<compile_context>
chip_gen: v6e
topology: v6e:2x2x1
jax: 0.10.0
libtpu: 0.0.40
codegen_flags: <defaults>
</compile_context>

<pallas_src>
import functools

import jax
import jax.numpy as jnp
from jax import lax
from jax.experimental import pallas as pl
from jax.experimental.pallas import tpu as pltpu

BN_EPS = 1e-5
LN_EPS = 1e-5
OUT_PAD = 128  # lane-dense HBM output width (sliced back to out_features in wrapper)


def _bf16(a):
    return a.astype(jnp.bfloat16)


# --------------------------- fused forward kernel -----------------------------
def gcn_fused_kernel(adj_ref, x_ref, gw1_ref, gw234_ref, lng_ref, lnb_ref,
                     wqkv_ref, bqkv_ref, wo_ref, bo_ref,
                     w1_ref, b1_ref, w2_ref, b2_ref, w3_ref, b3_ref,
                     o_ref, *, num_heads):
    f32 = jnp.float32
    adj = adj_ref[...]                          # (Bt, N, N) bf16, pre-normalized
    h = x_ref[...]                              # (Bt, N, Fin) f32
    Bt, N, _ = adj.shape
    H = wo_ref.shape[0]
    D = H // num_heads

    # ---- 4x GCNLayer (+ fused ReLU from GCN.forward). BN(eval) scale is folded
    #      into the weights in the wrapper; Dropout(eval) = identity. ----
    gcn_ws = (gw1_ref[...], gw234_ref[0], gw234_ref[1], gw234_ref[2])  # bf16
    for i in range(4):
        # per-graph aggregation: (N,N) @ (N,F), batched over the Bt graphs
        t = jnp.einsum('bij,bjf->bif', adj, _bf16(h),
                       preferred_element_type=f32)                    # (Bt,N,Fi)
        # shared-weight matmul on the flattened (Bt*N, Fi) slab
        g = jnp.dot(_bf16(t.reshape(Bt * N, t.shape[-1])), gcn_ws[i],
                    preferred_element_type=f32)                        # (Bt*N, H)
        # LayerNorm over feature dim (f32 elementwise)
        mu = jnp.mean(g, axis=-1, keepdims=True)
        var = jnp.mean(jnp.square(g - mu), axis=-1, keepdims=True)
        g = (g - mu) * lax.rsqrt(var + LN_EPS)
        g = g * lng_ref[i] + lnb_ref[i]
        g = jnp.maximum(g, 0.0)                                        # ReLU
        h = g.reshape(Bt, N, H)

    # ---- MultiheadAttention: fused qkv projection, per-head softmax core,
    #      fused concat-heads output projection, then mean pool over nodes ----
    h_flat = h.reshape(Bt * N, H)
    # 1/sqrt(d_head) is pre-folded into the q columns of wqkv/bqkv in the wrapper.
    qkv = jnp.dot(_bf16(h_flat), wqkv_ref[...],
                  preferred_element_type=f32) + bqkv_ref[...]          # (Bt*N, 3H)
    ctx_heads = []
    for hd in range(num_heads):
        qh = qkv[:, hd * D:(hd + 1) * D].reshape(Bt, N, D)
        kh = qkv[:, H + hd * D:H + (hd + 1) * D].reshape(Bt, N, D)
        vh = qkv[:, 2 * H + hd * D:2 * H + (hd + 1) * D].reshape(Bt, N, D)
        s = jnp.einsum('bqd,bkd->bqk', _bf16(qh), _bf16(kh),
                       preferred_element_type=f32)                     # (Bt, N, N)
        s = s - jnp.max(s, axis=-1, keepdims=True)
        p = jnp.exp(s)
        p = p * pl.reciprocal(jnp.sum(p, axis=-1, keepdims=True), approx=True)
        ch = jnp.einsum('bqk,bkd->bqd', _bf16(p), _bf16(vh),
                        preferred_element_type=f32)                    # (Bt, N, D)
        ctx_heads.append(ch.reshape(Bt * N, D))
    ctx = jnp.concatenate(ctx_heads, axis=-1)                          # (Bt*N, H)
    attn = jnp.dot(_bf16(ctx), wo_ref[...],
                   preferred_element_type=f32) + bo_ref[...]           # (Bt*N, H)
    pooled = jnp.mean(attn.reshape(Bt, N, H), axis=1)                  # (Bt, H)

    # ---- 3-layer MLP head (fc3 columns zero-padded to OUT_PAD lanes) ----
    z = jnp.maximum(jnp.dot(_bf16(pooled), w1_ref[...],
                            preferred_element_type=f32) + b1_ref[...], 0.0)
    z = jnp.maximum(jnp.dot(_bf16(z), w2_ref[...],
                            preferred_element_type=f32) + b2_ref[...], 0.0)
    z = jnp.dot(_bf16(z), w3_ref[...],
                preferred_element_type=f32) + b3_ref[...]
    o_ref[...] = z                                                     # (Bt, OUT_PAD)


# ------------------------------- wrapper --------------------------------------
def gcn_forward(x, adj, pk, out_features, num_heads, block_b):
    B, N, Fin = x.shape
    Bt = block_b
    assert B % Bt == 0, (B, Bt)
    steps = B // Bt  # keep even for v7x 2-TC balance

    # Hoisted out of the kernel: A_norm = D^-1/2 A D^-1/2 computed once, shipped
    # bf16 (halves adjacency DMA bytes + double-buffered VMEM block).
    deg = jnp.sum(adj, axis=-1, keepdims=True)                 # (B, N, 1)
    dis = lax.rsqrt(deg)
    dis = jnp.where(jnp.isinf(dis), 0.0, dis)                  # isolated nodes -> 0
    adj_n = (adj * dis * jnp.swapaxes(dis, -1, -2)).astype(jnp.bfloat16)

    weight_keys = ("gw1", "gw234", "lng", "lnb", "wqkv", "bqkv", "wo", "bo",
                   "w1", "b1", "w2", "b2", "w3", "b3")

    def const_map(ndim):  # same block every grid step -> weights fetched once
        zeros = (0,) * ndim
        return lambda b: zeros

    out_pad = pl.pallas_call(
        functools.partial(gcn_fused_kernel, num_heads=num_heads),
        out_shape=jax.ShapeDtypeStruct((B, OUT_PAD), jnp.float32),
        grid=(steps,),
        in_specs=[
            pl.BlockSpec((Bt, N, N), lambda b: (b, 0, 0)),      # bf16 adjacency
            pl.BlockSpec((Bt, N, Fin), lambda b: (b, 0, 0)),    # f32 features
        ] + [pl.BlockSpec(pk[k].shape, const_map(pk[k].ndim)) for k in weight_keys],
        out_specs=pl.BlockSpec((Bt, OUT_PAD), lambda b: (b, 0)),
        compiler_params=pltpu.CompilerParams(
            dimension_semantics=("parallel",),          # v7x: split batch on 2 TCs
            vmem_limit_bytes=32 * 1024 * 1024),         # explicit v7x-safe budget
    )(adj_n, x, *[pk[k] for k in weight_keys])
    return out_pad[:, :out_features]


# ------------------------------- parameters -----------------------------------
def xavier_uniform(key, shape):
    fan_in, fan_out = shape
    bound = (6.0 / (fan_in + fan_out)) ** 0.5
    return jax.random.uniform(key, shape, jnp.float32, -bound, bound)


def init_params(key, in_features, hidden, out_features):
    ks = jax.random.split(key, 12)
    p = {}
    p["gcn_w"] = [
        xavier_uniform(ks[0], (in_features, hidden)),
        xavier_uniform(ks[1], (hidden, hidden)),
        xavier_uniform(ks[2], (hidden, hidden)),
        xavier_uniform(ks[3], (hidden, hidden)),
    ]
    p["ln_g"] = [jnp.ones((1, hidden), jnp.float32) for _ in range(4)]
    p["ln_b"] = [jnp.zeros((1, hidden), jnp.float32) for _ in range(4)]
    p["wq"] = xavier_uniform(ks[4], (hidden, hidden))
    p["wk"] = xavier_uniform(ks[5], (hidden, hidden))
    p["wv"] = xavier_uniform(ks[6], (hidden, hidden))
    p["bq"] = jnp.zeros((1, hidden), jnp.float32)
    p["bk"] = jnp.zeros((1, hidden), jnp.float32)
    p["bv"] = jnp.zeros((1, hidden), jnp.float32)
    p["wo"] = xavier_uniform(ks[7], (hidden, hidden))
    p["bo"] = jnp.zeros((1, hidden), jnp.float32)
    p["w1"] = xavier_uniform(ks[8], (hidden, hidden))
    p["b1"] = jnp.zeros((1, hidden), jnp.float32)
    p["w2"] = xavier_uniform(ks[9], (hidden, hidden))
    p["b2"] = jnp.zeros((1, hidden), jnp.float32)
    p["w3"] = xavier_uniform(ks[10], (hidden, out_features))
    p["b3"] = jnp.zeros((1, out_features), jnp.float32)
    return p


def pack_params(params, *, num_heads):
    """One-time repack: fold BN(eval) scale + attn 1/sqrt(d), fuse qkv weights,
    pad fc3 to lane-dense width, cast all MXU weights to bf16."""
    H = params["w1"].shape[0]
    O = params["w3"].shape[1]
    D = H // num_heads
    bn_c = (1.0 + BN_EPS) ** -0.5          # eval BatchNorm1d scale, folded into gcn_w
    scale = 1.0 / float(D) ** 0.5          # attention 1/sqrt(d_head), folded into q
    bf = jnp.bfloat16

    pk = {
        "gw1": (params["gcn_w"][0] * bn_c).astype(bf),
        "gw234": jnp.stack([params["gcn_w"][i] * bn_c for i in range(1, 4)]).astype(bf),
        "lng": jnp.stack([g.reshape(1, H) for g in params["ln_g"]]),    # (4,1,H) f32
        "lnb": jnp.stack([b.reshape(1, H) for b in params["ln_b"]]),    # (4,1,H) f32
        "wqkv": jnp.concatenate([params["wq"] * scale, params["wk"], params["wv"]],
                                axis=1).astype(bf),                     # (H, 3H) bf16
        "bqkv": jnp.concatenate([params["bq"] * scale, params["bk"], params["bv"]],
                                axis=1),                                # (1, 3H) f32
        "wo": params["wo"].astype(bf),
        "bo": params["bo"].reshape(1, H),
        "w1": params["w1"].astype(bf), "b1": params["b1"].reshape(1, H),
        "w2": params["w2"].astype(bf), "b2": params["b2"].reshape(1, H),
        "w3": jnp.zeros((H, OUT_PAD), jnp.float32).at[:, :O]
                 .set(params["w3"]).astype(bf),
        "b3": jnp.zeros((1, OUT_PAD), jnp.float32).at[:, :O].set(params["b3"]),
    }
    return pk


# --------------------------------- main ----------------------------------------
if __name__ == "__main__":
    B, N = 16, 16
    in_features, hidden_features, out_features = 16, 32, 8
    num_heads = 4
    Bt = 8          # graphs per grid step -> Bt*N = 128 rows, 2 (even) grid steps

    key = jax.random.PRNGKey(0)
    kx, kadj, kparams = jax.random.split(key, 3)
    x = jax.random.normal(kx, (B, N, in_features), jnp.float32)
    # non-negative adjacency so degree^(-1/2) is well-defined
    adj = jax.random.uniform(kadj, (B, N, N), jnp.float32)

    params = init_params(kparams, in_features, hidden_features, out_features)
    pk = pack_params(params, num_heads=num_heads)

    fwd = jax.jit(gcn_forward, static_argnums=(3, 4, 5))
    out = fwd(x, adj, pk, out_features, num_heads, Bt)
    out = jax.block_until_ready(out)
    assert out.shape == (B, out_features), out.shape
    assert bool(jnp.all(jnp.isfinite(out)))
    print("KERNEL_OK")
</pallas_src>

<mosaic_0001>
module attributes {stable_mosaic.version = 11 : i64} {
  func.func @gcn_fused_kernel(%arg0: i32, %arg1: memref<8x16x16xbf16, #tpu.memory_space<vmem>>, %arg2: memref<8x16x16xf32, #tpu.memory_space<vmem>>, %arg3: memref<16x32xbf16, #tpu.memory_space<vmem>>, %arg4: memref<3x32x32xbf16, #tpu.memory_space<vmem>>, %arg5: memref<4x1x32xf32, #tpu.memory_space<vmem>>, %arg6: memref<4x1x32xf32, #tpu.memory_space<vmem>>, %arg7: memref<32x96xbf16, #tpu.memory_space<vmem>>, %arg8: memref<1x96xf32, #tpu.memory_space<vmem>>, %arg9: memref<32x32xbf16, #tpu.memory_space<vmem>>, %arg10: memref<1x32xf32, #tpu.memory_space<vmem>>, %arg11: memref<32x32xbf16, #tpu.memory_space<vmem>>, %arg12: memref<1x32xf32, #tpu.memory_space<vmem>>, %arg13: memref<32x32xbf16, #tpu.memory_space<vmem>>, %arg14: memref<1x32xf32, #tpu.memory_space<vmem>>, %arg15: memref<32x128xbf16, #tpu.memory_space<vmem>>, %arg16: memref<1x128xf32, #tpu.memory_space<vmem>>, %arg17: memref<8x128xf32, #tpu.memory_space<vmem>>) attributes {dimension_semantics = [#tpu.dimension_semantics<parallel>], iteration_bounds = array<i64: 2>, scalar_prefetch = 0 : i64, scratch_operands = 0 : i64, tpu.core_type = #tpu.core_type<tc>, window_params = [{transform_indices = @transform_0, window_bounds = array<i64: 8, 16, 16>}, {transform_indices = @transform_1, window_bounds = array<i64: 8, 16, 16>}, {pipeline_mode = #tpu.pipeline_mode<synchronous>, transform_indices = @transform_2, window_bounds = array<i64: 16, 32>}, {pipeline_mode = #tpu.pipeline_mode<synchronous>, transform_indices = @transform_3, window_bounds = array<i64: 3, 32, 32>}, {pipeline_mode = #tpu.pipeline_mode<synchronous>, transform_indices = @transform_4, window_bounds = array<i64: 4, 1, 32>}, {pipeline_mode = #tpu.pipeline_mode<synchronous>, transform_indices = @transform_5, window_bounds = array<i64: 4, 1, 32>}, {pipeline_mode = #tpu.pipeline_mode<synchronous>, transform_indices = @transform_6, window_bounds = array<i64: 32, 96>}, {pipeline_mode = #tpu.pipeline_mode<synchronous>, transform_indices = @transform_7, window_bounds = array<i64: 1, 96>}, {pipeline_mode = #tpu.pipeline_mode<synchronous>, transform_indices = @transform_8, window_bounds = array<i64: 32, 32>}, {pipeline_mode = #tpu.pipeline_mode<synchronous>, transform_indices = @transform_9, window_bounds = array<i64: 1, 32>}, {pipeline_mode = #tpu.pipeline_mode<synchronous>, transform_indices = @transform_10, window_bounds = array<i64: 32, 32>}, {pipeline_mode = #tpu.pipeline_mode<synchronous>, transform_indices = @transform_11, window_bounds = array<i64: 1, 32>}, {pipeline_mode = #tpu.pipeline_mode<synchronous>, transform_indices = @transform_12, window_bounds = array<i64: 32, 32>}, {pipeline_mode = #tpu.pipeline_mode<synchronous>, transform_indices = @transform_13, window_bounds = array<i64: 1, 32>}, {pipeline_mode = #tpu.pipeline_mode<synchronous>, transform_indices = @transform_14, window_bounds = array<i64: 32, 128>}, {pipeline_mode = #tpu.pipeline_mode<synchronous>, transform_indices = @transform_15, window_bounds = array<i64: 1, 128>}, {transform_indices = @transform_16, window_bounds = array<i64: 8, 128>}]} {
    %c0 = arith.constant 0 : index
    %c0_0 = arith.constant 0 : index
    %c0_1 = arith.constant 0 : index
    %0 = vector.load %arg1[%c0, %c0_0, %c0_1] : memref<8x16x16xbf16, #tpu.memory_space<vmem>>, vector<8x16x16xbf16>
    %c0_2 = arith.constant 0 : index
    %c0_3 = arith.constant 0 : index
    %c0_4 = arith.constant 0 : index
    %1 = vector.load %arg2[%c0_2, %c0_3, %c0_4] : memref<8x16x16xf32, #tpu.memory_space<vmem>>, vector<8x16x16xf32>
    %c0_5 = arith.constant 0 : index
    %c0_6 = arith.constant 0 : index
    %2 = vector.load %arg3[%c0_5, %c0_6] : memref<16x32xbf16, #tpu.memory_space<vmem>>, vector<16x32xbf16>
    %c0_7 = arith.constant 0 : index
    %c0_8 = arith.constant 0 : index
    %c0_9 = arith.constant 0 : index
    %3 = vector.load %arg4[%c0_7, %c0_8, %c0_9] : memref<3x32x32xbf16, #tpu.memory_space<vmem>>, vector<1x32x32xbf16>
    %4 = vector.shape_cast %3 : vector<1x32x32xbf16> to vector<32x32xbf16>
    %c1 = arith.constant 1 : index
    %c0_10 = arith.constant 0 : index
    %c0_11 = arith.constant 0 : index
    %5 = vector.load %arg4[%c1, %c0_10, %c0_11] : memref<3x32x32xbf16, #tpu.memory_space<vmem>>, vector<1x32x32xbf16>
    %6 = vector.shape_cast %5 : vector<1x32x32xbf16> to vector<32x32xbf16>
    %c2 = arith.constant 2 : index
    %c0_12 = arith.constant 0 : index
    %c0_13 = arith.constant 0 : index
    %7 = vector.load %arg4[%c2, %c0_12, %c0_13] : memref<3x32x32xbf16, #tpu.memory_space<vmem>>, vector<1x32x32xbf16>
    %8 = vector.shape_cast %7 : vector<1x32x32xbf16> to vector<32x32xbf16>
    %9 = arith.truncf %1 : vector<8x16x16xf32> to vector<8x16x16xbf16>
    "tpu.trace_start"() <{level = 10 : i32, message = "bij,bjf->bif"}> : () -> ()
    %cst = arith.constant dense<0.000000e+00> : vector<8x16x16xf32>
    %10 = tpu.matmul %0, %9, %cst {dimension_numbers = #tpu.dot_dimension_numbers<[2], [1], [1], [2], [0, 0, 0, 1, 1, 2], [0], [0]>} : vector<8x16x16xbf16>, vector<8x16x16xbf16>, vector<8x16x16xf32> -> vector<8x16x16xf32>
    "tpu.trace_stop"() : () -> ()
    %11 = vector.shape_cast %10 : vector<8x16x16xf32> to vector<128x16xf32>
    %12 = arith.truncf %11 : vector<128x16xf32> to vector<128x16xbf16>
    %cst_14 = arith.constant dense<0.000000e+00> : vector<128x32xf32>
    %13 = tpu.matmul %12, %2, %cst_14 {dimension_numbers = #tpu.dot_dimension_numbers<[1], [0], [0], [1], [0, 0, 1, 1], [], []>} : vector<128x16xbf16>, vector<16x32xbf16>, vector<128x32xf32> -> vector<128x32xf32>
    %cst_15 = arith.constant dense<0.000000e+00> : vector<128xf32>
    %14 = vector.multi_reduction <add>, %13, %cst_15 [1] : vector<128x32xf32> to vector<128xf32>
    %15 = vector.shape_cast %14 : vector<128xf32> to vector<128x1xf32>
    %cst_16 = arith.constant 3.200000e+01 : f32
    %16 = vector.broadcast %cst_16 : f32 to vector<128x1xf32>
    %17 = arith.divf %15, %16 : vector<128x1xf32>
    %18 = vector.broadcast %17 : vector<128x1xf32> to vector<128x32xf32>
    %19 = arith.subf %13, %18 : vector<128x32xf32>
    %20 = arith.mulf %19, %19 : vector<128x32xf32>
    %cst_17 = arith.constant dense<0.000000e+00> : vector<128xf32>
    %21 = vector.multi_reduction <add>, %20, %cst_17 [1] : vector<128x32xf32> to vector<128xf32>
    %22 = vector.shape_cast %21 : vector<128xf32> to vector<128x1xf32>
    %cst_18 = arith.constant 3.200000e+01 : f32
    %23 = vector.broadcast %cst_18 : f32 to vector<128x1xf32>
    %24 = arith.divf %22, %23 : vector<128x1xf32>
    %25 = vector.broadcast %17 : vector<128x1xf32> to vector<128x32xf32>
    %26 = arith.subf %13, %25 : vector<128x32xf32>
    %cst_19 = arith.constant 9.99999974E-6 : f32
    %27 = vector.broadcast %cst_19 : f32 to vector<128x1xf32>
    %28 = arith.addf %24, %27 : vector<128x1xf32>
    %29 = math.rsqrt %28 : vector<128x1xf32>
    %30 = vector.broadcast %29 : vector<128x1xf32> to vector<128x32xf32>
    %31 = arith.mulf %26, %30 : vector<128x32xf32>
    %c0_20 = arith.constant 0 : index
    %c0_21 = arith.constant 0 : index
    %c0_22 = arith.constant 0 : index
    %32 = vector.load %arg5[%c0_20, %c0_21, %c0_22] : memref<4x1x32xf32, #tpu.memory_space<vmem>>, vector<1x1x32xf32>
    %33 = vector.shape_cast %32 : vector<1x1x32xf32> to vector<1x32xf32>
    %34 = vector.broadcast %33 : vector<1x32xf32> to vector<128x32xf32>
    %35 = arith.mulf %31, %34 : vector<128x32xf32>
    %c0_23 = arith.constant 0 : index
    %c0_24 = arith.constant 0 : index
    %c0_25 = arith.constant 0 : index
    %36 = vector.load %arg6[%c0_23, %c0_24, %c0_25] : memref<4x1x32xf32, #tpu.memory_space<vmem>>, vector<1x1x32xf32>
    %37 = vector.shape_cast %36 : vector<1x1x32xf32> to vector<1x32xf32>
    %38 = vector.broadcast %37 : vector<1x32xf32> to vector<128x32xf32>
    %39 = arith.addf %35, %38 : vector<128x32xf32>
    %cst_26 = arith.constant 0.000000e+00 : f32
    %40 = vector.broadcast %cst_26 : f32 to vector<128x32xf32>
    %41 = arith.maximumf %39, %40 : vector<128x32xf32>
    %42 = vector.shape_cast %41 : vector<128x32xf32> to vector<8x16x32xf32>
    %43 = arith.truncf %42 : vector<8x16x32xf32> to vector<8x16x32xbf16>
    "tpu.trace_start"() <{level = 10 : i32, message = "bij,bjf->bif"}> : () -> ()
    %cst_27 = arith.constant dense<0.000000e+00> : vector<8x16x32xf32>
    %44 = tpu.matmul %0, %43, %cst_27 {dimension_numbers = #tpu.dot_dimension_numbers<[2], [1], [1], [2], [0, 0, 0, 1, 1, 2], [0], [0]>} : vector<8x16x16xbf16>, vector<8x16x32xbf16>, vector<8x16x32xf32> -> vector<8x16x32xf32>
    "tpu.trace_stop"() : () -> ()
    %45 = vector.shape_cast %44 : vector<8x16x32xf32> to vector<128x32xf32>
    %46 = arith.truncf %45 : vector<128x32xf32> to vector<128x32xbf16>
    %cst_28 = arith.constant dense<0.000000e+00> : vector<128x32xf32>
    %47 = tpu.matmul %46, %4, %cst_28 {dimension_numbers = #tpu.dot_dimension_numbers<[1], [0], [0], [1], [0, 0, 1, 1], [], []>} : vector<128x32xbf16>, vector<32x32xbf16>, vector<128x32xf32> -> vector<128x32xf32>
    %cst_29 = arith.constant dense<0.000000e+00> : vector<128xf32>
    %48 = vector.multi_reduction <add>, %47, %cst_29 [1] : vector<128x32xf32> to vector<128xf32>
    %49 = vector.shape_cast %48 : vector<128xf32> to vector<128x1xf32>
    %cst_30 = arith.constant 3.200000e+01 : f32
    %50 = vector.broadcast %cst_30 : f32 to vector<128x1xf32>
    %51 = arith.divf %49, %50 : vector<128x1xf32>
    %52 = vector.broadcast %51 : vector<128x1xf32> to vector<128x32xf32>
    %53 = arith.subf %47, %52 : vector<128x32xf32>
    %54 = arith.mulf %53, %53 : vector<128x32xf32>
    %cst_31 = arith.constant dense<0.000000e+00> : vector<128xf32>
    %55 = vector.multi_reduction <add>, %54, %cst_31 [1] : vector<128x32xf32> to vector<128xf32>
    %56 = vector.shape_cast %55 : vector<128xf32> to vector<128x1xf32>
    %cst_32 = arith.constant 3.200000e+01 : f32
    %57 = vector.broadcast %cst_32 : f32 to vector<128x1xf32>
    %58 = arith.divf %56, %57 : vector<128x1xf32>
    %59 = vector.broadcast %51 : vector<128x1xf32> to vector<128x32xf32>
    %60 = arith.subf %47, %59 : vector<128x32xf32>
    %cst_33 = arith.constant 9.99999974E-6 : f32
    %61 = vector.broadcast %cst_33 : f32 to vector<128x1xf32>
    %62 = arith.addf %58, %61 : vector<128x1xf32>
    %63 = math.rsqrt %62 : vector<128x1xf32>
    %64 = vector.broadcast %63 : vector<128x1xf32> to vector<128x32xf32>
    %65 = arith.mulf %60, %64 : vector<128x32xf32>
    %c1_34 = arith.constant 1 : index
    %c0_35 = arith.constant 0 : index
    %c0_36 = arith.constant 0 : index
    %66 = vector.load %arg5[%c1_34, %c0_35, %c0_36] : memref<4x1x32xf32, #tpu.memory_space<vmem>>, vector<1x1x32xf32>
    %67 = vector.shape_cast %66 : vector<1x1x32xf32> to vector<1x32xf32>
    %68 = vector.broadcast %67 : vector<1x32xf32> to vector<128x32xf32>
    %69 = arith.mulf %65, %68 : vector<128x32xf32>
    %c1_37 = arith.constant 1 : index
    %c0_38 = arith.constant 0 : index
    %c0_39 = arith.constant 0 : index
    %70 = vector.load %arg6[%c1_37, %c0_38, %c0_39] : memref<4x1x32xf32, #tpu.memory_space<vmem>>, vector<1x1x32xf32>
    %71 = vector.shape_cast %70 : vector<1x1x32xf32> to vector<1x32xf32>
    %72 = vector.broadcast %71 : vector<1x32xf32> to vector<128x32xf32>
    %73 = arith.addf %69, %72 : vector<128x32xf32>
    %cst_40 = arith.constant 0.000000e+00 : f32
    %74 = vector.broadcast %cst_40 : f32 to vector<128x32xf32>
    %75 = arith.maximumf %73, %74 : vector<128x32xf32>
    %76 = vector.shape_cast %75 : vector<128x32xf32> to vector<8x16x32xf32>
    %77 = arith.truncf %76 : vector<8x16x32xf32> to vector<8x16x32xbf16>
    "tpu.trace_start"() <{level = 10 : i32, message = "bij,bjf->bif"}> : () -> ()
    %cst_41 = arith.constant dense<0.000000e+00> : vector<8x16x32xf32>
    %78 = tpu.matmul %0, %77, %cst_41 {dimension_numbers = #tpu.dot_dimension_numbers<[2], [1], [1], [2], [0, 0, 0, 1, 1, 2], [0], [0]>} : vector<8x16x16xbf16>, vector<8x16x32xbf16>, vector<8x16x32xf32> -> vector<8x16x32xf32>
    "tpu.trace_stop"() : () -> ()
    %79 = vector.shape_cast %78 : vector<8x16x32xf32> to vector<128x32xf32>
    %80 = arith.truncf %79 : vector<128x32xf32> to vector<128x32xbf16>
    %cst_42 = arith.constant dense<0.000000e+00> : vector<128x32xf32>
    %81 = tpu.matmul %80, %6, %cst_42 {dimension_numbers = #tpu.dot_dimension_numbers<[1], [0], [0], [1], [0, 0, 1, 1], [], []>} : vector<128x32xbf16>, vector<32x32xbf16>, vector<128x32xf32> -> vector<128x32xf32>
    %cst_43 = arith.constant dense<0.000000e+00> : vector<128xf32>
    %82 = vector.multi_reduction <add>, %81, %cst_43 [1] : vector<128x32xf32> to vector<128xf32>
    %83 = vector.shape_cast %82 : vector<128xf32> to vector<128x1xf32>
    %cst_44 = arith.constant 3.200000e+01 : f32
    %84 = vector.broadcast %cst_44 : f32 to vector<128x1xf32>
    %85 = arith.divf %83, %84 : vector<128x1xf32>
    %86 = vector.broadcast %85 : vector<128x1xf32> to vector<128x32xf32>
    %87 = arith.subf %81, %86 : vector<128x32xf32>
    %88 = arith.mulf %87, %87 : vector<128x32xf32>
    %cst_45 = arith.constant dense<0.000000e+00> : vector<128xf32>
    %89 = vector.multi_reduction <add>, %88, %cst_45 [1] : vector<128x32xf32> to vector<128xf32>
    %90 = vector.shape_cast %89 : vector<128xf32> to vector<128x1xf32>
    %cst_46 = arith.constant 3.200000e+01 : f32
    %91 = vector.broadcast %cst_46 : f32 to vector<128x1xf32>
    %92 = arith.divf %90, %91 : vector<128x1xf32>
    %93 = vector.broadcast %85 : vector<128x1xf32> to vector<128x32xf32>
    %94 = arith.subf %81, %93 : vector<128x32xf32>
    %cst_47 = arith.constant 9.99999974E-6 : f32
    %95 = vector.broadcast %cst_47 : f32 to vector<128x1xf32>
    %96 = arith.addf %92, %95 : vector<128x1xf32>
    %97 = math.rsqrt %96 : vector<128x1xf32>
    %98 = vector.broadcast %97 : vector<128x1xf32> to vector<128x32xf32>
    %99 = arith.mulf %94, %98 : vector<128x32xf32>
    %c2_48 = arith.constant 2 : index
    %c0_49 = arith.constant 0 : index
    %c0_50 = arith.constant 0 : index
    %100 = vector.load %arg5[%c2_48, %c0_49, %c0_50] : memref<4x1x32xf32, #tpu.memory_space<vmem>>, vector<1x1x32xf32>
    %101 = vector.shape_cast %100 : vector<1x1x32xf32> to vector<1x32xf32>
    %102 = vector.broadcast %101 : vector<1x32xf32> to vector<128x32xf32>
    %103 = arith.mulf %99, %102 : vector<128x32xf32>
    %c2_51 = arith.constant 2 : index
    %c0_52 = arith.constant 0 : index
    %c0_53 = arith.constant 0 : index
    %104 = vector.load %arg6[%c2_51, %c0_52, %c0_53] : memref<4x1x32xf32, #tpu.memory_space<vmem>>, vector<1x1x32xf32>
    %105 = vector.shape_cast %104 : vector<1x1x32xf32> to vector<1x32xf32>
    %106 = vector.broadcast %105 : vector<1x32xf32> to vector<128x32xf32>
    %107 = arith.addf %103, %106 : vector<128x32xf32>
    %cst_54 = arith.constant 0.000000e+00 : f32
    %108 = vector.broadcast %cst_54 : f32 to vector<128x32xf32>
    %109 = arith.maximumf %107, %108 : vector<128x32xf32>
    %110 = vector.shape_cast %109 : vector<128x32xf32> to vector<8x16x32xf32>
    %111 = arith.truncf %110 : vector<8x16x32xf32> to vector<8x16x32xbf16>
    "tpu.trace_start"() <{level = 10 : i32, message = "bij,bjf->bif"}> : () -> ()
    %cst_55 = arith.constant dense<0.000000e+00> : vector<8x16x32xf32>
    %112 = tpu.matmul %0, %111, %cst_55 {dimension_numbers = #tpu.dot_dimension_numbers<[2], [1], [1], [2], [0, 0, 0, 1, 1, 2], [0], [0]>} : vector<8x16x16xbf16>, vector<8x16x32xbf16>, vector<8x16x32xf32> -> vector<8x16x32xf32>
    "tpu.trace_stop"() : () -> ()
    %113 = vector.shape_cast %112 : vector<8x16x32xf32> to vector<128x32xf32>
    %114 = arith.truncf %113 : vector<128x32xf32> to vector<128x32xbf16>
    %cst_56 = arith.constant dense<0.000000e+00> : vector<128x32xf32>
    %115 = tpu.matmul %114, %8, %cst_56 {dimension_numbers = #tpu.dot_dimension_numbers<[1], [0], [0], [1], [0, 0, 1, 1], [], []>} : vector<128x32xbf16>, vector<32x32xbf16>, vector<128x32xf32> -> vector<128x32xf32>
    %cst_57 = arith.constant dense<0.000000e+00> : vector<128xf32>
    %116 = vector.multi_reduction <add>, %115, %cst_57 [1] : vector<128x32xf32> to vector<128xf32>
    %117 = vector.shape_cast %116 : vector<128xf32> to vector<128x1xf32>
    %cst_58 = arith.constant 3.200000e+01 : f32
    %118 = vector.broadcast %cst_58 : f32 to vector<128x1xf32>
    %119 = arith.divf %117, %118 : vector<128x1xf32>
    %120 = vector.broadcast %119 : vector<128x1xf32> to vector<128x32xf32>
    %121 = arith.subf %115, %120 : vector<128x32xf32>
    %122 = arith.mulf %121, %121 : vector<128x32xf32>
    %cst_59 = arith.constant dense<0.000000e+00> : vector<128xf32>
    %123 = vector.multi_reduction <add>, %122, %cst_59 [1] : vector<128x32xf32> to vector<128xf32>
    %124 = vector.shape_cast %123 : vector<128xf32> to vector<128x1xf32>
    %cst_60 = arith.constant 3.200000e+01 : f32
    %125 = vector.broadcast %cst_60 : f32 to vector<128x1xf32>
    %126 = arith.divf %124, %125 : vector<128x1xf32>
    %127 = vector.broadcast %119 : vector<128x1xf32> to vector<128x32xf32>
    %128 = arith.subf %115, %127 : vector<128x32xf32>
    %cst_61 = arith.constant 9.99999974E-6 : f32
    %129 = vector.broadcast %cst_61 : f32 to vector<128x1xf32>
    %130 = arith.addf %126, %129 : vector<128x1xf32>
    %131 = math.rsqrt %130 : vector<128x1xf32>
    %132 = vector.broadcast %131 : vector<128x1xf32> to vector<128x32xf32>
    %133 = arith.mulf %128, %132 : vector<128x32xf32>
    %c3 = arith.constant 3 : index
    %c0_62 = arith.constant 0 : index
    %c0_63 = arith.constant 0 : index
    %134 = vector.load %arg5[%c3, %c0_62, %c0_63] : memref<4x1x32xf32, #tpu.memory_space<vmem>>, vector<1x1x32xf32>
    %135 = vector.shape_cast %134 : vector<1x1x32xf32> to vector<1x32xf32>
    %136 = vector.broadcast %135 : vector<1x32xf32> to vector<128x32xf32>
    %137 = arith.mulf %133, %136 : vector<128x32xf32>
    %c3_64 = arith.constant 3 : index
    %c0_65 = arith.constant 0 : index
    %c0_66 = arith.constant 0 : index
    %138 = vector.load %arg6[%c3_64, %c0_65, %c0_66] : memref<4x1x32xf32, #tpu.memory_space<vmem>>, vector<1x1x32xf32>
    %139 = vector.shape_cast %138 : vector<1x1x32xf32> to vector<1x32xf32>
    %140 = vector.broadcast %139 : vector<1x32xf32> to vector<128x32xf32>
    %141 = arith.addf %137, %140 : vector<128x32xf32>
    %cst_67 = arith.constant 0.000000e+00 : f32
    %142 = vector.broadcast %cst_67 : f32 to vector<128x32xf32>
    %143 = arith.maximumf %141, %142 : vector<128x32xf32>
    %144 = vector.shape_cast %143 : vector<128x32xf32> to vector<8x16x32xf32>
    %145 = vector.shape_cast %144 : vector<8x16x32xf32> to vector<128x32xf32>
    %146 = arith.truncf %145 : vector<128x32xf32> to vector<128x32xbf16>
    %c0_68 = arith.constant 0 : index
    %c0_69 = arith.constant 0 : index
    %147 = vector.load %arg7[%c0_68, %c0_69] : memref<32x96xbf16, #tpu.memory_space<vmem>>, vector<32x96xbf16>
    %cst_70 = arith.constant dense<0.000000e+00> : vector<128x96xf32>
    %148 = tpu.matmul %146, %147, %cst_70 {dimension_numbers = #tpu.dot_dimension_numbers<[1], [0], [0], [1], [0, 0, 1, 1], [], []>} : vector<128x32xbf16>, vector<32x96xbf16>, vector<128x96xf32> -> vector<128x96xf32>
    %c0_71 = arith.constant 0 : index
    %c0_72 = arith.constant 0 : index
    %149 = vector.load %arg8[%c0_71, %c0_72] : memref<1x96xf32, #tpu.memory_space<vmem>>, vector<1x96xf32>
    %150 = vector.broadcast %149 : vector<1x96xf32> to vector<128x96xf32>
    %151 = arith.addf %148, %150 : vector<128x96xf32>
    %152 = vector.extract_strided_slice %151 {offsets = [0, 0], sizes = [128, 8], strides = [1, 1]} : vector<128x96xf32> to vector<128x8xf32>
    %153 = vector.shape_cast %152 : vector<128x8xf32> to vector<8x16x8xf32>
    %154 = vector.extract_strided_slice %151 {offsets = [0, 32], sizes = [128, 8], strides = [1, 1]} : vector<128x96xf32> to vector<128x8xf32>
    %155 = vector.shape_cast %154 : vector<128x8xf32> to vector<8x16x8xf32>
    %156 = vector.extract_strided_slice %151 {offsets = [0, 64], sizes = [128, 8], strides = [1, 1]} : vector<128x96xf32> to vector<128x8xf32>
    %157 = vector.shape_cast %156 : vector<128x8xf32> to vector<8x16x8xf32>
    %158 = arith.truncf %153 : vector<8x16x8xf32> to vector<8x16x8xbf16>
    %159 = arith.truncf %155 : vector<8x16x8xf32> to vector<8x16x8xbf16>
    "tpu.trace_start"() <{level = 10 : i32, message = "bqd,bkd->bqk"}> : () -> ()
    %cst_73 = arith.constant dense<0.000000e+00> : vector<8x16x16xf32>
    %160 = tpu.matmul %158, %159, %cst_73 {dimension_numbers = #tpu.dot_dimension_numbers<[2], [2], [1], [1], [0, 0, 0, 1, 1, 1], [0], [0]>} : vector<8x16x8xbf16>, vector<8x16x8xbf16>, vector<8x16x16xf32> -> vector<8x16x16xf32>
    "tpu.trace_stop"() : () -> ()
    %cst_74 = arith.constant dense<0xFF800000> : vector<8x16xf32>
    %161 = vector.multi_reduction <maximumf>, %160, %cst_74 [2] : vector<8x16x16xf32> to vector<8x16xf32>
    %162 = vector.shape_cast %161 : vector<8x16xf32> to vector<8x16x1xf32>
    %163 = vector.broadcast %162 : vector<8x16x1xf32> to vector<8x16x16xf32>
    %164 = arith.subf %160, %163 : vector<8x16x16xf32>
    %165 = math.exp %164 : vector<8x16x16xf32>
    %cst_75 = arith.constant dense<0.000000e+00> : vector<8x16xf32>
    %166 = vector.multi_reduction <add>, %165, %cst_75 [2] : vector<8x16x16xf32> to vector<8x16xf32>
    %167 = vector.shape_cast %166 : vector<8x16xf32> to vector<8x16x1xf32>
    %168 = tpu.reciprocal %167 {approx = true} : vector<8x16x1xf32> -> vector<8x16x1xf32>
    %169 = vector.broadcast %168 : vector<8x16x1xf32> to vector<8x16x16xf32>
    %170 = arith.mulf %165, %169 : vector<8x16x16xf32>
    %171 = arith.truncf %170 : vector<8x16x16xf32> to vector<8x16x16xbf16>
    %172 = arith.truncf %157 : vector<8x16x8xf32> to vector<8x16x8xbf16>
    "tpu.trace_start"() <{level = 10 : i32, message = "bqk,bkd->bqd"}> : () -> ()
    %cst_76 = arith.constant dense<0.000000e+00> : vector<8x16x8xf32>
    %173 = tpu.matmul %171, %172, %cst_76 {dimension_numbers = #tpu.dot_dimension_numbers<[2], [1], [1], [2], [0, 0, 0, 1, 1, 2], [0], [0]>} : vector<8x16x16xbf16>, vector<8x16x8xbf16>, vector<8x16x8xf32> -> vector<8x16x8xf32>
    "tpu.trace_stop"() : () -> ()
    %174 = vector.shape_cast %173 : vector<8x16x8xf32> to vector<128x8xf32>
    %175 = vector.extract_strided_slice %151 {offsets = [0, 8], sizes = [128, 8], strides = [1, 1]} : vector<128x96xf32> to vector<128x8xf32>
    %176 = vector.shape_cast %175 : vector<128x8xf32> to vector<8x16x8xf32>
    %177 = vector.extract_strided_slice %151 {offsets = [0, 40], sizes = [128, 8], strides = [1, 1]} : vector<128x96xf32> to vector<128x8xf32>
    %178 = vector.shape_cast %177 : vector<128x8xf32> to vector<8x16x8xf32>
    %179 = vector.extract_strided_slice %151 {offsets = [0, 72], sizes = [128, 8], strides = [1, 1]} : vector<128x96xf32> to vector<128x8xf32>
    %180 = vector.shape_cast %179 : vector<128x8xf32> to vector<8x16x8xf32>
    %181 = arith.truncf %176 : vector<8x16x8xf32> to vector<8x16x8xbf16>
    %182 = arith.truncf %178 : vector<8x16x8xf32> to vector<8x16x8xbf16>
    "tpu.trace_start"() <{level = 10 : i32, message = "bqd,bkd->bqk"}> : () -> ()
    %cst_77 = arith.constant dense<0.000000e+00> : vector<8x16x16xf32>
    %183 = tpu.matmul %181, %182, %cst_77 {dimension_numbers = #tpu.dot_dimension_numbers<[2], [2], [1], [1], [0, 0, 0, 1, 1, 1], [0], [0]>} : vector<8x16x8xbf16>, vector<8x16x8xbf16>, vector<8x16x16xf32> -> vector<8x16x16xf32>
    "tpu.trace_stop"() : () -> ()
    %cst_78 = arith.constant dense<0xFF800000> : vector<8x16xf32>
    %184 = vector.multi_reduction <maximumf>, %183, %cst_78 [2] : vector<8x16x16xf32> to vector<8x16xf32>
    %185 = vector.shape_cast %184 : vector<8x16xf32> to vector<8x16x1xf32>
    %186 = vector.broadcast %185 : vector<8x16x1xf32> to vector<8x16x16xf32>
    %187 = arith.subf %183, %186 : vector<8x16x16xf32>
    %188 = math.exp %187 : vector<8x16x16xf32>
    %cst_79 = arith.constant dense<0.000000e+00> : vector<8x16xf32>
    %189 = vector.multi_reduction <add>, %188, %cst_79 [2] : vector<8x16x16xf32> to vector<8x16xf32>
    %190 = vector.shape_cast %189 : vector<8x16xf32> to vector<8x16x1xf32>
    %191 = tpu.reciprocal %190 {approx = true} : vector<8x16x1xf32> -> vector<8x16x1xf32>
    %192 = vector.broadcast %191 : vector<8x16x1xf32> to vector<8x16x16xf32>
    %193 = arith.mulf %188, %192 : vector<8x16x16xf32>
    %194 = arith.truncf %193 : vector<8x16x16xf32> to vector<8x16x16xbf16>
    %195 = arith.truncf %180 : vector<8x16x8xf32> to vector<8x16x8xbf16>
    "tpu.trace_start"() <{level = 10 : i32, message = "bqk,bkd->bqd"}> : () -> ()
    %cst_80 = arith.constant dense<0.000000e+00> : vector<8x16x8xf32>
    %196 = tpu.matmul %194, %195, %cst_80 {dimension_numbers = #tpu.dot_dimension_numbers<[2], [1], [1], [2], [0, 0, 0, 1, 1, 2], [0], [0]>} : vector<8x16x16xbf16>, vector<8x16x8xbf16>, vector<8x16x8xf32> -> vector<8x16x8xf32>
    "tpu.trace_stop"() : () -> ()
    %197 = vector.shape_cast %196 : vector<8x16x8xf32> to vector<128x8xf32>
    %198 = vector.extract_strided_slice %151 {offsets = [0, 16], sizes = [128, 8], strides = [1, 1]} : vector<128x96xf32> to vector<128x8xf32>
    %199 = vector.shape_cast %198 : vector<128x8xf32> to vector<8x16x8xf32>
    %200 = vector.extract_strided_slice %151 {offsets = [0, 48], sizes = [128, 8], strides = [1, 1]} : vector<128x96xf32> to vector<128x8xf32>
    %201 = vector.shape_cast %200 : vector<128x8xf32> to vector<8x16x8xf32>
    %202 = vector.extract_strided_slice %151 {offsets = [0, 80], sizes = [128, 8], strides = [1, 1]} : vector<128x96xf32> to vector<128x8xf32>
    %203 = vector.shape_cast %202 : vector<128x8xf32> to vector<8x16x8xf32>
    %204 = arith.truncf %199 : vector<8x16x8xf32> to vector<8x16x8xbf16>
    %205 = arith.truncf %201 : vector<8x16x8xf32> to vector<8x16x8xbf16>
    "tpu.trace_start"() <{level = 10 : i32, message = "bqd,bkd->bqk"}> : () -> ()
    %cst_81 = arith.constant dense<0.000000e+00> : vector<8x16x16xf32>
    %206 = tpu.matmul %204, %205, %cst_81 {dimension_numbers = #tpu.dot_dimension_numbers<[2], [2], [1], [1], [0, 0, 0, 1, 1, 1], [0], [0]>} : vector<8x16x8xbf16>, vector<8x16x8xbf16>, vector<8x16x16xf32> -> vector<8x16x16xf32>
    "tpu.trace_stop"() : () -> ()
    %cst_82 = arith.constant dense<0xFF800000> : vector<8x16xf32>
    %207 = vector.multi_reduction <maximumf>, %206, %cst_82 [2] : vector<8x16x16xf32> to vector<8x16xf32>
    %208 = vector.shape_cast %207 : vector<8x16xf32> to vector<8x16x1xf32>
    %209 = vector.broadcast %208 : vector<8x16x1xf32> to vector<8x16x16xf32>
    %210 = arith.subf %206, %209 : vector<8x16x16xf32>
    %211 = math.exp %210 : vector<8x16x16xf32>
    %cst_83 = arith.constant dense<0.000000e+00> : vector<8x16xf32>
    %212 = vector.multi_reduction <add>, %211, %cst_83 [2] : vector<8x16x16xf32> to vector<8x16xf32>
    %213 = vector.shape_cast %212 : vector<8x16xf32> to vector<8x16x1xf32>
    %214 = tpu.reciprocal %213 {approx = true} : vector<8x16x1xf32> -> vector<8x16x1xf32>
    %215 = vector.broadcast %214 : vector<8x16x1xf32> to vector<8x16x16xf32>
    %216 = arith.mulf %211, %215 : vector<8x16x16xf32>
    %217 = arith.truncf %216 : vector<8x16x16xf32> to vector<8x16x16xbf16>
    %218 = arith.truncf %203 : vector<8x16x8xf32> to vector<8x16x8xbf16>
    "tpu.trace_start"() <{level = 10 : i32, message = "bqk,bkd->bqd"}> : () -> ()
    %cst_84 = arith.constant dense<0.000000e+00> : vector<8x16x8xf32>
    %219 = tpu.matmul %217, %218, %cst_84 {dimension_numbers = #tpu.dot_dimension_numbers<[2], [1], [1], [2], [0, 0, 0, 1, 1, 2], [0], [0]>} : vector<8x16x16xbf16>, vector<8x16x8xbf16>, vector<8x16x8xf32> -> vector<8x16x8xf32>
    "tpu.trace_stop"() : () -> ()
    %220 = vector.shape_cast %219 : vector<8x16x8xf32> to vector<128x8xf32>
    %221 = vector.extract_strided_slice %151 {offsets = [0, 24], sizes = [128, 8], strides = [1, 1]} : vector<128x96xf32> to vector<128x8xf32>
    %222 = vector.shape_cast %221 : vector<128x8xf32> to vector<8x16x8xf32>
    %223 = vector.extract_strided_slice %151 {offsets = [0, 56], sizes = [128, 8], strides = [1, 1]} : vector<128x96xf32> to vector<128x8xf32>
    %224 = vector.shape_cast %223 : vector<128x8xf32> to vector<8x16x8xf32>
    %225 = vector.extract_strided_slice %151 {offsets = [0, 88], sizes = [128, 8], strides = [1, 1]} : vector<128x96xf32> to vector<128x8xf32>
    %226 = vector.shape_cast %225 : vector<128x8xf32> to vector<8x16x8xf32>
    %227 = arith.truncf %222 : vector<8x16x8xf32> to vector<8x16x8xbf16>
    %228 = arith.truncf %224 : vector<8x16x8xf32> to vector<8x16x8xbf16>
    "tpu.trace_start"() <{level = 10 : i32, message = "bqd,bkd->bqk"}> : () -> ()
    %cst_85 = arith.constant dense<0.000000e+00> : vector<8x16x16xf32>
    %229 = tpu.matmul %227, %228, %cst_85 {dimension_numbers = #tpu.dot_dimension_numbers<[2], [2], [1], [1], [0, 0, 0, 1, 1, 1], [0], [0]>} : vector<8x16x8xbf16>, vector<8x16x8xbf16>, vector<8x16x16xf32> -> vector<8x16x16xf32>
    "tpu.trace_stop"() : () -> ()
    %cst_86 = arith.constant dense<0xFF800000> : vector<8x16xf32>
    %230 = vector.multi_reduction <maximumf>, %229, %cst_86 [2] : vector<8x16x16xf32> to vector<8x16xf32>
    %231 = vector.shape_cast %230 : vector<8x16xf32> to vector<8x16x1xf32>
    %232 = vector.broadcast %231 : vector<8x16x1xf32> to vector<8x16x16xf32>
    %233 = arith.subf %229, %232 : vector<8x16x16xf32>
    %234 = math.exp %233 : vector<8x16x16xf32>
    %cst_87 = arith.constant dense<0.000000e+00> : vector<8x16xf32>
    %235 = vector.multi_reduction <add>, %234, %cst_87 [2] : vector<8x16x16xf32> to vector<8x16xf32>
    %236 = vector.shape_cast %235 : vector<8x16xf32> to vector<8x16x1xf32>
    %237 = tpu.reciprocal %236 {approx = true} : vector<8x16x1xf32> -> vector<8x16x1xf32>
    %238 = vector.broadcast %237 : vector<8x16x1xf32> to vector<8x16x16xf32>
    %239 = arith.mulf %234, %238 : vector<8x16x16xf32>
    %240 = arith.truncf %239 : vector<8x16x16xf32> to vector<8x16x16xbf16>
    %241 = arith.truncf %226 : vector<8x16x8xf32> to vector<8x16x8xbf16>
    "tpu.trace_start"() <{level = 10 : i32, message = "bqk,bkd->bqd"}> : () -> ()
    %cst_88 = arith.constant dense<0.000000e+00> : vector<8x16x8xf32>
    %242 = tpu.matmul %240, %241, %cst_88 {dimension_numbers = #tpu.dot_dimension_numbers<[2], [1], [1], [2], [0, 0, 0, 1, 1, 2], [0], [0]>} : vector<8x16x16xbf16>, vector<8x16x8xbf16>, vector<8x16x8xf32> -> vector<8x16x8xf32>
    "tpu.trace_stop"() : () -> ()
    %243 = vector.shape_cast %242 : vector<8x16x8xf32> to vector<128x8xf32>
    %244 = tpu.concatenate %174, %197, %220, %243 in 1 : vector<128x8xf32>, vector<128x8xf32>, vector<128x8xf32>, vector<128x8xf32> -> vector<128x32xf32>
    %245 = arith.truncf %244 : vector<128x32xf32> to vector<128x32xbf16>
    %c0_89 = arith.constant 0 : index
    %c0_90 = arith.constant 0 : index
    %246 = vector.load %arg9[%c0_89, %c0_90] : memref<32x32xbf16, #tpu.memory_space<vmem>>, vector<32x32xbf16>
    %cst_91 = arith.constant dense<0.000000e+00> : vector<128x32xf32>
    %247 = tpu.matmul %245, %246, %cst_91 {dimension_numbers = #tpu.dot_dimension_numbers<[1], [0], [0], [1], [0, 0, 1, 1], [], []>} : vector<128x32xbf16>, vector<32x32xbf16>, vector<128x32xf32> -> vector<128x32xf32>
    %c0_92 = arith.constant 0 : index
    %c0_93 = arith.constant 0 : index
    %248 = vector.load %arg10[%c0_92, %c0_93] : memref<1x32xf32, #tpu.memory_space<vmem>>, vector<1x32xf32>
    %249 = vector.broadcast %248 : vector<1x32xf32> to vector<128x32xf32>
    %250 = arith.addf %247, %249 : vector<128x32xf32>
    %251 = vector.shape_cast %250 : vector<128x32xf32> to vector<8x16x32xf32>
    %cst_94 = arith.constant dense<0.000000e+00> : vector<8x32xf32>
    %252 = vector.multi_reduction <add>, %251, %cst_94 [1] : vector<8x16x32xf32> to vector<8x32xf32>
    %cst_95 = arith.constant 1.600000e+01 : f32
    %253 = vector.broadcast %cst_95 : f32 to vector<8x32xf32>
    %254 = arith.divf %252, %253 : vector<8x32xf32>
    %255 = arith.truncf %254 : vector<8x32xf32> to vector<8x32xbf16>
    %c0_96 = arith.constant 0 : index
    %c0_97 = arith.constant 0 : index
    %256 = vector.load %arg11[%c0_96, %c0_97] : memref<32x32xbf16, #tpu.memory_space<vmem>>, vector<32x32xbf16>
    %cst_98 = arith.constant dense<0.000000e+00> : vector<8x32xf32>
    %257 = tpu.matmul %255, %256, %cst_98 {dimension_numbers = #tpu.dot_dimension_numbers<[1], [0], [0], [1], [0, 0, 1, 1], [], []>} : vector<8x32xbf16>, vector<32x32xbf16>, vector<8x32xf32> -> vector<8x32xf32>
    %c0_99 = arith.constant 0 : index
    %c0_100 = arith.constant 0 : index
    %258 = vector.load %arg12[%c0_99, %c0_100] : memref<1x32xf32, #tpu.memory_space<vmem>>, vector<1x32xf32>
    %259 = vector.broadcast %258 : vector<1x32xf32> to vector<8x32xf32>
    %260 = arith.addf %257, %259 : vector<8x32xf32>
    %cst_101 = arith.constant 0.000000e+00 : f32
    %261 = vector.broadcast %cst_101 : f32 to vector<8x32xf32>
    %262 = arith.maximumf %260, %261 : vector<8x32xf32>
    %263 = arith.truncf %262 : vector<8x32xf32> to vector<8x32xbf16>
    %c0_102 = arith.constant 0 : index
    %c0_103 = arith.constant 0 : index
    %264 = vector.load %arg13[%c0_102, %c0_103] : memref<32x32xbf16, #tpu.memory_space<vmem>>, vector<32x32xbf16>
    %cst_104 = arith.constant dense<0.000000e+00> : vector<8x32xf32>
    %265 = tpu.matmul %263, %264, %cst_104 {dimension_numbers = #tpu.dot_dimension_numbers<[1], [0], [0], [1], [0, 0, 1, 1], [], []>} : vector<8x32xbf16>, vector<32x32xbf16>, vector<8x32xf32> -> vector<8x32xf32>
    %c0_105 = arith.constant 0 : index
    %c0_106 = arith.constant 0 : index
    %266 = vector.load %arg14[%c0_105, %c0_106] : memref<1x32xf32, #tpu.memory_space<vmem>>, vector<1x32xf32>
    %267 = vector.broadcast %266 : vector<1x32xf32> to vector<8x32xf32>
    %268 = arith.addf %265, %267 : vector<8x32xf32>
    %cst_107 = arith.constant 0.000000e+00 : f32
    %269 = vector.broadcast %cst_107 : f32 to vector<8x32xf32>
    %270 = arith.maximumf %268, %269 : vector<8x32xf32>
    %271 = arith.truncf %270 : vector<8x32xf32> to vector<8x32xbf16>
    %c0_108 = arith.constant 0 : index
    %c0_109 = arith.constant 0 : index
    %272 = vector.load %arg15[%c0_108, %c0_109] : memref<32x128xbf16, #tpu.memory_space<vmem>>, vector<32x128xbf16>
    %cst_110 = arith.constant dense<0.000000e+00> : vector<8x128xf32>
    %273 = tpu.matmul %271, %272, %cst_110 {dimension_numbers = #tpu.dot_dimension_numbers<[1], [0], [0], [1], [0, 0, 1, 1], [], []>} : vector<8x32xbf16>, vector<32x128xbf16>, vector<8x128xf32> -> vector<8x128xf32>
    %c0_111 = arith.constant 0 : index
    %c0_112 = arith.constant 0 : index
    %274 = vector.load %arg16[%c0_111, %c0_112] : memref<1x128xf32, #tpu.memory_space<vmem>>, vector<1x128xf32>
    %275 = vector.broadcast %274 : vector<1x128xf32> to vector<8x128xf32>
    %276 = arith.addf %273, %275 : vector<8x128xf32>
    %c0_113 = arith.constant 0 : index
    %c0_114 = arith.constant 0 : index
    %277 = vector.load %arg17[%c0_113, %c0_114] : memref<8x128xf32, #tpu.memory_space<vmem>>, vector<8x128xf32>
    tpu.vector_store %arg17[%c0_113, %c0_114], %276 {strides = array<i32>} : memref<8x128xf32, #tpu.memory_space<vmem>>, vector<8x128xf32>,
    return
  }
  func.func @transform_0(%arg0: i32) -> (i32, i32, i32) {
    %c0_i32 = arith.constant 0 : i32
    %c0_i32_0 = arith.constant 0 : i32
    %c0_i32_1 = arith.constant 0 : i32
    return %arg0, %c0_i32, %c0_i32_0 : i32, i32, i32
  }
  func.func @transform_1(%arg0: i32) -> (i32, i32, i32) {
    %c0_i32 = arith.constant 0 : i32
    %c0_i32_0 = arith.constant 0 : i32
    %c0_i32_1 = arith.constant 0 : i32
    return %arg0, %c0_i32, %c0_i32_0 : i32, i32, i32
  }
  func.func @transform_2(%arg0: i32) -> (i32, i32) {
    %c0_i32 = arith.constant 0 : i32
    %c0_i32_0 = arith.constant 0 : i32
    %c0_i32_1 = arith.constant 0 : i32
    return %c0_i32, %c0_i32_0 : i32, i32
  }
  func.func @transform_3(%arg0: i32) -> (i32, i32, i32) {
    %c0_i32 = arith.constant 0 : i32
    %c0_i32_0 = arith.constant 0 : i32
    %c0_i32_1 = arith.constant 0 : i32
    %c0_i32_2 = arith.constant 0 : i32
    return %c0_i32, %c0_i32_0, %c0_i32_1 : i32, i32, i32
  }
  func.func @transform_4(%arg0: i32) -> (i32, i32, i32) {
    %c0_i32 = arith.constant 0 : i32
    %c0_i32_0 = arith.constant 0 : i32
    %c0_i32_1 = arith.constant 0 : i32
    %c0_i32_2 = arith.constant 0 : i32
    return %c0_i32, %c0_i32_0, %c0_i32_1 : i32, i32, i32
  }
  func.func @transform_5(%arg0: i32) -> (i32, i32, i32) {
    %c0_i32 = arith.constant 0 : i32
    %c0_i32_0 = arith.constant 0 : i32
    %c0_i32_1 = arith.constant 0 : i32
    %c0_i32_2 = arith.constant 0 : i32
    return %c0_i32, %c0_i32_0, %c0_i32_1 : i32, i32, i32
  }
  func.func @transform_6(%arg0: i32) -> (i32, i32) {
    %c0_i32 = arith.constant 0 : i32
    %c0_i32_0 = arith.constant 0 : i32
    %c0_i32_1 = arith.constant 0 : i32
    return %c0_i32, %c0_i32_0 : i32, i32
  }
  func.func @transform_7(%arg0: i32) -> (i32, i32) {
    %c0_i32 = arith.constant 0 : i32
    %c0_i32_0 = arith.constant 0 : i32
    %c0_i32_1 = arith.constant 0 : i32
    return %c0_i32, %c0_i32_0 : i32, i32
  }
  func.func @transform_8(%arg0: i32) -> (i32, i32) {
    %c0_i32 = arith.constant 0 : i32
    %c0_i32_0 = arith.constant 0 : i32
    %c0_i32_1 = arith.constant 0 : i32
    return %c0_i32, %c0_i32_0 : i32, i32
  }
  func.func @transform_9(%arg0: i32) -> (i32, i32) {
    %c0_i32 = arith.constant 0 : i32
    %c0_i32_0 = arith.constant 0 : i32
    %c0_i32_1 = arith.constant 0 : i32
    return %c0_i32, %c0_i32_0 : i32, i32
  }
  func.func @transform_10(%arg0: i32) -> (i32, i32) {
    %c0_i32 = arith.constant 0 : i32
    %c0_i32_0 = arith.constant 0 : i32
    %c0_i32_1 = arith.constant 0 : i32
    return %c0_i32, %c0_i32_0 : i32, i32
  }
  func.func @transform_11(%arg0: i32) -> (i32, i32) {
    %c0_i32 = arith.constant 0 : i32
    %c0_i32_0 = arith.constant 0 : i32
    %c0_i32_1 = arith.constant 0 : i32
    return %c0_i32, %c0_i32_0 : i32, i32
  }
  func.func @transform_12(%arg0: i32) -> (i32, i32) {
    %c0_i32 = arith.constant 0 : i32
    %c0_i32_0 = arith.constant 0 : i32
    %c0_i32_1 = arith.constant 0 : i32
    return %c0_i32, %c0_i32_0 : i32, i32
  }
  func.func @transform_13(%arg0: i32) -> (i32, i32) {
    %c0_i32 = arith.constant 0 : i32
    %c0_i32_0 = arith.constant 0 : i32
    %c0_i32_1 = arith.constant 0 : i32
    return %c0_i32, %c0_i32_0 : i32, i32
  }
  func.func @transform_14(%arg0: i32) -> (i32, i32) {
    %c0_i32 = arith.constant 0 : i32
    %c0_i32_0 = arith.constant 0 : i32
    %c0_i32_1 = arith.constant 0 : i32
    return %c0_i32, %c0_i32_0 : i32, i32
  }
  func.func @transform_15(%arg0: i32) -> (i32, i32) {
    %c0_i32 = arith.constant 0 : i32
    %c0_i32_0 = arith.constant 0 : i32
    %c0_i32_1 = arith.constant 0 : i32
    return %c0_i32, %c0_i32_0 : i32, i32
  }
  func.func @transform_16(%arg0: i32) -> (i32, i32) {
    %c0_i32 = arith.constant 0 : i32
    %c0_i32_0 = arith.constant 0 : i32
    return %arg0, %c0_i32 : i32, i32
  }
}

</mosaic_0001>

<bundles_post_ra>
// kernel: gcn_forward.1
= control target key start
LH: loop header
LB: loop body
LE: loop exit
PB: predicated region body
PF: predicated region fallthrough
CT: control target
= control target key end

     0   :  { %s10323_s21 = smov 0   ;;  %s12964_s0 = inlined_call_operand.vmem [shape: bf16[16,16,16], index: 0, kind: input, shape index: {}]   ;;  %s12965_s1 = inlined_call_operand.vmem [shape: f32[16,16,16], index: 1, kind: input, shape index: {}]   ;;  %s12966_s2 = inlined_call_operand.vmem [shape: bf16[16,32], index: 2, kind: input, shape index: {}]   ;;  %s12967_s3 = inlined_call_operand.vmem [shape: bf16[3,32,32], index: 3, kind: input, shape index: {}]   ;;  %s12968_s4 = inlined_call_operand.vmem [shape: f32[4,1,32], index: 4, kind: input, shape index: {}]   ;;  %s12969_s5 = inlined_call_operand.vmem [shape: f32[4,1,32], index: 5, kind: input, shape index: {}]   ;;  %s12970_s6 = inlined_call_operand.vmem [shape: bf16[32,96], index: 6, kind: input, shape index: {}]   ;;  %s12971_s7 = inlined_call_operand.vmem [shape: f32[1,96], index: 7, kind: input, shape index: {}]   ;;  %s12972_s8 = inlined_call_operand.vmem [shape: bf16[32,32], index: 8, kind: input, shape index: {}]   ;;  %s12973_s9 = inlined_call_operand.vmem [shape: f32[1,32], index: 9, kind: input, shape index: {}]   ;;  %s12974_s10 = inlined_call_operand.vmem [shape: bf16[32,32], index: 10, kind: input, shape index: {}]   ;;  %s12975_s11 = inlined_call_operand.vmem [shape: f32[1,32], index: 11, kind: input, shape index: {}]   ;;  %s12976_s12 = inlined_call_operand.vmem [shape: bf16[32,32], index: 12, kind: input, shape index: {}]   ;;  %s12977_s13 = inlined_call_operand.vmem [shape: f32[1,32], index: 13, kind: input, shape index: {}]   ;;  %s12978_s14 = inlined_call_operand.vmem [shape: bf16[32,128], index: 14, kind: input, shape index: {}]   ;;  %s12979_s15 = inlined_call_operand.vmem [shape: f32[1,128], index: 15, kind: input, shape index: {}]   ;;  %s12980_s16 = inlined_call_operand.vmem [shape: f32[16,128], index: 16, kind: output, shape index: {}]  }
   0x1   :  { %12985 = sst [smem:[#allocation20_spill]] %s12964_s0 }
   0x2 LB: > { %s10329_s22 = sadd.s32 4294967295, %s10220_s21   ;;  %p8464_p0 = scmp.ge.s32.totalorder %s10220_s21, 1  ;;  %s10220_s21 = sphi %s10323_s21, %s26_s21  }
   0x3   : > { %p476_p1 = scmp.lt.s32.totalorder %s10220_s21, 3 }
   0x5   : > { %p477_p2 = pnand %p8464_p0, %p476_p1 }
   0x7   : > { %480 = sbr.rel (%p477_p2) target bundleno = 6795 (0x1a8b), region = 84 }
   0xc   : > { %s8465_s23 = sshll.u32 %s10329_s22, 3  ;;  %v12981_v0 = vmov 0.0   ;;  %vm10223_vm0 = vmmov 0   ;;  %s12986_s28 = sld [smem:[#allocation20_spill]]  ;;  %vm612_vm1 = vcmask 130048   ;;  %v9805_v33 = vld [vmem:[%s12966_s2] sm:$0xff]  }
   0xd   : > { %8935 = vmatprep.subr.bf16.mxu0 %v12981_v0  ;;  %8941 = vmatprep.subr.bf16.mxu1 %v12981_v0  ;;  %p533_p3 = scmp.lt.s32.totalorder %s8465_s23, 15  ;;  %vm1135_vm2 = vcmask 261120   ;;  %s10224_s0 = smov 96   ;;  %vm3817_vm3 = vcmask 64512   ;;  %vm7903_vm4 = vcmask 195584   ;;  %vm8188_vm5 = vcmask 1041409  }
   0xe   : > { %8937 = vmatprep.mubr.msk.bf16.mxu0 %vm10223_vm0, %v12981_v0  ;;  %8943 = vmatprep.mubr.msk.bf16.mxu1 %vm10223_vm0, %v12981_v0  ;;  %s10226_s18 = smov 88   ;;  %s10227_s19 = smov 120   ;;  %vm8190_vm6 = vcmask 1042434   ;;  %vm8192_vm7 = vcmask 1043459   ;;  %vm8194_vm8 = vcmask 1044484   ;;  %vm8196_vm9 = vcmask 1045509  }
   0xf   : > { %s13041_s23 = smov (!%p533_p3, %s8465_s23), 15  ;;  %s10228_s20 = smov 56   ;;  %vm8198_vm10 = vcmask 1046534   ;;  %vm8200_vm11 = vcmask 1047559  }
  0x10   : > { %s8673_s24 = sshll.u32 %s13041_s23, 3  ;;  %s8674_s25 = sshll.u32 %s13041_s23, 4 }
  0x11   : > { %s10348_s17 = scalar_lea.vmem %s12965_s1, %s8674_s25  ;;  %s10229_s23 = smov 80  }
  0x12   : > { %s10343_s29 = scalar_lea.vmem %s12986_s28, %s8673_s24  ;;  %v567_v1 = vld [vmem:[%s10348_s17] sm:$0xff]  ;;  %v568_v2 = vld [vmem:[%s10348_s17 + $0x8] sm:$0xff]  ;;  %v569_v3 = vld [vmem:[%s10348_s17 + $0x10] sm:$0xff]  ;;  %s10230_s24 = smov 112  }
  0x13   : > { %v599_v4 = vpack.c.bf16 %v568_v2, %v567_v1  ;;  %v570_v5 = vld [vmem:[%s10348_s17 + $0x18] sm:$0xff]  ;;  %v10355_v7 = vld [vmem:[%s10343_s29] sm:$0xff]   ;;  %v10358_v8 = vld [vmem:[%s10343_s29 + $0x8] sm:$0xff]   ;;  %s10231_s25 = smov 48   ;;  %s10233_s26 = smov 104  }
  0x14   : > { %v600_v6 = vpack.c.bf16 %v570_v5, %v569_v3  ;;  %v571_v9 = vld [vmem:[%s10348_s17 + $0x20] sm:$0xff]  ;;  %v572_v10 = vld [vmem:[%s10348_s17 + $0x28] sm:$0xff]  ;;  %v573_v12 = vld [vmem:[%s10348_s17 + $0x30] sm:$0xff]  ;;  %s10234_s27 = smov 40   ;;  %s10235_s28 = smov 8  }
  0x15   : > { %8936 = vmatpush3.bf16.msra.mxu0 %v599_v4  ;;  %v601_v11 = vpack.c.bf16 %v572_v10, %v571_v9  ;;  %v574_v13 = vld [vmem:[%s10348_s17 + $0x38] sm:$0xff]  ;;  %v575_v15 = vld [vmem:[%s10348_s17 + $0x40] sm:$0xff]  ;;  %v576_v16 = vld [vmem:[%s10348_s17 + $0x48] sm:$0xff]  ;;  %s10236_s30 = smov 16   ;;  %p546_p4 = scmp.lt.s32.totalorder %s10329_s22, 1 }
  0x16   : > { %8942 = vmatpush3.bf16.msra.mxu1 %v600_v6  ;;  %8947 = vmatprep.subr.bf16.mxu0 %v12981_v0  ;;  %v602_v14 = vpack.c.bf16 %v574_v13, %v573_v12  ;;  %v577_v17 = vld [vmem:[%s10348_s17 + $0x50] sm:$0xff]  ;;  %v578_v18 = vld [vmem:[%s10348_s17 + $0x58] sm:$0xff]  ;;  %v603_v21 = vpack.c.bf16 %v576_v16, %v575_v15  ;;  %v579_v23 = vld [vmem:[%s10348_s17 + $0x60] sm:$0xff] }
  0x17   : > { %8953 = vmatprep.subr.bf16.mxu1 %v12981_v0  ;;  %v10380_v19 = vld [vmem:[%s10343_s29 + $0x10] sm:$0xff]   ;;  %v10384_v20 = vld [vmem:[%s10343_s29 + $0x18] sm:$0xff]   ;;  %v604_v22 = vpack.c.bf16 %v578_v18, %v577_v17  ;;  %v580_v24 = vld [vmem:[%s10348_s17 + $0x68] sm:$0xff]  ;;  %s13043_s22 = smov (!%p546_p4, %s10329_s22), 1 }
  0x18   : > { %8938 = vmatmul.mubr.msk.bf16.vlgmr.msra.gmra.mxu0 %vm612_vm1, %v10355_v7  ;;  %v581_v25 = vld [vmem:[%s10348_s17 + $0x70] sm:$0xff]  ;;  %v582_v26 = vld [vmem:[%s10348_s17 + $0x78] sm:$0xff]  ;;  %v10397_v27 = vld [vmem:[%s10343_s29 + $0x20] sm:$0xff]   ;;  %v605_v29 = vpack.c.bf16 %v580_v24, %v579_v23  ;;  %s10225_s17 = smov 64  }
  0x19   : > { %8944 = vmatmul.mubr.msk.bf16.vlgmr.msra.gmra.mxu1 %vm612_vm1, %v10358_v8  ;;  %8948 = vmatpush3.bf16.msra.mxu0 %v601_v11  ;;  %v10404_v28 = vld [vmem:[%s10343_s29 + $0x28] sm:$0xff]   ;;  %v606_v30 = vpack.c.bf16 %v582_v26, %v581_v25  ;;  %v10416_v31 = vld [vmem:[%s10343_s29 + $0x30] sm:$0xff]   ;;  %v10419_v32 = vld [vmem:[%s10343_s29 + $0x38] sm:$0xff]  }
  0x1a   : > { %8954 = vmatpush3.bf16.msra.mxu1 %v602_v14  ;;  %8949 = vmatprep.mubr.msk.bf16.mxu0 %vm10223_vm0, %v12981_v0 }
  0x1b   : > { %8955 = vmatprep.mubr.msk.bf16.mxu1 %vm10223_vm0, %v12981_v0  ;;  %8959 = vmatprep.subr.bf16.mxu0 %v12981_v0 }
  0x1c   : > { %8965 = vmatprep.subr.bf16.mxu1 %v12981_v0 }
  0x20   : > { %8950 = vmatmul.mubr.msk.bf16.vlgmr.msra.gmra.mxu0 %vm612_vm1, %v10380_v19 }
  0x21   : > { %8956 = vmatmul.mubr.msk.bf16.vlgmr.msra.gmra.mxu1 %vm612_vm1, %v10384_v20  ;;  %8960 = vmatpush3.bf16.msra.mxu0 %v603_v21 }
  0x22   : > { %8966 = vmatpush3.bf16.msra.mxu1 %v604_v22  ;;  %8961 = vmatprep.mubr.msk.bf16.mxu0 %vm10223_vm0, %v12981_v0 }
  0x23   : > { %8967 = vmatprep.mubr.msk.bf16.mxu1 %vm10223_vm0, %v12981_v0  ;;  %8971 = vmatprep.subr.bf16.mxu0 %v12981_v0 }
  0x24   : > { %8977 = vmatprep.subr.bf16.mxu1 %v12981_v0 }
  0x28   : > { %8962 = vmatmul.mubr.msk.bf16.vlgmr.msra.gmra.mxu0 %vm612_vm1, %v10397_v27 }
  0x29   : > { %8968 = vmatmul.mubr.msk.bf16.vlgmr.msra.gmra.mxu1 %vm612_vm1, %v10404_v28  ;;  %8972 = vmatpush3.bf16.msra.mxu0 %v605_v29 }
  0x2a   : > { %8978 = vmatpush3.bf16.msra.mxu1 %v606_v30  ;;  %8973 = vmatprep.mubr.msk.bf16.mxu0 %vm10223_vm0, %v12981_v0 }
  0x2b   : > { %8979 = vmatprep.mubr.msk.bf16.mxu1 %vm10223_vm0, %v12981_v0  ;;  %9001 = vmatprep.subr.bf16.mxu1 %v12981_v0 }
  0x2c   : > { %8983 = vmatprep.subr.bf16.mxu0 %v9805_v33 }
  0x30   : > { %8974 = vmatmul.mubr.msk.bf16.vlgmr.msra.gmra.mxu0 %vm612_vm1, %v10416_v31 }
  0x31   : > { %8980 = vmatmul.mubr.msk.bf16.vlgmr.msra.gmra.mxu1 %vm612_vm1, %v10419_v32  ;;  %8984 = vmatpush3.bf16.msra.mxu0 %v9805_v33 }
  0x32   : > { %9003 = vmatprep.mubr.msk.bf16.mxu1 %vm10223_vm0, %v12981_v0  ;;  %9025 = vmatprep.subr.bf16.mxu0 %v12981_v0 }
  0xd8   : > { %v650_v34 = vpop.f32.mrf.mxu0 }
  0xd9   : > { %v699_v35 = vpop.f32.mrf.mxu1 }
  0xda   : > { %v8939_v36 = vpop.f32.mrf.mxu0 }
  0xdb   : > { %v8945_v37 = vpop.f32.mrf.mxu1 }
  0xdc   : > { %v653_v38 = vpop.f32.mrf.mxu0 }
  0xdd   : > { %v1000_v39 = vpack.c.bf16 %v653_v38, %v650_v34  ;;  %v702_v40 = vpop.f32.mrf.mxu1 }
  0xde   : > { %v1001_v41 = vpack.c.bf16 %v702_v40, %v699_v35  ;;  %v8940_v42 = vpop.f32.mrf.mxu0 }
  0xdf   : > { %v8946_v43 = vpop.f32.mrf.mxu1  ;;  %8985 = vmatprep.mubr.msk.bf16.mxu0 %vm612_vm1, %v1000_v39 }
  0xe0   : > { %v748_v44 = vpop.f32.mrf.mxu0  ;;  %8986 = vmatmul.mubr.msk.bf16.vlgmr.msra.gmra.mxu0 %vm612_vm1, %v1001_v41 }
  0xe1   : > { %v797_v45 = vpop.f32.mrf.mxu1 }
  0xe2   : > { %v8951_v46 = vpop.f32.mrf.mxu0 }
  0xe3   : > { %v8957_v47 = vpop.f32.mrf.mxu1 }
  0xe4   : > { %v751_v48 = vpop.f32.mrf.mxu0 }
  0xe5   : > { %v1002_v49 = vpack.c.bf16 %v751_v48, %v748_v44  ;;  %v800_v50 = vpop.f32.mrf.mxu1 }
  0xe6   : > { %v1003_v51 = vpack.c.bf16 %v800_v50, %v797_v45  ;;  %v8952_v52 = vpop.f32.mrf.mxu0 }
  0xe7   : > { %v8958_v53 = vpop.f32.mrf.mxu1  ;;  %8989 = vmatprep.mubr.msk.bf16.mxu0 %vm612_vm1, %v1002_v49 }
  0xe8   : > { %v846_v54 = vpop.f32.mrf.mxu0  ;;  %8990 = vmatmul.mubr.msk.bf16.gmra.mxu0 %vm612_vm1, %v1003_v51 }
  0xe9   : > { %v895_v55 = vpop.f32.mrf.mxu1 }
  0xea   : > { %v8963_v56 = vpop.f32.mrf.mxu0 }
  0xeb   : > { %v8969_v57 = vpop.f32.mrf.mxu1 }
  0xec   : > { %v849_v58 = vpop.f32.mrf.mxu0 }
  0xed   : > { %v1004_v59 = vpack.c.bf16 %v849_v58, %v846_v54  ;;  %v898_v60 = vpop.f32.mrf.mxu1 }
  0xee   : > { %v1005_v61 = vpack.c.bf16 %v898_v60, %v895_v55  ;;  %v8964_v62 = vpop.f32.mrf.mxu0 }
  0xef   : > { %v8970_v63 = vpop.f32.mrf.mxu1  ;;  %8993 = vmatprep.mubr.msk.bf16.mxu0 %vm612_vm1, %v1004_v59 }
  0xf0   : > { %v944_v1 = vpop.f32.mrf.mxu0  ;;  %8994 = vmatmul.mubr.msk.bf16.gmra.mxu0 %vm612_vm1, %v1005_v61 }
  0xf1   : > { %v993_v2 = vpop.f32.mrf.mxu1 }
  0xf2   : > { %v8975_v3 = vpop.f32.mrf.mxu0 }
  0xf3   : > { %v8981_v4 = vpop.f32.mrf.mxu1 }
  0xf4   : > { %v947_v5 = vpop.f32.mrf.mxu0 }
  0xf5   : > { %v1006_v6 = vpack.c.bf16 %v947_v5, %v944_v1  ;;  %v996_v9 = vpop.f32.mrf.mxu1 }
  0xf6   : > { %v1007_v10 = vpack.c.bf16 %v996_v9, %v993_v2  ;;  %v8976_v11 = vpop.f32.mrf.mxu0 }
  0xf7   : > { %8997 = vmatprep.mubr.msk.bf16.mxu0 %vm612_vm1, %v1006_v6  ;;  %v8982_v12 = vpop.f32.mrf.mxu1 }
  0xf8   : > { %8998 = vmatmul.mubr.msk.bf16.gmra.mxu0 %vm612_vm1, %v1007_v10 }
  0xf9   : > { %9027 = vmatprep.mubr.msk.bf16.mxu0 %vm10223_vm0, %v12981_v0 }
 0x1a0   : > { %v8987_v13 = vpop.f32.mrf.mxu0 }
 0x1a1   : > { %v1142_v14 = vsel %vm1135_vm2, %v8987_v13, 0.0 }
 0x1a2   : > { %1143 = vadd.xlane.f32.xlu1 %v1142_v14  ;;  %v1072_v15 = vpop.f32.mrf.mxu0 }
 0x1a3   : > { %v1136_v16 = vsel %vm1135_vm2, %v1072_v15, 0.0 }
 0x1a4   : > { %1137 = vadd.xlane.f32.xlu0 %v1136_v16  ;;  %v8988_v17 = vpop.f32.mrf.mxu0 }
 0x1a5   : > { %v1145_v18 = vsel %vm1135_vm2, %v8988_v17, 0.0 }
 0x1a6   : > { %1146 = vadd.xlane.f32.xlu1 %v1145_v18  ;;  %v1075_v21 = vpop.f32.mrf.mxu0 }
 0x1a7   : > { %v1139_v22 = vsel %vm1135_vm2, %v1075_v21, 0.0 }
 0x1a8   : > { %1140 = vadd.xlane.f32.xlu0 %v1139_v22  ;;  %v10445_v23 = vpop.f32.mrf.mxu0 }
 0x1a9   : > { %v1154_v30 = vsel %vm1135_vm2, %v10445_v23, 0.0 }
 0x1aa   : > { %v1088_v24 = vpop.f32.mrf.mxu0 }
 0x1ab   : > { %v1148_v25 = vsel %vm1135_vm2, %v1088_v24, 0.0 }
 0x1ac   : > { %1149 = vadd.xlane.f32.xlu0 %v1148_v25  ;;  %v10448_v26 = vpop.f32.mrf.mxu0 }
 0x1ad   : > { %v1157_v36 = vsel %vm1135_vm2, %v10448_v26, 0.0 }
 0x1ae   : > { %v1091_v29 = vpop.f32.mrf.mxu0 }
 0x1af   : > { %v1151_v33 = vsel %vm1135_vm2, %v1091_v29, 0.0 }
 0x1b0   : > { %1155 = vadd.xlane.f32.xlu0 %v1154_v30  ;;  %1152 = vadd.xlane.f32.xlu1 %v1151_v33  ;;  %v10453_v34 = vpop.f32.mrf.mxu0 }
 0x1b1   : > { %v1166_v39 = vsel %vm1135_vm2, %v10453_v34, 0.0 }
 0x1b2   : > { %v10455_v35 = vpop.f32.mrf.mxu0 }
 0x1b3   : > { %v1160_v37 = vsel %vm1135_vm2, %v10455_v35, 0.0 }
 0x1b4   : > { %1158 = vadd.xlane.f32.xlu1 %v1157_v36  ;;  %1161 = vadd.xlane.f32.xlu0 %v1160_v37  ;;  %v10461_v38 = vpop.f32.mrf.mxu0 }
 0x1b5   : > { %v1169_v43 = vsel %vm1135_vm2, %v10461_v38, 0.0 }
 0x1b6   : > { %v10465_v40 = vpop.f32.mrf.mxu0 }
 0x1b7   : > { %v1163_v41 = vsel %vm1135_vm2, %v10465_v40, 0.0 }
 0x1b8   : > { %1167 = vadd.xlane.f32.xlu0 %v1166_v39  ;;  %1164 = vadd.xlane.f32.xlu1 %v1163_v41  ;;  %v10469_v42 = vpop.f32.mrf.mxu0 }
 0x1b9   : > { %v1178_v47 = vsel %vm1135_vm2, %v10469_v42, 0.0 }
 0x1ba   : > { %v10473_v44 = vpop.f32.mrf.mxu0 }
 0x1bb   : > { %v1172_v45 = vsel %vm1135_vm2, %v10473_v44, 0.0 }
 0x1bc   : > { %1170 = vadd.xlane.f32.xlu1 %v1169_v43  ;;  %1173 = vadd.xlane.f32.xlu0 %v1172_v45  ;;  %v10477_v46 = vpop.f32.mrf.mxu0 }
 0x1bd   : > { %v1181_v50 = vsel %vm1135_vm2, %v10477_v46, 0.0 }
 0x1be   : > { %v10481_v48 = vpop.f32.mrf.mxu0 }
 0x1bf   : > { %v1175_v49 = vsel %vm1135_vm2, %v10481_v48, 0.0 }
 0x1c0   : > { %1179 = vadd.xlane.f32.xlu0 %v1178_v47  ;;  %1176 = vadd.xlane.f32.xlu1 %v1175_v49 }
 0x1c4   : > { %1182 = vadd.xlane.f32.xlu1 %v1181_v50 }
 0x22b   : > { %v1144_v51 = vpop.xlane.xlu1 %1143 }
 0x22c   : > { %v1187_v52 = vmul.f32 0.03125, %v1144_v51 }
 0x22d   : > { %v1138_v53 = vpop.xlane.xlu0 %1137 }
 0x22e   : > { %v1185_v54 = vmul.f32 0.03125, %v1138_v53  ;;  %v10487_v56 = vsub.f32 %v8987_v13, %v1187_v52 }
 0x22f   : > { %v1147_v55 = vpop.xlane.xlu1 %1146 }
 0x230   : > { %v10489_v57 = vsub.f32 %v1072_v15, %v1185_v54  ;;  %v1188_v58 = vmul.f32 0.03125, %v1147_v55  ;;  %v1219_v2 = vmul.f32 %v10487_v56, %v10487_v56 }
 0x231   : > { %v1141_v59 = vpop.xlane.xlu0 %1140 }
 0x232   : > { %v1186_v60 = vmul.f32 0.03125, %v1141_v59  ;;  %v1217_v61 = vmul.f32 %v10489_v57, %v10489_v57  ;;  %v10493_v62 = vsub.f32 %v8988_v17, %v1188_v58  ;;  %v1239_v9 = vsel %vm1135_vm2, %v1219_v2, 0.0 }
 0x234   : > { %v10495_v63 = vsub.f32 %v1075_v21, %v1186_v60  ;;  %v1233_v1 = vsel %vm1135_vm2, %v1217_v61, 0.0  ;;  %v1220_v11 = vmul.f32 %v10493_v62, %v10493_v62 }
 0x235   : > { %v1150_v3 = vpop.xlane.xlu0 %1149  ;;  %1234 = vadd.xlane.f32.xlu0 %v1233_v1 }
 0x236   : > { %v1189_v4 = vmul.f32 0.03125, %v1150_v3  ;;  %v1218_v5 = vmul.f32 %v10495_v63, %v10495_v63  ;;  %v1242_v22 = vsel %vm1135_vm2, %v1220_v11, 0.0 }
 0x238   : > { %v10502_v6 = vsub.f32 %v1088_v24, %v1189_v4  ;;  %v1236_v10 = vsel %vm1135_vm2, %v1218_v5, 0.0 }
 0x239   : > { %v1156_v12 = vpop.xlane.xlu0 %1155  ;;  %v1153_v13 = vpop.xlane.xlu1 %1152  ;;  %1240 = vadd.xlane.f32.xlu0 %v1239_v9  ;;  %1237 = vadd.xlane.f32.xlu1 %v1236_v10 }
 0x23a   : > { %v1191_v14 = vmul.f32 0.03125, %v1156_v12  ;;  %v1190_v15 = vmul.f32 0.03125, %v1153_v13  ;;  %v1221_v16 = vmul.f32 %v10502_v6, %v10502_v6 }
 0x23c   : > { %v10511_v17 = vsub.f32 %v10445_v23, %v1191_v14  ;;  %v10513_v18 = vsub.f32 %v1091_v29, %v1190_v15  ;;  %v1245_v21 = vsel %vm1135_vm2, %v1221_v16, 0.0 }
 0x23d   : > { %v1159_v24 = vpop.xlane.xlu1 %1158  ;;  %v1162_v25 = vpop.xlane.xlu0 %1161  ;;  %1246 = vadd.xlane.f32.xlu0 %v1245_v21  ;;  %1243 = vadd.xlane.f32.xlu1 %v1242_v22 }
 0x23e   : > { %v1192_v30 = vmul.f32 0.03125, %v1159_v24  ;;  %v1193_v33 = vmul.f32 0.03125, %v1162_v25  ;;  %v1223_v36 = vmul.f32 %v10511_v17, %v10511_v17  ;;  %v1222_v37 = vmul.f32 %v10513_v18, %v10513_v18 }
 0x240   : > { %v10522_v23 = vsub.f32 %v10448_v26, %v1192_v30  ;;  %v10525_v29 = vsub.f32 %v10455_v35, %v1193_v33  ;;  %v1251_v39 = vsel %vm1135_vm2, %v1223_v36, 0.0  ;;  %v1248_v41 = vsel %vm1135_vm2, %v1222_v37, 0.0 }
 0x241   : > { %v1168_v43 = vpop.xlane.xlu0 %1167  ;;  %v1165_v45 = vpop.xlane.xlu1 %1164  ;;  %1252 = vadd.xlane.f32.xlu0 %v1251_v39  ;;  %1249 = vadd.xlane.f32.xlu1 %v1248_v41 }
 0x242   : > { %v1195_v47 = vmul.f32 0.03125, %v1168_v43  ;;  %v1194_v49 = vmul.f32 0.03125, %v1165_v45  ;;  %v1225_v50 = vmul.f32 %v10525_v29, %v10525_v29  ;;  %v1224_v26 = vmul.f32 %v10522_v23, %v10522_v23 }
 0x244   : > { %v10534_v51 = vsub.f32 %v10453_v34, %v1195_v47  ;;  %v10537_v35 = vsub.f32 %v10465_v40, %v1194_v49  ;;  %v1257_v52 = vsel %vm1135_vm2, %v1225_v50, 0.0  ;;  %v1254_v53 = vsel %vm1135_vm2, %v1224_v26, 0.0 }
 0x245   : > { %v1171_v54 = vpop.xlane.xlu1 %1170  ;;  %1258 = vadd.xlane.f32.xlu0 %v1257_v52  ;;  %v1174_v55 = vpop.xlane.xlu0 %1173  ;;  %1255 = vadd.xlane.f32.xlu1 %v1254_v53 }
 0x246   : > { %v1196_v58 = vmul.f32 0.03125, %v1171_v54  ;;  %v1197_v59 = vmul.f32 0.03125, %v1174_v55  ;;  %v1227_v60 = vmul.f32 %v10534_v51, %v10534_v51  ;;  %v1226_v34 = vmul.f32 %v10537_v35, %v10537_v35 }
 0x248   : > { %v10546_v61 = vsub.f32 %v10461_v38, %v1196_v58  ;;  %v10549_v40 = vsub.f32 %v10473_v44, %v1197_v59  ;;  %v1263_v1 = vsel %vm1135_vm2, %v1227_v60, 0.0  ;;  %v1260_v2 = vsel %vm1135_vm2, %v1226_v34, 0.0 }
 0x249   : > { %1264 = vadd.xlane.f32.xlu0 %v1263_v1  ;;  %v1180_v3 = vpop.xlane.xlu0 %1179  ;;  %1261 = vadd.xlane.f32.xlu1 %v1260_v2  ;;  %v1177_v4 = vpop.xlane.xlu1 %1176 }
 0x24a   : > { %v1199_v5 = vmul.f32 0.03125, %v1180_v3  ;;  %v1198_v9 = vmul.f32 0.03125, %v1177_v4  ;;  %v1229_v10 = vmul.f32 %v10549_v40, %v10549_v40  ;;  %v1228_v38 = vmul.f32 %v10546_v61, %v10546_v61 }
 0x24c   : > { %v10558_v11 = vsub.f32 %v10469_v42, %v1199_v5  ;;  %v10561_v44 = vsub.f32 %v10481_v48, %v1198_v9  ;;  %v1269_v12 = vsel %vm1135_vm2, %v1229_v10, 0.0  ;;  %v1266_v13 = vsel %vm1135_vm2, %v1228_v38, 0.0  ;;  %v10580_v9 = vld [vmem:[%s12968_s4] ss:$0 sm:$0xff] }
 0x24d   : > { %1270 = vadd.xlane.f32.xlu0 %v1269_v12  ;;  %1267 = vadd.xlane.f32.xlu1 %v1266_v13  ;;  %v1183_v14 = vpop.xlane.xlu1 %1182 }
 0x24e   : > { %v1200_v15 = vmul.f32 0.03125, %v1183_v14  ;;  %v1231_v16 = vmul.f32 %v10558_v11, %v10558_v11  ;;  %v1230_v21 = vmul.f32 %v10561_v44, %v10561_v44 }
 0x250   : > { %v10570_v42 = vsub.f32 %v10477_v46, %v1200_v15  ;;  %v1275_v48 = vsel %vm1135_vm2, %v1231_v16, 0.0  ;;  %v1272_v22 = vsel %vm1135_vm2, %v1230_v21, 0.0 }
 0x251   : > { %1276 = vadd.xlane.f32.xlu0 %v1275_v48  ;;  %1273 = vadd.xlane.f32.xlu1 %v1272_v22  ;;  %v10587_v48 = vld [vmem:[%s12969_s5] ss:$0 sm:$0xff] }
 0x252   : > { %v1232_v24 = vmul.f32 %v10570_v42, %v10570_v42 }
 0x254   : > { %v1278_v25 = vsel %vm1135_vm2, %v1232_v24, 0.0 }
 0x255   : > { %1279 = vadd.xlane.f32.xlu1 %v1278_v25 }
 0x2be   : > { %v1235_v30 = vpop.xlane.xlu0 %1234 }
 0x2bf   : > { %v1281_v33 = vmul.f32 0.03125, %v1235_v30 }
 0x2c1   : > { %v1297_v36 = vadd.f32 1e-05, %v1281_v33 }
 0x2c2   : > { %v1241_v37 = vpop.xlane.xlu0 %1240  ;;  %v1238_v39 = vpop.xlane.xlu1 %1237 }
 0x2c3   : > { %9822 = vrsqrt.f32 %v1297_v36  ;;  %v1283_v46 = vmul.f32 0.03125, %v1241_v37  ;;  %v1282_v41 = vmul.f32 0.03125, %v1238_v39 }
 0x2c5   : > { %v1299_v43 = vadd.f32 1e-05, %v1283_v46  ;;  %v1298_v45 = vadd.f32 1e-05, %v1282_v41 }
 0x2c6   : > { %v1247_v47 = vpop.xlane.xlu0 %1246  ;;  %v1244_v49 = vpop.xlane.xlu1 %1243 }
 0x2c7   : > { %9824 = vrsqrt.f32 %v1299_v43  ;;  %v1285_v50 = vmul.f32 0.03125, %v1247_v47  ;;  %v1284_v26 = vmul.f32 0.03125, %v1244_v49 }
 0x2c8   : > { %9826 = vrsqrt.f32 %v1298_v45 }
 0x2c9   : > { %v1301_v52 = vadd.f32 1e-05, %v1285_v50  ;;  %v1300_v53 = vadd.f32 1e-05, %v1284_v26 }
 0x2ca   : > { %v1253_v54 = vpop.xlane.xlu0 %1252  ;;  %v1250_v55 = vpop.xlane.xlu1 %1249 }
 0x2cb   : > { %9828 = vrsqrt.f32 %v1301_v52  ;;  %v1287_v58 = vmul.f32 0.03125, %v1253_v54  ;;  %v1286_v59 = vmul.f32 0.03125, %v1250_v55 }
 0x2cc   : > { %9830 = vrsqrt.f32 %v1300_v53 }
 0x2cd   : > { %v1302_v60 = vadd.f32 1e-05, %v1286_v59  ;;  %v1303_v34 = vadd.f32 1e-05, %v1287_v58 }
 0x2ce   : > { %v1259_v1 = vpop.xlane.xlu0 %1258  ;;  %v1256_v2 = vpop.xlane.xlu1 %1255 }
 0x2cf   : > { %v1289_v3 = vmul.f32 0.03125, %v1259_v1  ;;  %v1288_v4 = vmul.f32 0.03125, %v1256_v2  ;;  %9832 = vrsqrt.f32 %v1302_v60 }
 0x2d0   : > { %v9823_v5 = vpop.eup %9822  ;;  %9834 = vrsqrt.f32 %v1303_v34 }
 0x2d1   : > { %v1305_v10 = vadd.f32 1e-05, %v1289_v3  ;;  %v1304_v38 = vadd.f32 1e-05, %v1288_v4  ;;  %v1329_v12 = vmul.f32 %v9823_v5, %v10489_v57 }
 0x2d2   : > { %v1265_v13 = vpop.xlane.xlu0 %1264  ;;  %v1262_v14 = vpop.xlane.xlu1 %1261 }
 0x2d3   : > { %9836 = vrsqrt.f32 %v1305_v10  ;;  %v1291_v15 = vmul.f32 0.03125, %v1265_v13  ;;  %v1290_v16 = vmul.f32 0.03125, %v1262_v14  ;;  %v1352_v21 = vmul.f32 %v10580_v9, %v1329_v12 }
 0x2d4   : > { %v9825_v22 = vpop.eup %9824  ;;  %9838 = vrsqrt.f32 %v1304_v38 }
 0x2d5   : > { %v9827_v24 = vpop.eup %9826  ;;  %v1306_v25 = vadd.f32 1e-05, %v1290_v16  ;;  %v1331_v30 = vmul.f32 %v9825_v22, %v10487_v56  ;;  %v1307_v57 = vadd.f32 1e-05, %v1291_v15  ;;  %v1375_v39 = vadd.f32 %v10587_v48, %v1352_v21 }
 0x2d6   : > { %v1271_v33 = vpop.xlane.xlu0 %1270  ;;  %v1268_v36 = vpop.xlane.xlu1 %1267  ;;  %v1330_v37 = vmul.f32 %v9827_v24, %v10495_v63 }
 0x2d7   : > { %v1293_v46 = vmul.f32 0.03125, %v1271_v33  ;;  %v1292_v41 = vmul.f32 0.03125, %v1268_v36  ;;  %9840 = vrsqrt.f32 %v1306_v25  ;;  %v1354_v47 = vmul.f32 %v10580_v9, %v1331_v30 }
 0x2d8   : > { %v9829_v43 = vpop.eup %9828  ;;  %v1353_v45 = vmul.f32 %v10580_v9, %v1330_v37  ;;  %9842 = vrsqrt.f32 %v1307_v57  ;;  %v1391_v54 = vmax.f32 %v1375_v39, 0.0 }
 0x2d9   : > { %v9831_v49 = vpop.eup %9830  ;;  %v1309_v50 = vadd.f32 1e-05, %v1293_v46  ;;  %v1308_v26 = vadd.f32 1e-05, %v1292_v41  ;;  %v1377_v58 = vadd.f32 %v10587_v48, %v1354_v47  ;;  %v1333_v59 = vmul.f32 %v9829_v43, %v10502_v6 }
 0x2da   : > { %v1277_v56 = vpop.xlane.xlu0 %1276  ;;  %v1274_v52 = vpop.xlane.xlu1 %1273  ;;  %v1376_v53 = vadd.f32 %v10587_v48, %v1353_v45  ;;  %v1332_v63 = vmul.f32 %v9831_v49, %v10493_v62 }
 0x2db   : > { %9844 = vrsqrt.f32 %v1309_v50  ;;  %v1294_v55 = vmul.f32 0.03125, %v1274_v52  ;;  %v1295_v60 = vmul.f32 0.03125, %v1277_v56  ;;  %v1393_v13 = vmax.f32 %v1377_v58, 0.0 }
 0x2dc   : > { %9846 = vrsqrt.f32 %v1308_v26  ;;  %v1392_v34 = vmax.f32 %v1376_v53, 0.0  ;;  %v1355_v1 = vmul.f32 %v10580_v9, %v1332_v63  ;;  %v9833_v2 = vpop.eup %9832  ;;  %v1356_v14 = vmul.f32 %v10580_v9, %v1333_v59 }
 0x2dd   : > { %v1310_v3 = vadd.f32 1e-05, %v1294_v55  ;;  %v1334_v38 = vmul.f32 %v9833_v2, %v10513_v18  ;;  %v9835_v62 = vpop.eup %9834  ;;  %v1311_v6 = vadd.f32 1e-05, %v1295_v60 }
 0x2de   : > { %v1280_v4 = vpop.xlane.xlu1 %1279  ;;  %v1407_v5 = vpack.c.bf16 %v1392_v34, %v1391_v54  ;;  %v1378_v10 = vadd.f32 %v10587_v48, %v1355_v1  ;;  %v1335_v33 = vmul.f32 %v9835_v62, %v10511_v17  ;;  %v1379_v36 = vadd.f32 %v10587_v48, %v1356_v14 }
 0x2df   : > { %v1296_v12 = vmul.f32 0.03125, %v1280_v4  ;;  %9848 = vrsqrt.f32 %v1310_v3  ;;  %v1357_v21 = vmul.f32 %v10580_v9, %v1334_v38 }
 0x2e0   : > { %v9837_v15 = vpop.eup %9836  ;;  %9002 = vmatpush3.bf16.msra.mxu1 %v1407_v5  ;;  %v1394_v16 = vmax.f32 %v1378_v10, 0.0  ;;  %v1358_v17 = vmul.f32 %v10580_v9, %v1335_v33  ;;  %v1395_v43 = vmax.f32 %v1379_v36, 0.0 }
 0x2e1   : > { %v9839_v22 = vpop.eup %9838  ;;  %v1312_v24 = vadd.f32 1e-05, %v1296_v12  ;;  %9007 = vmatprep.subr.bf16.mxu1 %v12981_v0  ;;  %v1337_v25 = vmul.f32 %v9837_v15, %v10525_v29  ;;  %v1380_v18 = vadd.f32 %v10587_v48, %v1357_v21 }
 0x2e2   : > { %v1408_v30 = vpack.c.bf16 %v1394_v16, %v1393_v13  ;;  %v1336_v57 = vmul.f32 %v9839_v22, %v10522_v23  ;;  %v1381_v53 = vadd.f32 %v10587_v48, %v1358_v17 }
 0x2e3   : > { %9850 = vrsqrt.f32 %v1312_v24  ;;  %9004 = vmatmul.mubr.msk.bf16.vlgmr.msra.gmra.mxu1 %vm612_vm1, %v10355_v7  ;;  %v1360_v29 = vmul.f32 %v10580_v9, %v1337_v25  ;;  %v1396_v39 = vmax.f32 %v1380_v18, 0.0 }
 0x2e4   : > { %9852 = vrsqrt.f32 %v1311_v6  ;;  %9008 = vmatpush3.bf16.msra.mxu1 %v1408_v30  ;;  %9009 = vmatprep.mubr.msk.bf16.mxu1 %vm10223_vm0, %v12981_v0  ;;  %v9841_v37 = vpop.eup %9840  ;;  %v1359_v46 = vmul.f32 %v10580_v9, %v1336_v57  ;;  %v1397_v1 = vmax.f32 %v1381_v53, 0.0 }
 0x2e5   : > { %9013 = vmatprep.subr.bf16.mxu1 %v12981_v0  ;;  %v1338_v23 = vmul.f32 %v9841_v37, %v10537_v35  ;;  %v9843_v7 = vpop.eup %9842  ;;  %v1383_v47 = vadd.f32 %v10587_v48, %v1360_v29  ;;  %v1409_v26 = vpack.c.bf16 %v1396_v39, %v1395_v43 }
 0x2e6   : > { %v1382_v52 = vadd.f32 %v10587_v48, %v1359_v46  ;;  %v1339_v55 = vmul.f32 %v9843_v7, %v10534_v51 }
 0x2e7   : > { %v1361_v45 = vmul.f32 %v10580_v9, %v1338_v23  ;;  %v1399_v54 = vmax.f32 %v1383_v47, 0.0 }
 0x2e8   : > { %v9845_v41 = vpop.eup %9844  ;;  %v1362_v4 = vmul.f32 %v10580_v9, %v1339_v55 }
 0x2e9   : > { %v9847_v49 = vpop.eup %9846  ;;  %v1341_v50 = vmul.f32 %v9845_v41, %v10549_v40  ;;  %v1384_v56 = vadd.f32 %v10587_v48, %v1361_v45 }
 0x2ea   : > { %v1340_v35 = vmul.f32 %v9847_v49, %v10546_v61  ;;  %v1398_v61 = vmax.f32 %v1382_v52, 0.0  ;;  %v1385_v13 = vadd.f32 %v10587_v48, %v1362_v4 }
 0x2eb   : > { %9010 = vmatmul.mubr.msk.bf16.vlgmr.msra.gmra.mxu1 %vm612_vm1, %v10358_v8  ;;  %v1400_v63 = vmax.f32 %v1384_v56, 0.0  ;;  %v1364_v40 = vmul.f32 %v10580_v9, %v1341_v50 }
 0x2ec   : > { %9014 = vmatpush3.bf16.msra.mxu1 %v1409_v26  ;;  %9015 = vmatprep.mubr.msk.bf16.mxu1 %vm10223_vm0, %v12981_v0  ;;  %v9849_v58 = vpop.eup %9848  ;;  %v1363_v8 = vmul.f32 %v10580_v9, %v1340_v35  ;;  %v1410_v51 = vpack.c.bf16 %v1398_v61, %v1397_v1 }
 0x2ed   : > { %9019 = vmatprep.subr.bf16.mxu1 %v12981_v0  ;;  %v1411_v59 = vpack.c.bf16 %v1400_v63, %v1399_v54  ;;  %v1342_v60 = vmul.f32 %v9849_v58, %v10561_v44  ;;  %v1387_v3 = vadd.f32 %v10587_v48, %v1364_v40 }
 0x2ee   : > { %v1386_v38 = vadd.f32 %v10587_v48, %v1363_v8 }
 0x2ef   : > { %9026 = vmatpush3.bf16.msra.mxu0 %v1411_v59  ;;  %v1365_v2 = vmul.f32 %v10580_v9, %v1342_v60  ;;  %v1403_v62 = vmax.f32 %v1387_v3, 0.0 }
 0x2f0   : > { %v9851_v34 = vpop.eup %9850  ;;  %9037 = vmatprep.subr.bf16.mxu0 %v12981_v0 }
 0x2f1   : > { %v9853_v5 = vpop.eup %9852  ;;  %v1388_v10 = vadd.f32 %v10587_v48, %v1365_v2  ;;  %v1344_v44 = vmul.f32 %v9851_v34, %v10570_v42 }
 0x2f2   : > { %9028 = vmatmul.mubr.msk.bf16.vlgmr.msra.gmra.mxu0 %vm612_vm1, %v10397_v27  ;;  %v1343_v14 = vmul.f32 %v9853_v5, %v10558_v11  ;;  %v1401_v27 = vmax.f32 %v1385_v13, 0.0 }
 0x2f3   : > { %9016 = vmatmul.mubr.msk.bf16.vlgmr.msra.gmra.mxu1 %vm612_vm1, %v10380_v19  ;;  %v1404_v12 = vmax.f32 %v1388_v10, 0.0  ;;  %9039 = vmatprep.mubr.msk.bf16.mxu0 %vm10223_vm0, %v12981_v0  ;;  %v1402_v19 = vmax.f32 %v1386_v38, 0.0  ;;  %v1367_v15 = vmul.f32 %v10580_v9, %v1344_v44 }
 0x2f4   : > { %9020 = vmatpush3.bf16.msra.mxu1 %v1410_v51  ;;  %9021 = vmatprep.mubr.msk.bf16.mxu1 %vm10223_vm0, %v12981_v0  ;;  %v1366_v6 = vmul.f32 %v10580_v9, %v1343_v14 }
 0x2f5   : > { %9031 = vmatprep.subr.bf16.mxu1 %v12981_v0  ;;  %v1413_v42 = vpack.c.bf16 %v1404_v12, %v1403_v62  ;;  %v1412_v16 = vpack.c.bf16 %v1402_v19, %v1401_v27  ;;  %v1390_v21 = vadd.f32 %v10587_v48, %v1367_v15 }
 0x2f6   : > { %v1389_v11 = vadd.f32 %v10587_v48, %v1366_v6 }
 0x2f7   : > { %9038 = vmatpush3.bf16.msra.mxu0 %v1413_v42  ;;  %v1406_v22 = vmax.f32 %v1390_v21, 0.0 }
 0x2f8   : > { %v1405_v24 = vmax.f32 %v1389_v11, 0.0 }
 0x2fa   : > { %9040 = vmatmul.mubr.msk.bf16.vlgmr.msra.gmra.mxu0 %vm612_vm1, %v10416_v31  ;;  %v1414_v9 = vpack.c.bf16 %v1406_v22, %v1405_v24 }
 0x2fb   : > { %9022 = vmatmul.mubr.msk.bf16.vlgmr.msra.gmra.mxu1 %vm612_vm1, %v10384_v20  ;;  %v9806_v20 = vld [vmem:[%s12967_s3 + $0x8] sm:$0xff]  }
 0x2fc   : > { %9032 = vmatpush3.bf16.msra.mxu1 %v1412_v16  ;;  %9033 = vmatprep.mubr.msk.bf16.mxu1 %vm10223_vm0, %v12981_v0 }
 0x2fd   : > { %9043 = vmatprep.subr.bf16.mxu1 %v12981_v0  ;;  %9049 = vmatprep.subr.bf16.mxu0 %v9806_v20 }
 0x2fe   : > { %9050 = vmatpush3.bf16.msra.mxu0 %v9806_v20 }
 0x303   : > { %9034 = vmatmul.mubr.msk.bf16.vlgmr.msra.gmra.mxu1 %vm612_vm1, %v10404_v28  ;;  %v9807_v28 = vld [vmem:[%s12967_s3] sm:$0xff]  }
 0x304   : > { %9044 = vmatpush3.bf16.msra.mxu1 %v1414_v9  ;;  %9045 = vmatprep.mubr.msk.bf16.mxu1 %vm10223_vm0, %v12981_v0 }
 0x305   : > { %9069 = vmatprep.subr.bf16.mxu1 %v12981_v0  ;;  %9051 = vmatprep.subr.bf16.mxu0 %v9807_v28 }
 0x306   : > { %9052 = vmatpush3.bf16.msra.mxu0 %v9807_v28 }
 0x307   : > { %9093 = vmatprep.subr.bf16.mxu0 %v12981_v0 }
 0x30b   : > { %9046 = vmatmul.mubr.msk.bf16.vlgmr.msra.gmra.mxu1 %vm612_vm1, %v10419_v32 }
 0x30c   : > { %9071 = vmatprep.mubr.msk.bf16.mxu1 %vm10223_vm0, %v12981_v0 }
 0x3a3   : > { %v1449_v31 = vpop.f32.mrf.mxu1 }
 0x3a5   : > { %v9005_v48 = vpop.f32.mrf.mxu1 }
 0x3a7   : > { %v1452_v32 = vpop.f32.mrf.mxu1 }
 0x3a8   : > { %v1743_v25 = vpack.c.bf16 %v1452_v32, %v1449_v31 }
 0x3a9   : > { %v9006_v30 = vpop.f32.mrf.mxu1 }
 0x3aa   : > { %9053 = vmatprep.mubr.msk.bf16.mxu0 %vm1135_vm2, %v1743_v25 }
 0x3ab   : > { %v1490_v18 = vpop.f32.mrf.mxu1 }
 0x3ad   : > { %v9011_v57 = vpop.f32.mrf.mxu1 }
 0x3af   : > { %v1493_v33 = vpop.f32.mrf.mxu1 }
 0x3b0   : > { %v1744_v36 = vpack.c.bf16 %v1493_v33, %v1490_v18 }
 0x3b1   : > { %v9012_v29 = vpop.f32.mrf.mxu1 }
 0x3b2   : > { %9054 = vmatmul.mubr.msk.bf16.vlgmr.msra.gmra.mxu0 %vm1135_vm2, %v1744_v36  ;;  %v1613_v39 = vpop.f32.mrf.mxu0 }
 0x3b3   : > { %v1531_v37 = vpop.f32.mrf.mxu1 }
 0x3b4   : > { %v9029_v46 = vpop.f32.mrf.mxu0 }
 0x3b5   : > { %v9017_v23 = vpop.f32.mrf.mxu1 }
 0x3b6   : > { %v1616_v17 = vpop.f32.mrf.mxu0 }
 0x3b7   : > { %v1534_v7 = vpop.f32.mrf.mxu1  ;;  %v1747_v52 = vpack.c.bf16 %v1616_v17, %v1613_v39 }
 0x3b8   : > { %v1745_v41 = vpack.c.bf16 %v1534_v7, %v1531_v37  ;;  %v9030_v45 = vpop.f32.mrf.mxu0 }
 0x3b9   : > { %v9018_v43 = vpop.f32.mrf.mxu1 }
 0x3ba   : > { %9057 = vmatprep.mubr.msk.bf16.mxu0 %vm1135_vm2, %v1745_v41  ;;  %v1695_v49 = vpop.f32.mrf.mxu0 }
 0x3bb   : > { %v1572_v47 = vpop.f32.mrf.mxu1 }
 0x3bc   : > { %v9041_v26 = vpop.f32.mrf.mxu0 }
 0x3bd   : > { %v9023_v50 = vpop.f32.mrf.mxu1 }
 0x3be   : > { %v1698_v35 = vpop.f32.mrf.mxu0 }
 0x3bf   : > { %v1575_v56 = vpop.f32.mrf.mxu1  ;;  %v1749_v59 = vpack.c.bf16 %v1698_v35, %v1695_v49 }
 0x3c0   : > { %v1746_v53 = vpack.c.bf16 %v1575_v56, %v1572_v47  ;;  %v9042_v63 = vpop.f32.mrf.mxu0 }
 0x3c1   : > { %v9024_v54 = vpop.f32.mrf.mxu1 }
 0x3c2   : > { %9058 = vmatmul.mubr.msk.bf16.gmra.mxu0 %vm1135_vm2, %v1746_v53 }
 0x3c3   : > { %v1654_v40 = vpop.f32.mrf.mxu1  ;;  %9061 = vmatprep.mubr.msk.bf16.mxu0 %vm1135_vm2, %v1747_v52 }
 0x3c5   : > { %v9035_v55 = vpop.f32.mrf.mxu1 }
 0x3c7   : > { %v1657_v58 = vpop.f32.mrf.mxu1 }
 0x3c8   : > { %v1748_v61 = vpack.c.bf16 %v1657_v58, %v1654_v40 }
 0x3c9   : > { %v9036_v60 = vpop.f32.mrf.mxu1 }
 0x3ca   : > { %9062 = vmatmul.mubr.msk.bf16.gmra.mxu0 %vm1135_vm2, %v1748_v61 }
 0x3cb   : > { %v1736_v8 = vpop.f32.mrf.mxu1  ;;  %9065 = vmatprep.mubr.msk.bf16.mxu0 %vm1135_vm2, %v1749_v59 }
 0x3cd   : > { %v9047_v34 = vpop.f32.mrf.mxu1 }
 0x3cf   : > { %v1739_v1 = vpop.f32.mrf.mxu1 }
 0x3d0   : > { %v1750_v2 = vpack.c.bf16 %v1739_v1, %v1736_v8 }
 0x3d1   : > { %v9048_v3 = vpop.f32.mrf.mxu1 }
 0x3d2   : > { %9066 = vmatmul.mubr.msk.bf16.gmra.mxu0 %vm1135_vm2, %v1750_v2 }
 0x3d3   : > { %9095 = vmatprep.mubr.msk.bf16.mxu0 %vm10223_vm0, %v12981_v0 }
 0x472   : > { %v9055_v4 = vpop.f32.mrf.mxu0 }
 0x473   : > { %v1890_v44 = vsel %vm1135_vm2, %v9055_v4, 0.0 }
 0x474   : > { %v1821_v5 = vpop.f32.mrf.mxu0 }
 0x475   : > { %v1884_v51 = vsel %vm1135_vm2, %v1821_v5, 0.0 }
 0x476   : > { %1885 = vadd.xlane.f32.xlu0 %v1884_v51  ;;  %v9056_v10 = vpop.f32.mrf.mxu0 }
 0x477   : > { %v1893_v12 = vsel %vm1135_vm2, %v9056_v10, 0.0 }
 0x478   : > { %v1824_v38 = vpop.f32.mrf.mxu0 }
 0x479   : > { %v1887_v62 = vsel %vm1135_vm2, %v1824_v38, 0.0 }
 0x47a   : > { %1891 = vadd.xlane.f32.xlu0 %v1890_v44  ;;  %1888 = vadd.xlane.f32.xlu1 %v1887_v62 }
 0x47e   : > { %1894 = vadd.xlane.f32.xlu1 %v1893_v12 }
 0x482   : > { %v10693_v13 = vpop.f32.mrf.mxu0 }
 0x483   : > { %v1902_v27 = vsel %vm1135_vm2, %v10693_v13, 0.0 }
 0x484   : > { %v1837_v14 = vpop.f32.mrf.mxu0 }
 0x485   : > { %v1896_v42 = vsel %vm1135_vm2, %v1837_v14, 0.0 }
 0x486   : > { %1897 = vadd.xlane.f32.xlu0 %v1896_v42  ;;  %v10696_v19 = vpop.f32.mrf.mxu0 }
 0x487   : > { %v1905_v11 = vsel %vm1135_vm2, %v10696_v19, 0.0 }
 0x488   : > { %v10698_v15 = vpop.f32.mrf.mxu0 }
 0x489   : > { %v1899_v6 = vsel %vm1135_vm2, %v10698_v15, 0.0 }
 0x48a   : > { %1903 = vadd.xlane.f32.xlu0 %v1902_v27  ;;  %1900 = vadd.xlane.f32.xlu1 %v1899_v6  ;;  %v10704_v16 = vpop.f32.mrf.mxu0 }
 0x48b   : > { %v1914_v9 = vsel %vm1135_vm2, %v10704_v16, 0.0 }
 0x48c   : > { %v10706_v21 = vpop.f32.mrf.mxu0 }
 0x48d   : > { %v1908_v22 = vsel %vm1135_vm2, %v10706_v21, 0.0 }
 0x48e   : > { %1906 = vadd.xlane.f32.xlu1 %v1905_v11  ;;  %1909 = vadd.xlane.f32.xlu0 %v1908_v22  ;;  %v10712_v24 = vpop.f32.mrf.mxu0 }
 0x48f   : > { %v1917_v48 = vsel %vm1135_vm2, %v10712_v24, 0.0 }
 0x490   : > { %v10716_v20 = vpop.f32.mrf.mxu0 }
 0x491   : > { %v1911_v28 = vsel %vm1135_vm2, %v10716_v20, 0.0 }
 0x492   : > { %1915 = vadd.xlane.f32.xlu0 %v1914_v9  ;;  %1912 = vadd.xlane.f32.xlu1 %v1911_v28  ;;  %v10720_v31 = vpop.f32.mrf.mxu0 }
 0x493   : > { %v1926_v18 = vsel %vm1135_vm2, %v10720_v31, 0.0 }
 0x494   : > { %v10724_v32 = vpop.f32.mrf.mxu0 }
 0x495   : > { %v1920_v25 = vsel %vm1135_vm2, %v10724_v32, 0.0 }
 0x496   : > { %1918 = vadd.xlane.f32.xlu1 %v1917_v48  ;;  %1921 = vadd.xlane.f32.xlu0 %v1920_v25  ;;  %v10728_v30 = vpop.f32.mrf.mxu0 }
 0x497   : > { %v1929_v36 = vsel %vm1135_vm2, %v10728_v30, 0.0 }
 0x498   : > { %v10732_v57 = vpop.f32.mrf.mxu0 }
 0x499   : > { %v1923_v33 = vsel %vm1135_vm2, %v10732_v57, 0.0 }
 0x49a   : > { %1927 = vadd.xlane.f32.xlu0 %v1926_v18  ;;  %1924 = vadd.xlane.f32.xlu1 %v1923_v33 }
 0x49e   : > { %1930 = vadd.xlane.f32.xlu1 %v1929_v36 }
 0x4ff   : > { %v1886_v29 = vpop.xlane.xlu0 %1885 }
 0x500   : > { %v1932_v37 = vmul.f32 0.03125, %v1886_v29 }
 0x502   : > { %v10738_v39 = vsub.f32 %v1821_v5, %v1932_v37 }
 0x503   : > { %v1892_v23 = vpop.xlane.xlu0 %1891  ;;  %v1889_v46 = vpop.xlane.xlu1 %1888 }
 0x504   : > { %v1934_v7 = vmul.f32 0.03125, %v1892_v23  ;;  %v1933_v17 = vmul.f32 0.03125, %v1889_v46  ;;  %v1964_v41 = vmul.f32 %v10738_v39, %v10738_v39 }
 0x506   : > { %v10742_v43 = vsub.f32 %v9055_v4, %v1934_v7  ;;  %v10744_v45 = vsub.f32 %v1824_v38, %v1933_v17  ;;  %v1980_v47 = vsel %vm1135_vm2, %v1964_v41, 0.0 }
 0x507   : > { %1981 = vadd.xlane.f32.xlu0 %v1980_v47  ;;  %v1895_v49 = vpop.xlane.xlu1 %1894 }
 0x508   : > { %v1935_v50 = vmul.f32 0.03125, %v1895_v49  ;;  %v1966_v26 = vmul.f32 %v10742_v43, %v10742_v43  ;;  %v1965_v56 = vmul.f32 %v10744_v45, %v10744_v45 }
 0x50a   : > { %v10751_v52 = vsub.f32 %v9056_v10, %v1935_v50  ;;  %v1986_v35 = vsel %vm1135_vm2, %v1966_v26, 0.0  ;;  %v1983_v53 = vsel %vm1135_vm2, %v1965_v56, 0.0 }
 0x50b   : > { %1987 = vadd.xlane.f32.xlu0 %v1986_v35  ;;  %1984 = vadd.xlane.f32.xlu1 %v1983_v53 }
 0x50c   : > { %v1967_v54 = vmul.f32 %v10751_v52, %v10751_v52 }
 0x50e   : > { %v1989_v63 = vsel %vm1135_vm2, %v1967_v54, 0.0 }
 0x50f   : > { %v1898_v40 = vpop.xlane.xlu0 %1897  ;;  %1990 = vadd.xlane.f32.xlu1 %v1989_v63 }
 0x510   : > { %v1936_v55 = vmul.f32 0.03125, %v1898_v40 }
 0x512   : > { %v10758_v58 = vsub.f32 %v1837_v14, %v1936_v55 }
 0x513   : > { %v1904_v59 = vpop.xlane.xlu0 %1903  ;;  %v1901_v61 = vpop.xlane.xlu1 %1900 }
 0x514   : > { %v1938_v60 = vmul.f32 0.03125, %v1904_v59  ;;  %v1937_v8 = vmul.f32 0.03125, %v1901_v61  ;;  %v1968_v34 = vmul.f32 %v10758_v58, %v10758_v58 }
 0x516   : > { %v10763_v1 = vsub.f32 %v10693_v13, %v1938_v60  ;;  %v10766_v2 = vsub.f32 %v10698_v15, %v1937_v8  ;;  %v1992_v3 = vsel %vm1135_vm2, %v1968_v34, 0.0 }
 0x517   : > { %v1910_v4 = vpop.xlane.xlu0 %1909  ;;  %1993 = vadd.xlane.f32.xlu0 %v1992_v3  ;;  %v1907_v5 = vpop.xlane.xlu1 %1906 }
 0x518   : > { %v1940_v51 = vmul.f32 0.03125, %v1910_v4  ;;  %v1939_v10 = vmul.f32 0.03125, %v1907_v5  ;;  %v1970_v38 = vmul.f32 %v10763_v1, %v10763_v1  ;;  %v1969_v44 = vmul.f32 %v10766_v2, %v10766_v2 }
 0x51a   : > { %v10774_v62 = vsub.f32 %v10706_v21, %v1940_v51  ;;  %v10777_v12 = vsub.f32 %v10696_v19, %v1939_v10  ;;  %v1998_v13 = vsel %vm1135_vm2, %v1970_v38, 0.0  ;;  %v1995_v14 = vsel %vm1135_vm2, %v1969_v44, 0.0 }
 0x51b   : > { %v1916_v42 = vpop.xlane.xlu0 %1915  ;;  %1999 = vadd.xlane.f32.xlu0 %v1998_v13  ;;  %1996 = vadd.xlane.f32.xlu1 %v1995_v14  ;;  %v1913_v15 = vpop.xlane.xlu1 %1912 }
 0x51c   : > { %v1942_v27 = vmul.f32 0.03125, %v1916_v42  ;;  %v1941_v6 = vmul.f32 0.03125, %v1913_v15  ;;  %v1972_v11 = vmul.f32 %v10774_v62, %v10774_v62  ;;  %v1971_v21 = vmul.f32 %v10777_v12, %v10777_v12 }
 0x51e   : > { %v10786_v22 = vsub.f32 %v10704_v16, %v1942_v27  ;;  %v10789_v19 = vsub.f32 %v10716_v20, %v1941_v6  ;;  %v2004_v9 = vsel %vm1135_vm2, %v1972_v11, 0.0  ;;  %v2001_v28 = vsel %vm1135_vm2, %v1971_v21, 0.0  ;;  %v10833_v27 = vld [vmem:[%s12968_s4 + $0x1] ss:$0 sm:$0xff] }
 0x51f   : > { %2005 = vadd.xlane.f32.xlu0 %v2004_v9  ;;  %v1922_v48 = vpop.xlane.xlu0 %1921  ;;  %2002 = vadd.xlane.f32.xlu1 %v2001_v28  ;;  %v1919_v25 = vpop.xlane.xlu1 %1918 }
 0x520   : > { %v1944_v18 = vmul.f32 0.03125, %v1922_v48  ;;  %v1943_v33 = vmul.f32 0.03125, %v1919_v25  ;;  %v1974_v36 = vmul.f32 %v10786_v22, %v10786_v22  ;;  %v1973_v16 = vmul.f32 %v10789_v19, %v10789_v19 }
 0x522   : > { %v10798_v29 = vsub.f32 %v10724_v32, %v1944_v18  ;;  %v10801_v20 = vsub.f32 %v10712_v24, %v1943_v33  ;;  %v2010_v37 = vsel %vm1135_vm2, %v1974_v36, 0.0  ;;  %v2007_v23 = vsel %vm1135_vm2, %v1973_v16, 0.0 }
 0x523   : > { %2011 = vadd.xlane.f32.xlu0 %v2010_v37  ;;  %v1928_v46 = vpop.xlane.xlu0 %1927  ;;  %2008 = vadd.xlane.f32.xlu1 %v2007_v23  ;;  %v1925_v7 = vpop.xlane.xlu1 %1924 }
 0x524   : > { %v1946_v17 = vmul.f32 0.03125, %v1928_v46  ;;  %v1945_v41 = vmul.f32 0.03125, %v1925_v7  ;;  %v1976_v47 = vmul.f32 %v10798_v29, %v10798_v29  ;;  %v1975_v32 = vmul.f32 %v10801_v20, %v10801_v20 }
 0x526   : > { %v10810_v49 = vsub.f32 %v10720_v31, %v1946_v17  ;;  %v10813_v24 = vsub.f32 %v10732_v57, %v1945_v41  ;;  %v2016_v50 = vsel %vm1135_vm2, %v1976_v47, 0.0  ;;  %v2013_v26 = vsel %vm1135_vm2, %v1975_v32, 0.0 }
 0x527   : > { %2017 = vadd.xlane.f32.xlu0 %v2016_v50  ;;  %2014 = vadd.xlane.f32.xlu1 %v2013_v26  ;;  %v1931_v56 = vpop.xlane.xlu1 %1930 }
 0x528   : > { %v1947_v35 = vmul.f32 0.03125, %v1931_v56  ;;  %v1978_v53 = vmul.f32 %v10810_v49, %v10810_v49  ;;  %v1977_v54 = vmul.f32 %v10813_v24, %v10813_v24 }
 0x52a   : > { %v10822_v31 = vsub.f32 %v10728_v30, %v1947_v35  ;;  %v2022_v57 = vsel %vm1135_vm2, %v1978_v53, 0.0  ;;  %v2019_v63 = vsel %vm1135_vm2, %v1977_v54, 0.0 }
 0x52b   : > { %2023 = vadd.xlane.f32.xlu0 %v2022_v57  ;;  %2020 = vadd.xlane.f32.xlu1 %v2019_v63 }
 0x52c   : > { %v1979_v40 = vmul.f32 %v10822_v31, %v10822_v31 }
 0x52e   : > { %v2025_v55 = vsel %vm1135_vm2, %v1979_v40, 0.0 }
 0x52f   : > { %2026 = vadd.xlane.f32.xlu1 %v2025_v55 }
 0x590   : > { %v1982_v59 = vpop.xlane.xlu0 %1981 }
 0x591   : > { %v2028_v61 = vmul.f32 0.03125, %v1982_v59 }
 0x593   : > { %v2044_v60 = vadd.f32 1e-05, %v2028_v61 }
 0x594   : > { %v1988_v8 = vpop.xlane.xlu0 %1987  ;;  %v1985_v34 = vpop.xlane.xlu1 %1984 }
 0x595   : > { %9854 = vrsqrt.f32 %v2044_v60  ;;  %v2030_v30 = vmul.f32 0.03125, %v1988_v8  ;;  %v2029_v3 = vmul.f32 0.03125, %v1985_v34 }
 0x597   : > { %v2046_v4 = vadd.f32 1e-05, %v2030_v30  ;;  %v2045_v5 = vadd.f32 1e-05, %v2029_v3 }
 0x598   : > { %v1991_v51 = vpop.xlane.xlu1 %1990 }
 0x599   : > { %9856 = vrsqrt.f32 %v2046_v4  ;;  %v2031_v10 = vmul.f32 0.03125, %v1991_v51 }
 0x59a   : > { %9858 = vrsqrt.f32 %v2045_v5 }
 0x59b   : > { %v2047_v38 = vadd.f32 1e-05, %v2031_v10 }
 0x59d   : > { %9860 = vrsqrt.f32 %v2047_v38 }
 0x5a0   : > { %v1994_v44 = vpop.xlane.xlu0 %1993 }
 0x5a1   : > { %v2032_v13 = vmul.f32 0.03125, %v1994_v44 }
 0x5a2   : > { %v9855_v14 = vpop.eup %9854 }
 0x5a3   : > { %v2048_v42 = vadd.f32 1e-05, %v2032_v13  ;;  %v2076_v15 = vmul.f32 %v9855_v14, %v10738_v39  ;;  %v10839_v39 = vld [vmem:[%s12969_s5 + $0x1] ss:$0 sm:$0xff] }
 0x5a4   : > { %v2000_v6 = vpop.xlane.xlu0 %1999  ;;  %v1997_v11 = vpop.xlane.xlu1 %1996 }
 0x5a5   : > { %9862 = vrsqrt.f32 %v2048_v42  ;;  %v2034_v21 = vmul.f32 0.03125, %v2000_v6  ;;  %v2033_v9 = vmul.f32 0.03125, %v1997_v11  ;;  %v2100_v48 = vmul.f32 %v10833_v27, %v2076_v15  ;;  %v10854_v6 = vld [vmem:[%s10343_s29] sm:$0xff]  }
 0x5a6   : > { %v9857_v28 = vpop.eup %9856 }
 0x5a7   : > { %v9859_v25 = vpop.eup %9858  ;;  %v2050_v18 = vadd.f32 1e-05, %v2034_v21  ;;  %v2049_v33 = vadd.f32 1e-05, %v2033_v9  ;;  %v2078_v36 = vmul.f32 %v9857_v28, %v10742_v43  ;;  %v2124_v47 = vadd.f32 %v10839_v39, %v2100_v48 }
 0x5a8   : > { %v2006_v16 = vpop.xlane.xlu0 %2005  ;;  %v2003_v37 = vpop.xlane.xlu1 %2002  ;;  %v2077_v23 = vmul.f32 %v9859_v25, %v10744_v45 }
 0x5a9   : > { %9864 = vrsqrt.f32 %v2050_v18  ;;  %v2036_v46 = vmul.f32 0.03125, %v2006_v16  ;;  %v2035_v7 = vmul.f32 0.03125, %v2003_v37  ;;  %v2102_v32 = vmul.f32 %v10833_v27, %v2078_v36 }
 0x5aa   : > { %v9861_v17 = vpop.eup %9860  ;;  %9866 = vrsqrt.f32 %v2049_v33  ;;  %v2101_v41 = vmul.f32 %v10833_v27, %v2077_v23  ;;  %v2140_v40 = vmax.f32 %v2124_v47, 0.0 }
 0x5ab   : > { %v2052_v50 = vadd.f32 1e-05, %v2036_v46  ;;  %v2051_v26 = vadd.f32 1e-05, %v2035_v7  ;;  %v2079_v56 = vmul.f32 %v9861_v17, %v10751_v52  ;;  %v2126_v45 = vadd.f32 %v10839_v39, %v2102_v32 }
 0x5ac   : > { %v2012_v43 = vpop.xlane.xlu0 %2011  ;;  %v2009_v35 = vpop.xlane.xlu1 %2008  ;;  %v2125_v53 = vadd.f32 %v10839_v39, %v2101_v41 }
 0x5ad   : > { %9868 = vrsqrt.f32 %v2052_v50  ;;  %v2038_v54 = vmul.f32 0.03125, %v2012_v43  ;;  %v2037_v57 = vmul.f32 0.03125, %v2009_v35  ;;  %v2103_v63 = vmul.f32 %v10833_v27, %v2079_v56 }
 0x5ae   : > { %9870 = vrsqrt.f32 %v2051_v26  ;;  %v2141_v55 = vmax.f32 %v2125_v53, 0.0  ;;  %v2142_v30 = vmax.f32 %v2126_v45, 0.0 }
 0x5af   : > { %v2054_v59 = vadd.f32 1e-05, %v2038_v54  ;;  %v2053_v61 = vadd.f32 1e-05, %v2037_v57  ;;  %v2127_v60 = vadd.f32 %v10839_v39, %v2103_v63 }
 0x5b0   : > { %v2018_v8 = vpop.xlane.xlu0 %2017  ;;  %v2015_v52 = vpop.xlane.xlu1 %2014  ;;  %v2156_v34 = vpack.c.bf16 %v2141_v55, %v2140_v40 }
 0x5b1   : > { %9872 = vrsqrt.f32 %v2054_v59  ;;  %v2040_v3 = vmul.f32 0.03125, %v2018_v8  ;;  %v2039_v4 = vmul.f32 0.03125, %v2015_v52  ;;  %v2143_v5 = vmax.f32 %v2127_v60, 0.0 }
 0x5b2   : > { %v9863_v51 = vpop.eup %9862  ;;  %9874 = vrsqrt.f32 %v2053_v61  ;;  %9070 = vmatpush3.bf16.msra.mxu1 %v2156_v34  ;;  %v10891_v34 = vld [vmem:[%s10343_s29 + $0x10] sm:$0xff]  }
 0x5b3   : > { %v2056_v10 = vadd.f32 1e-05, %v2040_v3  ;;  %v2055_v38 = vadd.f32 1e-05, %v2039_v4  ;;  %9075 = vmatprep.subr.bf16.mxu1 %v12981_v0  ;;  %v2157_v44 = vpack.c.bf16 %v2143_v5, %v2142_v30  ;;  %v2080_v13 = vmul.f32 %v9863_v51, %v10758_v58 }
 0x5b4   : > { %v2024_v14 = vpop.xlane.xlu0 %2023  ;;  %v2021_v42 = vpop.xlane.xlu1 %2020 }
 0x5b5   : > { %9876 = vrsqrt.f32 %v2056_v10  ;;  %v2042_v15 = vmul.f32 0.03125, %v2024_v14  ;;  %9072 = vmatmul.mubr.msk.bf16.vlgmr.msra.gmra.mxu1 %vm612_vm1, %v10854_v6  ;;  %v2041_v11 = vmul.f32 0.03125, %v2021_v42  ;;  %v2104_v9 = vmul.f32 %v10833_v27, %v2080_v13 }
 0x5b6   : > { %v9865_v21 = vpop.eup %9864  ;;  %9878 = vrsqrt.f32 %v2055_v38  ;;  %9076 = vmatpush3.bf16.msra.mxu1 %v2157_v44  ;;  %9077 = vmatprep.mubr.msk.bf16.mxu1 %vm10223_vm0, %v12981_v0 }
 0x5b7   : > { %v9867_v28 = vpop.eup %9866  ;;  %v2058_v58 = vadd.f32 1e-05, %v2042_v15  ;;  %v2057_v48 = vadd.f32 1e-05, %v2041_v11  ;;  %9081 = vmatprep.subr.bf16.mxu1 %v12981_v0  ;;  %v2082_v25 = vmul.f32 %v9865_v21, %v10763_v1  ;;  %v2128_v23 = vadd.f32 %v10839_v39, %v2104_v9 }
 0x5b8   : > { %v2027_v18 = vpop.xlane.xlu1 %2026  ;;  %v2081_v33 = vmul.f32 %v9867_v28, %v10766_v2  ;;  %v10871_v2 = vld [vmem:[%s10343_s29 + $0x8] sm:$0xff]  }
 0x5b9   : > { %9880 = vrsqrt.f32 %v2058_v58  ;;  %v2043_v36 = vmul.f32 0.03125, %v2027_v18  ;;  %v2106_v46 = vmul.f32 %v10833_v27, %v2082_v25  ;;  %v2144_v26 = vmax.f32 %v2128_v23, 0.0 }
 0x5ba   : > { %v9869_v16 = vpop.eup %9868  ;;  %9882 = vrsqrt.f32 %v2057_v48  ;;  %v2105_v37 = vmul.f32 %v10833_v27, %v2081_v33  ;;  %v10911_v48 = vld [vmem:[%s10343_s29 + $0x18] sm:$0xff]  }
 0x5bb   : > { %v9871_v7 = vpop.eup %9870  ;;  %v2059_v17 = vadd.f32 1e-05, %v2043_v36  ;;  %v2084_v41 = vmul.f32 %v9869_v16, %v10774_v62  ;;  %v2130_v43 = vadd.f32 %v10839_v39, %v2106_v46  ;;  %v10929_v46 = vld [vmem:[%s10343_s29 + $0x28] sm:$0xff]  }
 0x5bc   : > { %v2129_v1 = vadd.f32 %v10839_v39, %v2105_v37  ;;  %v2083_v47 = vmul.f32 %v9871_v7, %v10777_v12  ;;  %v10934_v7 = vld [vmem:[%s10343_s29 + $0x30] sm:$0xff]  }
 0x5bd   : > { %9884 = vrsqrt.f32 %v2059_v17  ;;  %9078 = vmatmul.mubr.msk.bf16.vlgmr.msra.gmra.mxu1 %vm612_vm1, %v10871_v2  ;;  %v2108_v32 = vmul.f32 %v10833_v27, %v2084_v41  ;;  %v2146_v40 = vmax.f32 %v2130_v43, 0.0  ;;  %v9808_v17 = vld [vmem:[%s12967_s3 + $0x18] sm:$0xff]   ;;  %v9809_v41 = vld [vmem:[%s12967_s3 + $0x10] sm:$0xff]  }
 0x5be   : > { %v9873_v50 = vpop.eup %9872  ;;  %v2145_v56 = vmax.f32 %v2129_v1, 0.0  ;;  %9083 = vmatprep.mubr.msk.bf16.mxu1 %vm10223_vm0, %v12981_v0  ;;  %v2107_v62 = vmul.f32 %v10833_v27, %v2083_v47 }
 0x5bf   : > { %v9875_v35 = vpop.eup %9874  ;;  %v2086_v12 = vmul.f32 %v9873_v50, %v10786_v22  ;;  %v2132_v57 = vadd.f32 %v10839_v39, %v2108_v32 }
 0x5c0   : > { %v2158_v53 = vpack.c.bf16 %v2145_v56, %v2144_v26  ;;  %v2131_v45 = vadd.f32 %v10839_v39, %v2107_v62  ;;  %v2085_v54 = vmul.f32 %v9875_v35, %v10789_v19 }
 0x5c1   : > { %v2110_v61 = vmul.f32 %v10833_v27, %v2086_v12  ;;  %v2148_v30 = vmax.f32 %v2132_v57, 0.0 }
 0x5c2   : > { %v9877_v63 = vpop.eup %9876  ;;  %9082 = vmatpush3.bf16.msra.mxu1 %v2158_v53  ;;  %v2147_v55 = vmax.f32 %v2131_v45, 0.0  ;;  %v2109_v59 = vmul.f32 %v10833_v27, %v2085_v54 }
 0x5c3   : > { %v9879_v60 = vpop.eup %9878  ;;  %9087 = vmatprep.subr.bf16.mxu1 %v12981_v0  ;;  %v2088_v22 = vmul.f32 %v9877_v63, %v10798_v29  ;;  %v2134_v29 = vadd.f32 %v10839_v39, %v2110_v61 }
 0x5c4   : > { %v2159_v8 = vpack.c.bf16 %v2147_v55, %v2146_v40  ;;  %v2133_v52 = vadd.f32 %v10839_v39, %v2109_v59  ;;  %v2087_v19 = vmul.f32 %v9879_v60, %v10801_v20 }
 0x5c5   : > { %9084 = vmatmul.mubr.msk.bf16.vlgmr.msra.gmra.mxu1 %vm612_vm1, %v10891_v34  ;;  %v2112_v51 = vmul.f32 %v10833_v27, %v2088_v22  ;;  %v2150_v15 = vmax.f32 %v2134_v29, 0.0 }
 0x5c6   : > { %v9881_v3 = vpop.eup %9880  ;;  %9088 = vmatpush3.bf16.msra.mxu1 %v2159_v8  ;;  %v2149_v4 = vmax.f32 %v2133_v52, 0.0  ;;  %9089 = vmatprep.mubr.msk.bf16.mxu1 %vm10223_vm0, %v12981_v0  ;;  %v2111_v5 = vmul.f32 %v10833_v27, %v2087_v19 }
 0x5c7   : > { %v9883_v10 = vpop.eup %9882  ;;  %9099 = vmatprep.subr.bf16.mxu1 %v12981_v0  ;;  %v2090_v20 = vmul.f32 %v9881_v3, %v10810_v49  ;;  %v2136_v9 = vadd.f32 %v10839_v39, %v2112_v51 }
 0x5c8   : > { %v2160_v38 = vpack.c.bf16 %v2149_v4, %v2148_v30  ;;  %v2135_v44 = vadd.f32 %v10839_v39, %v2111_v5  ;;  %v2089_v13 = vmul.f32 %v9883_v10, %v10813_v24  ;;  %v10916_v24 = vld [vmem:[%s10343_s29 + $0x20] sm:$0xff]  }
 0x5c9   : > { %v2114_v14 = vmul.f32 %v10833_v27, %v2090_v20 }
 0x5ca   : > { %v9885_v42 = vpop.eup %9884  ;;  %9094 = vmatpush3.bf16.msra.mxu0 %v2160_v38  ;;  %v2151_v11 = vmax.f32 %v2135_v44, 0.0  ;;  %v2113_v21 = vmul.f32 %v10833_v27, %v2089_v13 }
 0x5cb   : > { %9105 = vmatprep.subr.bf16.mxu0 %v12981_v0  ;;  %v2091_v49 = vmul.f32 %v9885_v42, %v10822_v31  ;;  %v2138_v18 = vadd.f32 %v10839_v39, %v2114_v14  ;;  %v2152_v31 = vmax.f32 %v2136_v9, 0.0 }
 0x5cc   : > { %v2161_v28 = vpack.c.bf16 %v2151_v11, %v2150_v15  ;;  %v2137_v58 = vadd.f32 %v10839_v39, %v2113_v21 }
 0x5cd   : > { %9090 = vmatmul.mubr.msk.bf16.vlgmr.msra.gmra.mxu1 %vm612_vm1, %v10911_v48  ;;  %9096 = vmatmul.mubr.msk.bf16.vlgmr.msra.gmra.mxu0 %vm612_vm1, %v10916_v24  ;;  %v2115_v25 = vmul.f32 %v10833_v27, %v2091_v49  ;;  %v2154_v37 = vmax.f32 %v2138_v18, 0.0 }
 0x5ce   : > { %9100 = vmatpush3.bf16.msra.mxu1 %v2161_v28  ;;  %v2153_v33 = vmax.f32 %v2137_v58, 0.0  ;;  %9101 = vmatprep.mubr.msk.bf16.mxu1 %vm10223_vm0, %v12981_v0 }
 0x5cf   : > { %9111 = vmatprep.subr.bf16.mxu1 %v12981_v0  ;;  %v2139_v36 = vadd.f32 %v10839_v39, %v2115_v25  ;;  %9107 = vmatprep.mubr.msk.bf16.mxu0 %vm10223_vm0, %v12981_v0  ;;  %v10942_v39 = vld [vmem:[%s10343_s29 + $0x38] sm:$0xff]   ;;  %s10232_s29 = smov 72  }
 0x5d0   : > { %v2162_v16 = vpack.c.bf16 %v2153_v33, %v2152_v31 }
 0x5d1   : > { %v2155_v27 = vmax.f32 %v2139_v36, 0.0 }
 0x5d2   : > { %9106 = vmatpush3.bf16.msra.mxu0 %v2162_v16 }
 0x5d3   : > { %v2163_v23 = vpack.c.bf16 %v2155_v27, %v2154_v37  ;;  %9117 = vmatprep.subr.bf16.mxu0 %v9808_v17 }
 0x5d5   : > { %9102 = vmatmul.mubr.msk.bf16.vlgmr.msra.gmra.mxu1 %vm612_vm1, %v10929_v46  ;;  %9108 = vmatmul.mubr.msk.bf16.vlgmr.msra.gmra.mxu0 %vm612_vm1, %v10934_v7 }
 0x5d6   : > { %9112 = vmatpush3.bf16.msra.mxu1 %v2163_v23  ;;  %9113 = vmatprep.mubr.msk.bf16.mxu1 %vm10223_vm0, %v12981_v0 }
 0x5d7   : > { %9137 = vmatprep.subr.bf16.mxu1 %v12981_v0  ;;  %9118 = vmatpush3.bf16.msra.mxu0 %v9808_v17 }
 0x5d8   : > { %9119 = vmatprep.subr.bf16.mxu0 %v9809_v41 }
 0x5db   : > { %9120 = vmatpush3.bf16.msra.mxu0 %v9809_v41 }
 0x5dc   : > { %9161 = vmatprep.subr.bf16.mxu0 %v12981_v0 }
 0x5dd   : > { %9114 = vmatmul.mubr.msk.bf16.vlgmr.msra.gmra.mxu1 %vm612_vm1, %v10942_v39 }
 0x5de   : > { %9139 = vmatprep.mubr.msk.bf16.mxu1 %vm10223_vm0, %v12981_v0 }
 0x675   : > { %v2198_v1 = vpop.f32.mrf.mxu1 }
 0x677   : > { %v9073_v47 = vpop.f32.mrf.mxu1 }
 0x679   : > { %v2201_v32 = vpop.f32.mrf.mxu1 }
 0x67a   : > { %v2492_v50 = vpack.c.bf16 %v2201_v32, %v2198_v1 }
 0x67b   : > { %v9074_v26 = vpop.f32.mrf.mxu1 }
 0x67c   : > { %9121 = vmatprep.mubr.msk.bf16.mxu0 %vm1135_vm2, %v2492_v50 }
 0x67d   : > { %v2239_v56 = vpop.f32.mrf.mxu1 }
 0x67f   : > { %v9079_v62 = vpop.f32.mrf.mxu1 }
 0x681   : > { %v2242_v43 = vpop.f32.mrf.mxu1 }
 0x682   : > { %v2493_v35 = vpack.c.bf16 %v2242_v43, %v2239_v56 }
 0x683   : > { %v9080_v12 = vpop.f32.mrf.mxu1 }
 0x684   : > { %9122 = vmatmul.mubr.msk.bf16.vlgmr.msra.gmra.mxu0 %vm1135_vm2, %v2493_v35 }
 0x685   : > { %v2280_v53 = vpop.f32.mrf.mxu1 }
 0x687   : > { %v9085_v45 = vpop.f32.mrf.mxu1 }
 0x689   : > { %v2283_v54 = vpop.f32.mrf.mxu1 }
 0x68a   : > { %v2494_v57 = vpack.c.bf16 %v2283_v54, %v2280_v53 }
 0x68b   : > { %v9086_v63 = vpop.f32.mrf.mxu1 }
 0x68c   : > { %9125 = vmatprep.mubr.msk.bf16.mxu0 %vm1135_vm2, %v2494_v57 }
 0x68d   : > { %v2321_v40 = vpop.f32.mrf.mxu1  ;;  %v2362_v55 = vpop.f32.mrf.mxu0 }
 0x68f   : > { %v9091_v59 = vpop.f32.mrf.mxu1  ;;  %v9097_v61 = vpop.f32.mrf.mxu0 }
 0x691   : > { %v2324_v60 = vpop.f32.mrf.mxu1  ;;  %v2365_v22 = vpop.f32.mrf.mxu0 }
 0x692   : > { %v2495_v8 = vpack.c.bf16 %v2324_v60, %v2321_v40  ;;  %v2496_v52 = vpack.c.bf16 %v2365_v22, %v2362_v55 }
 0x693   : > { %v9092_v19 = vpop.f32.mrf.mxu1  ;;  %v9098_v30 = vpop.f32.mrf.mxu0 }
 0x694   : > { %9126 = vmatmul.mubr.msk.bf16.gmra.mxu0 %vm1135_vm2, %v2495_v8 }
 0x695   : > { %v2403_v3 = vpop.f32.mrf.mxu1  ;;  %9129 = vmatprep.mubr.msk.bf16.mxu0 %vm1135_vm2, %v2496_v52  ;;  %v2444_v4 = vpop.f32.mrf.mxu0 }
 0x697   : > { %v9103_v5 = vpop.f32.mrf.mxu1  ;;  %v9109_v29 = vpop.f32.mrf.mxu0 }
 0x699   : > { %v2406_v51 = vpop.f32.mrf.mxu1  ;;  %v2447_v10 = vpop.f32.mrf.mxu0 }
 0x69a   : > { %v2497_v20 = vpack.c.bf16 %v2406_v51, %v2403_v3  ;;  %v2498_v38 = vpack.c.bf16 %v2447_v10, %v2444_v4 }
 0x69b   : > { %v9104_v44 = vpop.f32.mrf.mxu1  ;;  %v9110_v13 = vpop.f32.mrf.mxu0 }
 0x69c   : > { %9130 = vmatmul.mubr.msk.bf16.gmra.mxu0 %vm1135_vm2, %v2497_v20 }
 0x69d   : > { %v2485_v14 = vpop.f32.mrf.mxu1  ;;  %9133 = vmatprep.mubr.msk.bf16.mxu0 %vm1135_vm2, %v2498_v38 }
 0x69f   : > { %v9115_v42 = vpop.f32.mrf.mxu1 }
 0x6a1   : > { %v2488_v15 = vpop.f32.mrf.mxu1 }
 0x6a2   : > { %v2499_v11 = vpack.c.bf16 %v2488_v15, %v2485_v14 }
 0x6a3   : > { %v9116_v21 = vpop.f32.mrf.mxu1 }
 0x6a4   : > { %9134 = vmatmul.mubr.msk.bf16.gmra.mxu0 %vm1135_vm2, %v2499_v11 }
 0x6a5   : > { %9163 = vmatprep.mubr.msk.bf16.mxu0 %vm10223_vm0, %v12981_v0 }
 0x744   : > { %v9123_v9 = vpop.f32.mrf.mxu0 }
 0x745   : > { %v2639_v18 = vsel %vm1135_vm2, %v9123_v9, 0.0 }
 0x746   : > { %v2570_v49 = vpop.f32.mrf.mxu0 }
 0x747   : > { %v2633_v28 = vsel %vm1135_vm2, %v2570_v49, 0.0 }
 0x748   : > { %2634 = vadd.xlane.f32.xlu0 %v2633_v28  ;;  %v9124_v58 = vpop.f32.mrf.mxu0 }
 0x749   : > { %v2642_v33 = vsel %vm1135_vm2, %v9124_v58, 0.0 }
 0x74a   : > { %v2573_v25 = vpop.f32.mrf.mxu0 }
 0x74b   : > { %v2636_v31 = vsel %vm1135_vm2, %v2573_v25, 0.0 }
 0x74c   : > { %2640 = vadd.xlane.f32.xlu0 %v2639_v18  ;;  %2637 = vadd.xlane.f32.xlu1 %v2636_v31 }
 0x750   : > { %2643 = vadd.xlane.f32.xlu1 %v2642_v33 }
 0x754   : > { %v10969_v36 = vpop.f32.mrf.mxu0 }
 0x755   : > { %v2651_v17 = vsel %vm1135_vm2, %v10969_v36, 0.0 }
 0x756   : > { %v2586_v16 = vpop.f32.mrf.mxu0 }
 0x757   : > { %v2645_v37 = vsel %vm1135_vm2, %v2586_v16, 0.0 }
 0x758   : > { %2646 = vadd.xlane.f32.xlu0 %v2645_v37  ;;  %v10972_v27 = vpop.f32.mrf.mxu0 }
 0x759   : > { %v2654_v32 = vsel %vm1135_vm2, %v10972_v27, 0.0 }
 0x75a   : > { %v10974_v23 = vpop.f32.mrf.mxu0 }
 0x75b   : > { %v2648_v41 = vsel %vm1135_vm2, %v10974_v23, 0.0 }
 0x75c   : > { %2652 = vadd.xlane.f32.xlu0 %v2651_v17  ;;  %2649 = vadd.xlane.f32.xlu1 %v2648_v41  ;;  %v10980_v1 = vpop.f32.mrf.mxu0 }
 0x75d   : > { %v2663_v56 = vsel %vm1135_vm2, %v10980_v1, 0.0 }
 0x75e   : > { %v10982_v47 = vpop.f32.mrf.mxu0 }
 0x75f   : > { %v2657_v50 = vsel %vm1135_vm2, %v10982_v47, 0.0 }
 0x760   : > { %2655 = vadd.xlane.f32.xlu1 %v2654_v32  ;;  %2658 = vadd.xlane.f32.xlu0 %v2657_v50  ;;  %v10988_v26 = vpop.f32.mrf.mxu0 }
 0x761   : > { %v2666_v53 = vsel %vm1135_vm2, %v10988_v26, 0.0 }
 0x762   : > { %v10992_v62 = vpop.f32.mrf.mxu0 }
 0x763   : > { %v2660_v43 = vsel %vm1135_vm2, %v10992_v62, 0.0 }
 0x764   : > { %2664 = vadd.xlane.f32.xlu0 %v2663_v56  ;;  %2661 = vadd.xlane.f32.xlu1 %v2660_v43  ;;  %v10996_v35 = vpop.f32.mrf.mxu0 }
 0x765   : > { %v2675_v57 = vsel %vm1135_vm2, %v10996_v35, 0.0 }
 0x766   : > { %v10998_v12 = vpop.f32.mrf.mxu0 }
 0x767   : > { %v2669_v45 = vsel %vm1135_vm2, %v10998_v12, 0.0 }
 0x768   : > { %2667 = vadd.xlane.f32.xlu1 %v2666_v53  ;;  %2670 = vadd.xlane.f32.xlu0 %v2669_v45  ;;  %v11004_v54 = vpop.f32.mrf.mxu0 }
 0x769   : > { %v2678_v55 = vsel %vm1135_vm2, %v11004_v54, 0.0 }
 0x76a   : > { %v11008_v63 = vpop.f32.mrf.mxu0 }
 0x76b   : > { %v2672_v40 = vsel %vm1135_vm2, %v11008_v63, 0.0 }
 0x76c   : > { %2676 = vadd.xlane.f32.xlu0 %v2675_v57  ;;  %2673 = vadd.xlane.f32.xlu1 %v2672_v40 }
 0x770   : > { %2679 = vadd.xlane.f32.xlu1 %v2678_v55 }
 0x7d1   : > { %v2635_v59 = vpop.xlane.xlu0 %2634 }
 0x7d2   : > { %v2681_v61 = vmul.f32 0.03125, %v2635_v59 }
 0x7d4   : > { %v11014_v60 = vsub.f32 %v2570_v49, %v2681_v61 }
 0x7d5   : > { %v2641_v22 = vpop.xlane.xlu0 %2640  ;;  %v2638_v8 = vpop.xlane.xlu1 %2637 }
 0x7d6   : > { %v2683_v52 = vmul.f32 0.03125, %v2641_v22  ;;  %v2682_v19 = vmul.f32 0.03125, %v2638_v8  ;;  %v2713_v30 = vmul.f32 %v11014_v60, %v11014_v60 }
 0x7d8   : > { %v11018_v3 = vsub.f32 %v9123_v9, %v2683_v52  ;;  %v11020_v4 = vsub.f32 %v2573_v25, %v2682_v19  ;;  %v2729_v5 = vsel %vm1135_vm2, %v2713_v30, 0.0 }
 0x7d9   : > { %2730 = vadd.xlane.f32.xlu0 %v2729_v5  ;;  %v2644_v29 = vpop.xlane.xlu1 %2643 }
 0x7da   : > { %v2684_v51 = vmul.f32 0.03125, %v2644_v29  ;;  %v2715_v10 = vmul.f32 %v11018_v3, %v11018_v3  ;;  %v2714_v20 = vmul.f32 %v11020_v4, %v11020_v4 }
 0x7dc   : > { %v11027_v38 = vsub.f32 %v9124_v58, %v2684_v51  ;;  %v2735_v44 = vsel %vm1135_vm2, %v2715_v10, 0.0  ;;  %v2732_v13 = vsel %vm1135_vm2, %v2714_v20, 0.0 }
 0x7dd   : > { %2736 = vadd.xlane.f32.xlu0 %v2735_v44  ;;  %2733 = vadd.xlane.f32.xlu1 %v2732_v13 }
 0x7de   : > { %v2716_v14 = vmul.f32 %v11027_v38, %v11027_v38 }
 0x7e0   : > { %v2738_v42 = vsel %vm1135_vm2, %v2716_v14, 0.0 }
 0x7e1   : > { %v2647_v15 = vpop.xlane.xlu0 %2646  ;;  %2739 = vadd.xlane.f32.xlu1 %v2738_v42 }
 0x7e2   : > { %v2685_v11 = vmul.f32 0.03125, %v2647_v15 }
 0x7e4   : > { %v11034_v21 = vsub.f32 %v2586_v16, %v2685_v11 }
 0x7e5   : > { %v2653_v9 = vpop.xlane.xlu0 %2652  ;;  %v2650_v49 = vpop.xlane.xlu1 %2649 }
 0x7e6   : > { %v2687_v28 = vmul.f32 0.03125, %v2653_v9  ;;  %v2686_v58 = vmul.f32 0.03125, %v2650_v49  ;;  %v2717_v25 = vmul.f32 %v11034_v21, %v11034_v21 }
 0x7e8   : > { %v11039_v18 = vsub.f32 %v10969_v36, %v2687_v28  ;;  %v11042_v31 = vsub.f32 %v10974_v23, %v2686_v58  ;;  %v2741_v33 = vsel %vm1135_vm2, %v2717_v25, 0.0 }
 0x7e9   : > { %v2659_v37 = vpop.xlane.xlu0 %2658  ;;  %2742 = vadd.xlane.f32.xlu0 %v2741_v33  ;;  %v2656_v17 = vpop.xlane.xlu1 %2655 }
 0x7ea   : > { %v2689_v16 = vmul.f32 0.03125, %v2659_v37  ;;  %v2688_v41 = vmul.f32 0.03125, %v2656_v17  ;;  %v2719_v32 = vmul.f32 %v11039_v18, %v11039_v18  ;;  %v2718_v50 = vmul.f32 %v11042_v31, %v11042_v31 }
 0x7ec   : > { %v11050_v56 = vsub.f32 %v10982_v47, %v2689_v16  ;;  %v11053_v36 = vsub.f32 %v10972_v27, %v2688_v41  ;;  %v2747_v23 = vsel %vm1135_vm2, %v2719_v32, 0.0  ;;  %v2744_v43 = vsel %vm1135_vm2, %v2718_v50, 0.0 }
 0x7ed   : > { %v2665_v53 = vpop.xlane.xlu0 %2664  ;;  %2748 = vadd.xlane.f32.xlu0 %v2747_v23  ;;  %2745 = vadd.xlane.f32.xlu1 %v2744_v43  ;;  %v2662_v45 = vpop.xlane.xlu1 %2661 }
 0x7ee   : > { %v2691_v57 = vmul.f32 0.03125, %v2665_v53  ;;  %v2690_v40 = vmul.f32 0.03125, %v2662_v45  ;;  %v2721_v55 = vmul.f32 %v11050_v56, %v11050_v56  ;;  %v2720_v47 = vmul.f32 %v11053_v36, %v11053_v36 }
 0x7f0   : > { %v11062_v59 = vsub.f32 %v10980_v1, %v2691_v57  ;;  %v11065_v27 = vsub.f32 %v10992_v62, %v2690_v40  ;;  %v2753_v61 = vsel %vm1135_vm2, %v2721_v55, 0.0  ;;  %v2750_v22 = vsel %vm1135_vm2, %v2720_v47, 0.0 }
 0x7f1   : > { %2754 = vadd.xlane.f32.xlu0 %v2753_v61  ;;  %v2671_v8 = vpop.xlane.xlu0 %2670  ;;  %2751 = vadd.xlane.f32.xlu1 %v2750_v22  ;;  %v2668_v52 = vpop.xlane.xlu1 %2667 }
 0x7f2   : > { %v2693_v19 = vmul.f32 0.03125, %v2671_v8  ;;  %v2692_v30 = vmul.f32 0.03125, %v2668_v52  ;;  %v2723_v5 = vmul.f32 %v11062_v59, %v11062_v59  ;;  %v2722_v1 = vmul.f32 %v11065_v27, %v11065_v27 }
 0x7f4   : > { %v11074_v29 = vsub.f32 %v10998_v12, %v2693_v19  ;;  %v11077_v62 = vsub.f32 %v10988_v26, %v2692_v30  ;;  %v2759_v51 = vsel %vm1135_vm2, %v2723_v5, 0.0  ;;  %v2756_v10 = vsel %vm1135_vm2, %v2722_v1, 0.0  ;;  %v11109_v19 = vld [vmem:[%s12968_s4 + $0x2] ss:$0 sm:$0xff] }
 0x7f5   : > { %2760 = vadd.xlane.f32.xlu0 %v2759_v51  ;;  %v2677_v20 = vpop.xlane.xlu0 %2676  ;;  %2757 = vadd.xlane.f32.xlu1 %v2756_v10  ;;  %v2674_v44 = vpop.xlane.xlu1 %2673 }
 0x7f6   : > { %v2695_v13 = vmul.f32 0.03125, %v2677_v20  ;;  %v2694_v14 = vmul.f32 0.03125, %v2674_v44  ;;  %v2725_v42 = vmul.f32 %v11074_v29, %v11074_v29  ;;  %v2724_v12 = vmul.f32 %v11077_v62, %v11077_v62 }
 0x7f8   : > { %v11086_v15 = vsub.f32 %v10996_v35, %v2695_v13  ;;  %v11089_v26 = vsub.f32 %v11008_v63, %v2694_v14  ;;  %v2765_v11 = vsel %vm1135_vm2, %v2725_v42, 0.0  ;;  %v2762_v9 = vsel %vm1135_vm2, %v2724_v12, 0.0 }
 0x7f9   : > { %2766 = vadd.xlane.f32.xlu0 %v2765_v11  ;;  %2763 = vadd.xlane.f32.xlu1 %v2762_v9  ;;  %v2680_v49 = vpop.xlane.xlu1 %2679 }
 0x7fa   : > { %v2696_v28 = vmul.f32 0.03125, %v2680_v49  ;;  %v2727_v58 = vmul.f32 %v11086_v15, %v11086_v15  ;;  %v2726_v25 = vmul.f32 %v11089_v26, %v11089_v26 }
 0x7fc   : > { %v11098_v35 = vsub.f32 %v11004_v54, %v2696_v28  ;;  %v2771_v63 = vsel %vm1135_vm2, %v2727_v58, 0.0  ;;  %v2768_v33 = vsel %vm1135_vm2, %v2726_v25, 0.0 }
 0x7fd   : > { %2772 = vadd.xlane.f32.xlu0 %v2771_v63  ;;  %2769 = vadd.xlane.f32.xlu1 %v2768_v33 }
 0x7fe   : > { %v2728_v37 = vmul.f32 %v11098_v35, %v11098_v35 }
 0x800   : > { %v2774_v17 = vsel %vm1135_vm2, %v2728_v37, 0.0 }
 0x801   : > { %2775 = vadd.xlane.f32.xlu1 %v2774_v17 }
 0x862   : > { %v2731_v16 = vpop.xlane.xlu0 %2730 }
 0x863   : > { %v2777_v41 = vmul.f32 0.03125, %v2731_v16 }
 0x865   : > { %v2793_v32 = vadd.f32 1e-05, %v2777_v41 }
 0x866   : > { %v2737_v50 = vpop.xlane.xlu0 %2736  ;;  %v2734_v23 = vpop.xlane.xlu1 %2733 }
 0x867   : > { %9886 = vrsqrt.f32 %v2793_v32  ;;  %v2779_v54 = vmul.f32 0.03125, %v2737_v50  ;;  %v2778_v43 = vmul.f32 0.03125, %v2734_v23 }
 0x869   : > { %v2795_v53 = vadd.f32 1e-05, %v2779_v54  ;;  %v2794_v45 = vadd.f32 1e-05, %v2778_v43 }
 0x86a   : > { %v2740_v57 = vpop.xlane.xlu1 %2739 }
 0x86b   : > { %9888 = vrsqrt.f32 %v2795_v53  ;;  %v2780_v40 = vmul.f32 0.03125, %v2740_v57 }
 0x86c   : > { %9890 = vrsqrt.f32 %v2794_v45 }
 0x86d   : > { %v2796_v55 = vadd.f32 1e-05, %v2780_v40 }
 0x86f   : > { %9892 = vrsqrt.f32 %v2796_v55 }
 0x872   : > { %v2743_v47 = vpop.xlane.xlu0 %2742 }
 0x873   : > { %v2781_v61 = vmul.f32 0.03125, %v2743_v47 }
 0x874   : > { %v9887_v22 = vpop.eup %9886 }
 0x875   : > { %v2797_v8 = vadd.f32 1e-05, %v2781_v61  ;;  %v2825_v52 = vmul.f32 %v9887_v22, %v11014_v60  ;;  %v11115_v60 = vld [vmem:[%s12969_s5 + $0x2] ss:$0 sm:$0xff] }
 0x876   : > { %v2749_v30 = vpop.xlane.xlu0 %2748  ;;  %v2746_v5 = vpop.xlane.xlu1 %2745 }
 0x877   : > { %9894 = vrsqrt.f32 %v2797_v8  ;;  %v2783_v1 = vmul.f32 0.03125, %v2749_v30  ;;  %v2782_v51 = vmul.f32 0.03125, %v2746_v5  ;;  %v2849_v20 = vmul.f32 %v11109_v19, %v2825_v52 }
 0x878   : > { %v9889_v10 = vpop.eup %9888 }
 0x879   : > { %v9891_v44 = vpop.eup %9890  ;;  %v2799_v13 = vadd.f32 1e-05, %v2783_v1  ;;  %v2798_v14 = vadd.f32 1e-05, %v2782_v51  ;;  %v2827_v42 = vmul.f32 %v9889_v10, %v11018_v3  ;;  %v2873_v63 = vadd.f32 %v11115_v60, %v2849_v20 }
 0x87a   : > { %v2755_v12 = vpop.xlane.xlu0 %2754  ;;  %v2752_v11 = vpop.xlane.xlu1 %2751  ;;  %v2826_v9 = vmul.f32 %v9891_v44, %v11020_v4 }
 0x87b   : > { %9896 = vrsqrt.f32 %v2799_v13  ;;  %v2785_v49 = vmul.f32 0.03125, %v2755_v12  ;;  %v2784_v28 = vmul.f32 0.03125, %v2752_v11  ;;  %v2851_v33 = vmul.f32 %v11109_v19, %v2827_v42 }
 0x87c   : > { %v9893_v58 = vpop.eup %9892  ;;  %9898 = vrsqrt.f32 %v2798_v14  ;;  %v2850_v25 = vmul.f32 %v11109_v19, %v2826_v9  ;;  %v2889_v43 = vmax.f32 %v2873_v63, 0.0 }
 0x87d   : > { %v2801_v37 = vadd.f32 1e-05, %v2785_v49  ;;  %v2800_v17 = vadd.f32 1e-05, %v2784_v28  ;;  %v2828_v16 = vmul.f32 %v9893_v58, %v11027_v38  ;;  %v2875_v4 = vadd.f32 %v11115_v60, %v2851_v33 }
 0x87e   : > { %v2761_v3 = vpop.xlane.xlu0 %2760  ;;  %v2758_v41 = vpop.xlane.xlu1 %2757  ;;  %v2874_v32 = vadd.f32 %v11115_v60, %v2850_v25 }
 0x87f   : > { %9900 = vrsqrt.f32 %v2801_v37  ;;  %v2787_v50 = vmul.f32 0.03125, %v2761_v3  ;;  %v2786_v23 = vmul.f32 0.03125, %v2758_v41  ;;  %v2852_v54 = vmul.f32 %v11109_v19, %v2828_v16 }
 0x880   : > { %9902 = vrsqrt.f32 %v2800_v17  ;;  %v2890_v53 = vmax.f32 %v2874_v32, 0.0  ;;  %v2891_v61 = vmax.f32 %v2875_v4, 0.0 }
 0x881   : > { %v2803_v45 = vadd.f32 1e-05, %v2787_v50  ;;  %v2802_v57 = vadd.f32 1e-05, %v2786_v23  ;;  %v2876_v40 = vadd.f32 %v11115_v60, %v2852_v54 }
 0x882   : > { %v2767_v55 = vpop.xlane.xlu0 %2766  ;;  %v2764_v38 = vpop.xlane.xlu1 %2763  ;;  %v2905_v47 = vpack.c.bf16 %v2890_v53, %v2889_v43 }
 0x883   : > { %9904 = vrsqrt.f32 %v2803_v45  ;;  %v2789_v22 = vmul.f32 0.03125, %v2767_v55  ;;  %v2788_v8 = vmul.f32 0.03125, %v2764_v38  ;;  %v2892_v52 = vmax.f32 %v2876_v40, 0.0 }
 0x884   : > { %v9895_v30 = vpop.eup %9894  ;;  %9906 = vrsqrt.f32 %v2802_v57  ;;  %9138 = vmatpush3.bf16.msra.mxu1 %v2905_v47 }
 0x885   : > { %v2805_v5 = vadd.f32 1e-05, %v2789_v22  ;;  %v2804_v1 = vadd.f32 1e-05, %v2788_v8  ;;  %9143 = vmatprep.subr.bf16.mxu1 %v12981_v0  ;;  %v2906_v51 = vpack.c.bf16 %v2892_v52, %v2891_v61  ;;  %v2829_v10 = vmul.f32 %v9895_v30, %v11034_v21 }
 0x886   : > { %v2773_v20 = vpop.xlane.xlu0 %2772  ;;  %v2770_v44 = vpop.xlane.xlu1 %2769 }
 0x887   : > { %9908 = vrsqrt.f32 %v2805_v5  ;;  %v2791_v13 = vmul.f32 0.03125, %v2773_v20  ;;  %9140 = vmatmul.mubr.msk.bf16.vlgmr.msra.gmra.mxu1 %vm612_vm1, %v10854_v6  ;;  %v2790_v14 = vmul.f32 0.03125, %v2770_v44  ;;  %v2853_v12 = vmul.f32 %v11109_v19, %v2829_v10 }
 0x888   : > { %v9897_v42 = vpop.eup %9896  ;;  %9910 = vrsqrt.f32 %v2804_v1  ;;  %9144 = vmatpush3.bf16.msra.mxu1 %v2906_v51  ;;  %9145 = vmatprep.mubr.msk.bf16.mxu1 %vm10223_vm0, %v12981_v0 }
 0x889   : > { %v9899_v11 = vpop.eup %9898  ;;  %v2807_v9 = vadd.f32 1e-05, %v2791_v13  ;;  %v2806_v49 = vadd.f32 1e-05, %v2790_v14  ;;  %9149 = vmatprep.subr.bf16.mxu1 %v12981_v0  ;;  %v2831_v21 = vmul.f32 %v9897_v42, %v11039_v18  ;;  %v2877_v33 = vadd.f32 %v11115_v60, %v2853_v12 }
 0x88a   : > { %v2776_v28 = vpop.xlane.xlu1 %2775  ;;  %v2830_v58 = vmul.f32 %v9899_v11, %v11042_v31 }
 0x88b   : > { %9912 = vrsqrt.f32 %v2807_v9  ;;  %v2792_v6 = vmul.f32 0.03125, %v2776_v28  ;;  %v2855_v37 = vmul.f32 %v11109_v19, %v2831_v21  ;;  %v2893_v4 = vmax.f32 %v2877_v33, 0.0 }
 0x88c   : > { %v9901_v25 = vpop.eup %9900  ;;  %9914 = vrsqrt.f32 %v2806_v49  ;;  %v2854_v63 = vmul.f32 %v11109_v19, %v2830_v58 }
 0x88d   : > { %v9903_v17 = vpop.eup %9902  ;;  %v2808_v16 = vadd.f32 1e-05, %v2792_v6  ;;  %v2833_v3 = vmul.f32 %v9901_v25, %v11050_v56  ;;  %v2879_v56 = vadd.f32 %v11115_v60, %v2855_v37 }
 0x88e   : > { %v2878_v41 = vadd.f32 %v11115_v60, %v2854_v63  ;;  %v2832_v18 = vmul.f32 %v9903_v17, %v11053_v36 }
 0x88f   : > { %9916 = vrsqrt.f32 %v2808_v16  ;;  %9146 = vmatmul.mubr.msk.bf16.vlgmr.msra.gmra.mxu1 %vm612_vm1, %v10871_v2  ;;  %v2857_v31 = vmul.f32 %v11109_v19, %v2833_v3  ;;  %v2895_v40 = vmax.f32 %v2879_v56, 0.0 }
 0x890   : > { %v9905_v32 = vpop.eup %9904  ;;  %v2894_v50 = vmax.f32 %v2878_v41, 0.0  ;;  %9151 = vmatprep.mubr.msk.bf16.mxu1 %vm10223_vm0, %v12981_v0  ;;  %v2856_v23 = vmul.f32 %v11109_v19, %v2832_v18 }
 0x891   : > { %v9907_v54 = vpop.eup %9906  ;;  %v2835_v43 = vmul.f32 %v9905_v32, %v11062_v59  ;;  %v2881_v45 = vadd.f32 %v11115_v60, %v2857_v31 }
 0x892   : > { %v2907_v36 = vpack.c.bf16 %v2894_v50, %v2893_v4  ;;  %v2880_v53 = vadd.f32 %v11115_v60, %v2856_v23  ;;  %v2834_v2 = vmul.f32 %v9907_v54, %v11065_v27 }
 0x893   : > { %v2859_v47 = vmul.f32 %v11109_v19, %v2835_v43  ;;  %v2897_v52 = vmax.f32 %v2881_v45, 0.0 }
 0x894   : > { %v9909_v57 = vpop.eup %9908  ;;  %9150 = vmatpush3.bf16.msra.mxu1 %v2907_v36  ;;  %v2896_v55 = vmax.f32 %v2880_v53, 0.0  ;;  %v2858_v38 = vmul.f32 %v11109_v19, %v2834_v2 }
 0x895   : > { %v9911_v61 = vpop.eup %9910  ;;  %9155 = vmatprep.subr.bf16.mxu1 %v12981_v0  ;;  %v2837_v59 = vmul.f32 %v9909_v57, %v11074_v29  ;;  %v2883_v51 = vadd.f32 %v11115_v60, %v2859_v47 }
 0x896   : > { %v2908_v22 = vpack.c.bf16 %v2896_v55, %v2895_v40  ;;  %v2882_v8 = vadd.f32 %v11115_v60, %v2858_v38  ;;  %v2836_v27 = vmul.f32 %v9911_v61, %v11077_v62 }
 0x897   : > { %9152 = vmatmul.mubr.msk.bf16.vlgmr.msra.gmra.mxu1 %vm612_vm1, %v10891_v34  ;;  %v2861_v29 = vmul.f32 %v11109_v19, %v2837_v59  ;;  %v2899_v42 = vmax.f32 %v2883_v51, 0.0 }
 0x898   : > { %v9913_v30 = vpop.eup %9912  ;;  %9156 = vmatpush3.bf16.msra.mxu1 %v2908_v22  ;;  %v2898_v5 = vmax.f32 %v2882_v8, 0.0  ;;  %9157 = vmatprep.mubr.msk.bf16.mxu1 %vm10223_vm0, %v12981_v0  ;;  %v2860_v1 = vmul.f32 %v11109_v19, %v2836_v27 }
 0x899   : > { %v9915_v10 = vpop.eup %9914  ;;  %9167 = vmatprep.subr.bf16.mxu1 %v12981_v0  ;;  %v2839_v62 = vmul.f32 %v9913_v30, %v11086_v15  ;;  %v2885_v9 = vadd.f32 %v11115_v60, %v2861_v29 }
 0x89a   : > { %v2909_v20 = vpack.c.bf16 %v2898_v5, %v2897_v52  ;;  %v2884_v34 = vadd.f32 %v11115_v60, %v2860_v1  ;;  %v2838_v44 = vmul.f32 %v9915_v10, %v11089_v26 }
 0x89b   : > { %v2863_v13 = vmul.f32 %v11109_v19, %v2839_v62  ;;  %v2901_v58 = vmax.f32 %v2885_v9, 0.0 }
 0x89c   : > { %v9917_v14 = vpop.eup %9916  ;;  %9162 = vmatpush3.bf16.msra.mxu0 %v2909_v20  ;;  %v2900_v12 = vmax.f32 %v2884_v34, 0.0  ;;  %v2862_v11 = vmul.f32 %v11109_v19, %v2838_v44 }
 0x89d   : > { %9173 = vmatprep.subr.bf16.mxu0 %v12981_v0  ;;  %v2840_v49 = vmul.f32 %v9917_v14, %v11098_v35  ;;  %v2887_v28 = vadd.f32 %v11115_v60, %v2863_v13 }
 0x89e   : > { %v2910_v15 = vpack.c.bf16 %v2900_v12, %v2899_v42  ;;  %v2886_v21 = vadd.f32 %v11115_v60, %v2862_v11 }
 0x89f   : > { %9158 = vmatmul.mubr.msk.bf16.vlgmr.msra.gmra.mxu1 %vm612_vm1, %v10911_v48  ;;  %9164 = vmatmul.mubr.msk.bf16.vlgmr.msra.gmra.mxu0 %vm612_vm1, %v10916_v24  ;;  %v2864_v26 = vmul.f32 %v11109_v19, %v2840_v49  ;;  %v2903_v25 = vmax.f32 %v2887_v28, 0.0 }
 0x8a0   : > { %9168 = vmatpush3.bf16.msra.mxu1 %v2910_v15  ;;  %v2902_v6 = vmax.f32 %v2886_v21, 0.0  ;;  %9169 = vmatprep.mubr.msk.bf16.mxu1 %vm10223_vm0, %v12981_v0 }
 0x8a1   : > { %9179 = vmatprep.subr.bf16.mxu1 %v12981_v0  ;;  %v2888_v35 = vadd.f32 %v11115_v60, %v2864_v26  ;;  %9175 = vmatprep.mubr.msk.bf16.mxu0 %vm10223_vm0, %v12981_v0  ;;  %v9810_v60 = vld [vmem:[%s12967_s3 + $0x28] sm:$0xff]  }
 0x8a2   : > { %v2911_v48 = vpack.c.bf16 %v2902_v6, %v2901_v58 }
 0x8a3   : > { %v2904_v24 = vmax.f32 %v2888_v35, 0.0 }
 0x8a4   : > { %9174 = vmatpush3.bf16.msra.mxu0 %v2911_v48 }
 0x8a5   : > { %v2912_v19 = vpack.c.bf16 %v2904_v24, %v2903_v25  ;;  %9185 = vmatprep.subr.bf16.mxu0 %v9810_v60 }
 0x8a7   : > { %9170 = vmatmul.mubr.msk.bf16.vlgmr.msra.gmra.mxu1 %vm612_vm1, %v10929_v46  ;;  %9176 = vmatmul.mubr.msk.bf16.vlgmr.msra.gmra.mxu0 %vm612_vm1, %v10934_v7  ;;  %v9811_v46 = vld [vmem:[%s12967_s3 + $0x20] sm:$0xff]  }
 0x8a8   : > { %9180 = vmatpush3.bf16.msra.mxu1 %v2912_v19  ;;  %9181 = vmatprep.mubr.msk.bf16.mxu1 %vm10223_vm0, %v12981_v0 }
 0x8a9   : > { %9186 = vmatpush3.bf16.msra.mxu0 %v9810_v60 }
 0x8aa   : > { %9187 = vmatprep.subr.bf16.mxu0 %v9811_v46 }
 0x8ad   : > { %9188 = vmatpush3.bf16.msra.mxu0 %v9811_v46 }
 0x8ae   : > { %9225 = vmatprep.subr.bf16.mxu0 %v12981_v0 }
 0x8af   : > { %9182 = vmatmul.mubr.msk.bf16.vlgmr.msra.gmra.mxu1 %vm612_vm1, %v10942_v39 }
 0x947   : > { %v2947_v7 = vpop.f32.mrf.mxu1 }
 0x949   : > { %v9141_v63 = vpop.f32.mrf.mxu1 }
 0x94b   : > { %v2950_v33 = vpop.f32.mrf.mxu1 }
 0x94c   : > { %v3241_v37 = vpack.c.bf16 %v2950_v33, %v2947_v7 }
 0x94d   : > { %v9142_v17 = vpop.f32.mrf.mxu1 }
 0x94e   : > { %9189 = vmatprep.mubr.msk.bf16.mxu0 %vm1135_vm2, %v3241_v37 }
 0x94f   : > { %v2988_v39 = vpop.f32.mrf.mxu1 }
 0x951   : > { %v9147_v16 = vpop.f32.mrf.mxu1 }
 0x953   : > { %v2991_v3 = vpop.f32.mrf.mxu1 }
 0x954   : > { %v3242_v41 = vpack.c.bf16 %v2991_v3, %v2988_v39 }
 0x955   : > { %v9148_v18 = vpop.f32.mrf.mxu1 }
 0x956   : > { %9190 = vmatmul.mubr.msk.bf16.vlgmr.msra.gmra.mxu0 %vm1135_vm2, %v3242_v41 }
 0x957   : > { %v3029_v31 = vpop.f32.mrf.mxu1 }
 0x959   : > { %v9153_v32 = vpop.f32.mrf.mxu1 }
 0x95b   : > { %v3032_v4 = vpop.f32.mrf.mxu1 }
 0x95c   : > { %v3243_v50 = vpack.c.bf16 %v3032_v4, %v3029_v31 }
 0x95d   : > { %v9154_v23 = vpop.f32.mrf.mxu1 }
 0x95e   : > { %9193 = vmatprep.mubr.msk.bf16.mxu0 %vm1135_vm2, %v3243_v50 }
 0x95f   : > { %v3070_v56 = vpop.f32.mrf.mxu1  ;;  %v3111_v54 = vpop.f32.mrf.mxu0 }
 0x961   : > { %v9159_v43 = vpop.f32.mrf.mxu1  ;;  %v9165_v36 = vpop.f32.mrf.mxu0 }
 0x963   : > { %v3073_v53 = vpop.f32.mrf.mxu1  ;;  %v3114_v2 = vpop.f32.mrf.mxu0 }
 0x964   : > { %v3244_v45 = vpack.c.bf16 %v3073_v53, %v3070_v56  ;;  %v3245_v57 = vpack.c.bf16 %v3114_v2, %v3111_v54 }
 0x965   : > { %v9160_v40 = vpop.f32.mrf.mxu1  ;;  %v9166_v55 = vpop.f32.mrf.mxu0 }
 0x966   : > { %9194 = vmatmul.mubr.msk.bf16.gmra.mxu0 %vm1135_vm2, %v3244_v45 }
 0x967   : > { %v3152_v38 = vpop.f32.mrf.mxu1  ;;  %9197 = vmatprep.mubr.msk.bf16.mxu0 %vm1135_vm2, %v3245_v57  ;;  %v3193_v47 = vpop.f32.mrf.mxu0 }
 0x969   : > { %v9171_v61 = vpop.f32.mrf.mxu1  ;;  %v9177_v59 = vpop.f32.mrf.mxu0 }
 0x96b   : > { %v3155_v22 = vpop.f32.mrf.mxu1  ;;  %v3196_v8 = vpop.f32.mrf.mxu0 }
 0x96c   : > { %v3246_v27 = vpack.c.bf16 %v3155_v22, %v3152_v38  ;;  %v3247_v52 = vpack.c.bf16 %v3196_v8, %v3193_v47 }
 0x96d   : > { %v9172_v30 = vpop.f32.mrf.mxu1  ;;  %v9178_v5 = vpop.f32.mrf.mxu0 }
 0x96e   : > { %9198 = vmatmul.mubr.msk.bf16.gmra.mxu0 %vm1135_vm2, %v3246_v27 }
 0x96f   : > { %v3234_v1 = vpop.f32.mrf.mxu1  ;;  %9201 = vmatprep.mubr.msk.bf16.mxu0 %vm1135_vm2, %v3247_v52 }
 0x971   : > { %v9183_v51 = vpop.f32.mrf.mxu1 }
 0x973   : > { %v3237_v29 = vpop.f32.mrf.mxu1 }
 0x974   : > { %v3248_v10 = vpack.c.bf16 %v3237_v29, %v3234_v1 }
 0x975   : > { %v9184_v62 = vpop.f32.mrf.mxu1 }
 0x976   : > { %9202 = vmatmul.mubr.msk.bf16.gmra.mxu0 %vm1135_vm2, %v3248_v10 }
 0x977   : > { %9227 = vmatprep.mubr.msk.bf16.mxu0 %vm10223_vm0, %v12981_v0 }
 0xa16   : > { %v9191_v20 = vpop.f32.mrf.mxu0 }
 0xa17   : > { %v3388_v42 = vsel %vm1135_vm2, %v9191_v20, 0.0 }
 0xa18   : > { %v3319_v34 = vpop.f32.mrf.mxu0 }
 0xa19   : > { %v3382_v44 = vsel %vm1135_vm2, %v3319_v34, 0.0 }
 0xa1a   : > { %3383 = vadd.xlane.f32.xlu0 %v3382_v44  ;;  %v9192_v13 = vpop.f32.mrf.mxu0 }
 0xa1b   : > { %v3391_v11 = vsel %vm1135_vm2, %v9192_v13, 0.0 }
 0xa1c   : > { %v3322_v14 = vpop.f32.mrf.mxu0 }
 0xa1d   : > { %v3385_v12 = vsel %vm1135_vm2, %v3322_v14, 0.0 }
 0xa1e   : > { %3389 = vadd.xlane.f32.xlu0 %v3388_v42  ;;  %3386 = vadd.xlane.f32.xlu1 %v3385_v12 }
 0xa22   : > { %3392 = vadd.xlane.f32.xlu1 %v3391_v11 }
 0xa26   : > { %v11218_v9 = vpop.f32.mrf.mxu0 }
 0xa27   : > { %v3400_v28 = vsel %vm1135_vm2, %v11218_v9, 0.0 }
 0xa28   : > { %v3335_v49 = vpop.f32.mrf.mxu0 }
 0xa29   : > { %v3394_v15 = vsel %vm1135_vm2, %v3335_v49, 0.0 }
 0xa2a   : > { %3395 = vadd.xlane.f32.xlu0 %v3394_v15  ;;  %v11221_v21 = vpop.f32.mrf.mxu0 }
 0xa2b   : > { %v3403_v48 = vsel %vm1135_vm2, %v11221_v21, 0.0 }
 0xa2c   : > { %v11223_v26 = vpop.f32.mrf.mxu0 }
 0xa2d   : > { %v3397_v58 = vsel %vm1135_vm2, %v11223_v26, 0.0 }
 0xa2e   : > { %3401 = vadd.xlane.f32.xlu0 %v3400_v28  ;;  %3398 = vadd.xlane.f32.xlu1 %v3397_v58  ;;  %v11229_v6 = vpop.f32.mrf.mxu0 }
 0xa2f   : > { %v3412_v60 = vsel %vm1135_vm2, %v11229_v6, 0.0 }
 0xa30   : > { %v11231_v35 = vpop.f32.mrf.mxu0 }
 0xa31   : > { %v3406_v25 = vsel %vm1135_vm2, %v11231_v35, 0.0 }
 0xa32   : > { %3404 = vadd.xlane.f32.xlu1 %v3403_v48  ;;  %3407 = vadd.xlane.f32.xlu0 %v3406_v25  ;;  %v11237_v24 = vpop.f32.mrf.mxu0 }
 0xa33   : > { %v3415_v33 = vsel %vm1135_vm2, %v11237_v24, 0.0 }
 0xa34   : > { %v11239_v19 = vpop.f32.mrf.mxu0 }
 0xa35   : > { %v3409_v46 = vsel %vm1135_vm2, %v11239_v19, 0.0 }
 0xa36   : > { %3413 = vadd.xlane.f32.xlu0 %v3412_v60  ;;  %3410 = vadd.xlane.f32.xlu1 %v3409_v46  ;;  %v11245_v7 = vpop.f32.mrf.mxu0 }
 0xa37   : > { %v3424_v39 = vsel %vm1135_vm2, %v11245_v7, 0.0 }
 0xa38   : > { %v11247_v63 = vpop.f32.mrf.mxu0 }
 0xa39   : > { %v3418_v37 = vsel %vm1135_vm2, %v11247_v63, 0.0 }
 0xa3a   : > { %3416 = vadd.xlane.f32.xlu1 %v3415_v33  ;;  %3419 = vadd.xlane.f32.xlu0 %v3418_v37  ;;  %v11253_v17 = vpop.f32.mrf.mxu0 }
 0xa3b   : > { %v3427_v41 = vsel %vm1135_vm2, %v11253_v17, 0.0 }
 0xa3c   : > { %v11257_v16 = vpop.f32.mrf.mxu0 }
 0xa3d   : > { %v3421_v3 = vsel %vm1135_vm2, %v11257_v16, 0.0 }
 0xa3e   : > { %3425 = vadd.xlane.f32.xlu0 %v3424_v39  ;;  %3422 = vadd.xlane.f32.xlu1 %v3421_v3 }
 0xa42   : > { %3428 = vadd.xlane.f32.xlu1 %v3427_v41 }
 0xaa3   : > { %v3384_v18 = vpop.xlane.xlu0 %3383 }
 0xaa4   : > { %v3430_v31 = vmul.f32 0.03125, %v3384_v18 }
 0xaa6   : > { %v11263_v32 = vsub.f32 %v3319_v34, %v3430_v31 }
 0xaa7   : > { %v3390_v4 = vpop.xlane.xlu0 %3389  ;;  %v3387_v50 = vpop.xlane.xlu1 %3386 }
 0xaa8   : > { %v3432_v23 = vmul.f32 0.03125, %v3390_v4  ;;  %v3431_v56 = vmul.f32 0.03125, %v3387_v50  ;;  %v3462_v54 = vmul.f32 %v11263_v32, %v11263_v32 }
 0xaaa   : > { %v11267_v43 = vsub.f32 %v9191_v20, %v3432_v23  ;;  %v11269_v36 = vsub.f32 %v3322_v14, %v3431_v56  ;;  %v3478_v53 = vsel %vm1135_vm2, %v3462_v54, 0.0 }
 0xaab   : > { %3479 = vadd.xlane.f32.xlu0 %v3478_v53  ;;  %v3393_v2 = vpop.xlane.xlu1 %3392 }
 0xaac   : > { %v3433_v45 = vmul.f32 0.03125, %v3393_v2  ;;  %v3464_v57 = vmul.f32 %v11267_v43, %v11267_v43  ;;  %v3463_v40 = vmul.f32 %v11269_v36, %v11269_v36 }
 0xaae   : > { %v11276_v55 = vsub.f32 %v9192_v13, %v3433_v45  ;;  %v3484_v38 = vsel %vm1135_vm2, %v3464_v57, 0.0  ;;  %v3481_v47 = vsel %vm1135_vm2, %v3463_v40, 0.0 }
 0xaaf   : > { %3485 = vadd.xlane.f32.xlu0 %v3484_v38  ;;  %3482 = vadd.xlane.f32.xlu1 %v3481_v47 }
 0xab0   : > { %v3465_v61 = vmul.f32 %v11276_v55, %v11276_v55 }
 0xab2   : > { %v3487_v59 = vsel %vm1135_vm2, %v3465_v61, 0.0 }
 0xab3   : > { %v3396_v22 = vpop.xlane.xlu0 %3395  ;;  %3488 = vadd.xlane.f32.xlu1 %v3487_v59 }
 0xab4   : > { %v3434_v8 = vmul.f32 0.03125, %v3396_v22 }
 0xab6   : > { %v11283_v27 = vsub.f32 %v3335_v49, %v3434_v8  ;;  %v9812_v8 = vld [vmem:[%s12970_s6 + $0x8] sm:$0xff]  }
 0xab7   : > { %v3402_v52 = vpop.xlane.xlu0 %3401  ;;  %v3399_v30 = vpop.xlane.xlu1 %3398  ;;  %9205 = vmatprep.subr.bf16.mxu1 %v9812_v8 }
 0xab8   : > { %v3436_v5 = vmul.f32 0.03125, %v3402_v52  ;;  %v3435_v1 = vmul.f32 0.03125, %v3399_v30  ;;  %v3466_v51 = vmul.f32 %v11283_v27, %v11283_v27  ;;  %9206 = vmatpush3.bf16.msra.mxu1 %v9812_v8 }
 0xaba   : > { %v11288_v29 = vsub.f32 %v11218_v9, %v3436_v5  ;;  %v11291_v10 = vsub.f32 %v11223_v26, %v3435_v1  ;;  %v3490_v62 = vsel %vm1135_vm2, %v3466_v51, 0.0 }
 0xabb   : > { %v3408_v20 = vpop.xlane.xlu0 %3407  ;;  %3491 = vadd.xlane.f32.xlu0 %v3490_v62  ;;  %v3405_v34 = vpop.xlane.xlu1 %3404 }
 0xabc   : > { %v3438_v44 = vmul.f32 0.03125, %v3408_v20  ;;  %v3437_v13 = vmul.f32 0.03125, %v3405_v34  ;;  %v3468_v14 = vmul.f32 %v11288_v29, %v11288_v29  ;;  %v3467_v42 = vmul.f32 %v11291_v10, %v11291_v10 }
 0xabe   : > { %v11299_v12 = vsub.f32 %v11231_v35, %v3438_v44  ;;  %v11302_v11 = vsub.f32 %v11221_v21, %v3437_v13  ;;  %v3496_v9 = vsel %vm1135_vm2, %v3468_v14, 0.0  ;;  %v3493_v49 = vsel %vm1135_vm2, %v3467_v42, 0.0 }
 0xabf   : > { %v3414_v15 = vpop.xlane.xlu0 %3413  ;;  %3497 = vadd.xlane.f32.xlu0 %v3496_v9  ;;  %3494 = vadd.xlane.f32.xlu1 %v3493_v49  ;;  %v3411_v26 = vpop.xlane.xlu1 %3410 }
 0xac0   : > { %v3440_v28 = vmul.f32 0.03125, %v3414_v15  ;;  %v3439_v58 = vmul.f32 0.03125, %v3411_v26  ;;  %v3470_v48 = vmul.f32 %v11299_v12, %v11299_v12  ;;  %v3469_v35 = vmul.f32 %v11302_v11, %v11302_v11 }
 0xac2   : > { %v11311_v25 = vsub.f32 %v11229_v6, %v3440_v28  ;;  %v11314_v21 = vsub.f32 %v11239_v19, %v3439_v58  ;;  %v3502_v60 = vsel %vm1135_vm2, %v3470_v48, 0.0  ;;  %v3499_v46 = vsel %vm1135_vm2, %v3469_v35, 0.0  ;;  %v11365_v48 = vld [vmem:[%s12968_s4 + $0x3] ss:$0 sm:$0xff] }
 0xac3   : > { %3503 = vadd.xlane.f32.xlu0 %v3502_v60  ;;  %v3420_v33 = vpop.xlane.xlu0 %3419  ;;  %3500 = vadd.xlane.f32.xlu1 %v3499_v46  ;;  %v3417_v37 = vpop.xlane.xlu1 %3416 }
 0xac4   : > { %v3442_v39 = vmul.f32 0.03125, %v3420_v33  ;;  %v3441_v3 = vmul.f32 0.03125, %v3417_v37  ;;  %v3472_v41 = vmul.f32 %v11311_v25, %v11311_v25  ;;  %v3471_v6 = vmul.f32 %v11314_v21, %v11314_v21 }
 0xac6   : > { %v11323_v18 = vsub.f32 %v11247_v63, %v3442_v39  ;;  %v11326_v19 = vsub.f32 %v11237_v24, %v3441_v3  ;;  %v3508_v31 = vsel %vm1135_vm2, %v3472_v41, 0.0  ;;  %v3505_v4 = vsel %vm1135_vm2, %v3471_v6, 0.0 }
 0xac7   : > { %3509 = vadd.xlane.f32.xlu0 %v3508_v31  ;;  %v3426_v50 = vpop.xlane.xlu0 %3425  ;;  %3506 = vadd.xlane.f32.xlu1 %v3505_v4  ;;  %v3423_v23 = vpop.xlane.xlu1 %3422 }
 0xac8   : > { %v3444_v56 = vmul.f32 0.03125, %v3426_v50  ;;  %v3443_v54 = vmul.f32 0.03125, %v3423_v23  ;;  %v3474_v53 = vmul.f32 %v11323_v18, %v11323_v18  ;;  %v3473_v63 = vmul.f32 %v11326_v19, %v11326_v19 }
 0xaca   : > { %v11335_v2 = vsub.f32 %v11245_v7, %v3444_v56  ;;  %v11338_v24 = vsub.f32 %v11257_v16, %v3443_v54  ;;  %v3514_v45 = vsel %vm1135_vm2, %v3474_v53, 0.0  ;;  %v3511_v57 = vsel %vm1135_vm2, %v3473_v63, 0.0 }
 0xacb   : > { %3515 = vadd.xlane.f32.xlu0 %v3514_v45  ;;  %3512 = vadd.xlane.f32.xlu1 %v3511_v57  ;;  %v3429_v40 = vpop.xlane.xlu1 %3428 }
 0xacc   : > { %v3445_v38 = vmul.f32 0.03125, %v3429_v40  ;;  %v3476_v47 = vmul.f32 %v11335_v2, %v11335_v2  ;;  %v3475_v61 = vmul.f32 %v11338_v24, %v11338_v24 }
 0xace   : > { %v11347_v7 = vsub.f32 %v11253_v17, %v3445_v38  ;;  %v3520_v16 = vsel %vm1135_vm2, %v3476_v47, 0.0  ;;  %v3517_v59 = vsel %vm1135_vm2, %v3475_v61, 0.0  ;;  %v9813_v17 = vld [vmem:[%s12970_s6] sm:$0xff]  }
 0xacf   : > { %3521 = vadd.xlane.f32.xlu0 %v3520_v16  ;;  %3518 = vadd.xlane.f32.xlu1 %v3517_v59 }
 0xad0   : > { %v3477_v22 = vmul.f32 %v11347_v7, %v11347_v7  ;;  %9207 = vmatprep.subr.bf16.mxu1 %v9813_v17 }
 0xad1   : > { %9208 = vmatpush3.bf16.msra.mxu1 %v9813_v17 }
 0xad2   : > { %v3523_v52 = vsel %vm1135_vm2, %v3477_v22, 0.0  ;;  %9231 = vmatprep.subr.bf16.mxu1 %v12981_v0 }
 0xad3   : > { %3524 = vadd.xlane.f32.xlu1 %v3523_v52 }
 0xb34   : > { %v3480_v30 = vpop.xlane.xlu0 %3479 }
 0xb35   : > { %v3526_v5 = vmul.f32 0.03125, %v3480_v30 }
 0xb37   : > { %v3542_v1 = vadd.f32 1e-05, %v3526_v5 }
 0xb38   : > { %v3486_v51 = vpop.xlane.xlu0 %3485  ;;  %v3483_v62 = vpop.xlane.xlu1 %3482 }
 0xb39   : > { %9918 = vrsqrt.f32 %v3542_v1  ;;  %v3528_v20 = vmul.f32 0.03125, %v3486_v51  ;;  %v3527_v34 = vmul.f32 0.03125, %v3483_v62 }
 0xb3b   : > { %v3544_v44 = vadd.f32 1e-05, %v3528_v20  ;;  %v3543_v13 = vadd.f32 1e-05, %v3527_v34 }
 0xb3c   : > { %v3489_v14 = vpop.xlane.xlu1 %3488 }
 0xb3d   : > { %9920 = vrsqrt.f32 %v3544_v44  ;;  %v3529_v42 = vmul.f32 0.03125, %v3489_v14 }
 0xb3e   : > { %9922 = vrsqrt.f32 %v3543_v13 }
 0xb3f   : > { %v3545_v9 = vadd.f32 1e-05, %v3529_v42 }
 0xb41   : > { %9924 = vrsqrt.f32 %v3545_v9 }
 0xb44   : > { %v3492_v49 = vpop.xlane.xlu0 %3491 }
 0xb45   : > { %v3530_v15 = vmul.f32 0.03125, %v3492_v49 }
 0xb46   : > { %v9919_v26 = vpop.eup %9918 }
 0xb47   : > { %v3546_v28 = vadd.f32 1e-05, %v3530_v15  ;;  %v3574_v58 = vmul.f32 %v9919_v26, %v11263_v32  ;;  %v11372_v32 = vld [vmem:[%s12969_s5 + $0x3] ss:$0 sm:$0xff] }
 0xb48   : > { %v3498_v35 = vpop.xlane.xlu0 %3497  ;;  %v3495_v60 = vpop.xlane.xlu1 %3494 }
 0xb49   : > { %9926 = vrsqrt.f32 %v3546_v28  ;;  %v3532_v46 = vmul.f32 0.03125, %v3498_v35  ;;  %v3531_v33 = vmul.f32 0.03125, %v3495_v60  ;;  %v3598_v39 = vmul.f32 %v11365_v48, %v3574_v58 }
 0xb4a   : > { %v9921_v37 = vpop.eup %9920 }
 0xb4b   : > { %v9923_v3 = vpop.eup %9922  ;;  %v3576_v41 = vmul.f32 %v9921_v37, %v11267_v43  ;;  %v3548_v6 = vadd.f32 1e-05, %v3532_v46  ;;  %v3547_v31 = vadd.f32 1e-05, %v3531_v33  ;;  %v3622_v43 = vadd.f32 %v11372_v32, %v3598_v39 }
 0xb4c   : > { %v3504_v4 = vpop.xlane.xlu0 %3503  ;;  %v3501_v50 = vpop.xlane.xlu1 %3500  ;;  %v3575_v23 = vmul.f32 %v9923_v3, %v11269_v36 }
 0xb4d   : > { %9928 = vrsqrt.f32 %v3548_v6  ;;  %v3534_v56 = vmul.f32 0.03125, %v3504_v4  ;;  %v3533_v54 = vmul.f32 0.03125, %v3501_v50  ;;  %v3600_v45 = vmul.f32 %v11365_v48, %v3576_v41 }
 0xb4e   : > { %v9925_v53 = vpop.eup %9924  ;;  %9930 = vrsqrt.f32 %v3547_v31  ;;  %v3599_v63 = vmul.f32 %v11365_v48, %v3575_v23  ;;  %v3638_v52 = vmax.f32 %v3622_v43, 0.0 }
 0xb4f   : > { %v3577_v57 = vmul.f32 %v9925_v53, %v11276_v55  ;;  %v3550_v40 = vadd.f32 1e-05, %v3534_v56  ;;  %v3549_v38 = vadd.f32 1e-05, %v3533_v54  ;;  %v3624_v36 = vadd.f32 %v11372_v32, %v3600_v45 }
 0xb50   : > { %v3510_v47 = vpop.xlane.xlu0 %3509  ;;  %v3507_v61 = vpop.xlane.xlu1 %3506  ;;  %v3623_v16 = vadd.f32 %v11372_v32, %v3599_v63 }
 0xb51   : > { %9932 = vrsqrt.f32 %v3550_v40  ;;  %v3536_v59 = vmul.f32 0.03125, %v3510_v47  ;;  %v3535_v22 = vmul.f32 0.03125, %v3507_v61  ;;  %v3601_v8 = vmul.f32 %v11365_v48, %v3577_v57 }
 0xb52   : > { %9934 = vrsqrt.f32 %v3549_v38  ;;  %v3639_v17 = vmax.f32 %v3623_v16, 0.0  ;;  %v3640_v20 = vmax.f32 %v3624_v36, 0.0 }
 0xb53   : > { %v3552_v30 = vadd.f32 1e-05, %v3536_v59  ;;  %v3551_v5 = vadd.f32 1e-05, %v3535_v22  ;;  %v3625_v55 = vadd.f32 %v11372_v32, %v3601_v8 }
 0xb54   : > { %v3516_v1 = vpop.xlane.xlu0 %3515  ;;  %v3513_v51 = vpop.xlane.xlu1 %3512  ;;  %v3654_v62 = vpack.c.bf16 %v3639_v17, %v3638_v52 }
 0xb55   : > { %9936 = vrsqrt.f32 %v3552_v30  ;;  %v3538_v34 = vmul.f32 0.03125, %v3516_v1  ;;  %v3537_v44 = vmul.f32 0.03125, %v3513_v51  ;;  %v3641_v13 = vmax.f32 %v3625_v55, 0.0 }
 0xb56   : > { %v9927_v14 = vpop.eup %9926  ;;  %9938 = vrsqrt.f32 %v3551_v5  ;;  %9209 = vmatprep.mubr.msk.bf16.mxu1 %vm1135_vm2, %v3654_v62 }
 0xb57   : > { %v3554_v42 = vadd.f32 1e-05, %v3538_v34  ;;  %v3553_v9 = vadd.f32 1e-05, %v3537_v44  ;;  %v3655_v49 = vpack.c.bf16 %v3641_v13, %v3640_v20  ;;  %v3578_v15 = vmul.f32 %v9927_v14, %v11283_v27 }
 0xb58   : > { %v3522_v26 = vpop.xlane.xlu0 %3521  ;;  %v3519_v28 = vpop.xlane.xlu1 %3518 }
 0xb59   : > { %9940 = vrsqrt.f32 %v3554_v42  ;;  %v3540_v58 = vmul.f32 0.03125, %v3522_v26  ;;  %v3539_v35 = vmul.f32 0.03125, %v3519_v28  ;;  %9210 = vmatmul.mubr.msk.bf16.vlgmr.msra.gmra.mxu1 %vm1135_vm2, %v3655_v49  ;;  %v3602_v46 = vmul.f32 %v11365_v48, %v3578_v15 }
 0xb5a   : > { %v9929_v60 = vpop.eup %9928  ;;  %9942 = vrsqrt.f32 %v3553_v9 }
 0xb5b   : > { %v9931_v33 = vpop.eup %9930  ;;  %v3556_v37 = vadd.f32 1e-05, %v3540_v58  ;;  %v3555_v39 = vadd.f32 1e-05, %v3539_v35  ;;  %v3580_v3 = vmul.f32 %v9929_v60, %v11288_v29  ;;  %v3626_v50 = vadd.f32 %v11372_v32, %v3602_v46 }
 0xb5c   : > { %v3525_v41 = vpop.xlane.xlu1 %3524  ;;  %v3579_v6 = vmul.f32 %v9931_v33, %v11291_v10 }
 0xb5d   : > { %9944 = vrsqrt.f32 %v3556_v37  ;;  %v3541_v27 = vmul.f32 0.03125, %v3525_v41  ;;  %v3604_v23 = vmul.f32 %v11365_v48, %v3580_v3  ;;  %v3642_v45 = vmax.f32 %v3626_v50, 0.0 }
 0xb5e   : > { %v9933_v31 = vpop.eup %9932  ;;  %9946 = vrsqrt.f32 %v3555_v39  ;;  %v3603_v4 = vmul.f32 %v11365_v48, %v3579_v6 }
 0xb5f   : > { %v9935_v56 = vpop.eup %9934  ;;  %v3557_v54 = vadd.f32 1e-05, %v3541_v27  ;;  %v3582_v53 = vmul.f32 %v9933_v31, %v11299_v12  ;;  %v3628_v38 = vadd.f32 %v11372_v32, %v3604_v23 }
 0xb60   : > { %v3627_v63 = vadd.f32 %v11372_v32, %v3603_v4  ;;  %v3581_v29 = vmul.f32 %v9935_v56, %v11302_v11 }
 0xb61   : > { %9948 = vrsqrt.f32 %v3557_v54  ;;  %v3606_v10 = vmul.f32 %v11365_v48, %v3582_v53  ;;  %v3644_v22 = vmax.f32 %v3628_v38, 0.0 }
 0xb62   : > { %v9937_v43 = vpop.eup %9936  ;;  %v3643_v57 = vmax.f32 %v3627_v63, 0.0  ;;  %v3605_v40 = vmul.f32 %v11365_v48, %v3581_v29 }
 0xb63   : > { %v9939_v47 = vpop.eup %9938  ;;  %v3584_v61 = vmul.f32 %v9937_v43, %v11311_v25  ;;  %v3630_v11 = vadd.f32 %v11372_v32, %v3606_v10 }
 0xb64   : > { %v3656_v16 = vpack.c.bf16 %v3643_v57, %v3642_v45  ;;  %v3629_v12 = vadd.f32 %v11372_v32, %v3605_v40  ;;  %v3583_v36 = vmul.f32 %v9939_v47, %v11314_v21 }
 0xb65   : > { %v3608_v17 = vmul.f32 %v11365_v48, %v3584_v61  ;;  %v3646_v21 = vmax.f32 %v3630_v11, 0.0 }
 0xb66   : > { %v9941_v59 = vpop.eup %9940  ;;  %9213 = vmatprep.mubr.msk.bf16.mxu1 %vm1135_vm2, %v3656_v16  ;;  %v3645_v8 = vmax.f32 %v3629_v12, 0.0  ;;  %v3607_v52 = vmul.f32 %v11365_v48, %v3583_v36 }
 0xb67   : > { %v9943_v30 = vpop.eup %9942  ;;  %v3586_v5 = vmul.f32 %v9941_v59, %v11323_v18  ;;  %v3632_v34 = vadd.f32 %v11372_v32, %v3608_v17 }
 0xb68   : > { %v3657_v25 = vpack.c.bf16 %v3645_v8, %v3644_v22  ;;  %v3631_v55 = vadd.f32 %v11372_v32, %v3607_v52  ;;  %v3585_v1 = vmul.f32 %v9943_v30, %v11326_v19 }
 0xb69   : > { %v3610_v44 = vmul.f32 %v11365_v48, %v3586_v5  ;;  %v3648_v15 = vmax.f32 %v3632_v34, 0.0 }
 0xb6a   : > { %v9945_v51 = vpop.eup %9944  ;;  %9214 = vmatmul.mubr.msk.bf16.gmra.mxu1 %vm1135_vm2, %v3657_v25  ;;  %v3647_v62 = vmax.f32 %v3631_v55, 0.0  ;;  %v3609_v20 = vmul.f32 %v11365_v48, %v3585_v1 }
 0xb6b   : > { %v9947_v13 = vpop.eup %9946  ;;  %v3588_v14 = vmul.f32 %v9945_v51, %v11335_v2  ;;  %v3634_v58 = vadd.f32 %v11372_v32, %v3610_v44 }
 0xb6c   : > { %v3658_v18 = vpack.c.bf16 %v3647_v62, %v3646_v21  ;;  %v3633_v42 = vadd.f32 %v11372_v32, %v3609_v20  ;;  %v3587_v9 = vmul.f32 %v9947_v13, %v11338_v24 }
 0xb6d   : > { %v3612_v19 = vmul.f32 %v11365_v48, %v3588_v14  ;;  %v3650_v33 = vmax.f32 %v3634_v58, 0.0 }
 0xb6e   : > { %v9949_v49 = vpop.eup %9948  ;;  %9217 = vmatprep.mubr.msk.bf16.mxu1 %vm1135_vm2, %v3658_v18  ;;  %v3649_v26 = vmax.f32 %v3633_v42, 0.0  ;;  %v3611_v28 = vmul.f32 %v11365_v48, %v3587_v9 }
 0xb6f   : > { %v3589_v35 = vmul.f32 %v9949_v49, %v11347_v7  ;;  %v3636_v24 = vadd.f32 %v11372_v32, %v3612_v19 }
 0xb70   : > { %v3659_v60 = vpack.c.bf16 %v3649_v26, %v3648_v15  ;;  %v3635_v2 = vadd.f32 %v11372_v32, %v3611_v28 }
 0xb71   : > { %v3613_v46 = vmul.f32 %v11365_v48, %v3589_v35  ;;  %v3652_v41 = vmax.f32 %v3636_v24, 0.0  ;;  %v8573_v48 = vld [vmem:[%s12971_s7] ss:$0 sm:$0xff] }
 0xb72   : > { %9218 = vmatmul.mubr.msk.bf16.gmra.mxu1 %vm1135_vm2, %v3659_v60  ;;  %v3651_v37 = vmax.f32 %v3635_v2, 0.0 }
 0xb73   : > { %v3637_v39 = vadd.f32 %v11372_v32, %v3613_v46 }
 0xb74   : > { %v3660_v3 = vpack.c.bf16 %v3651_v37, %v3650_v33 }
 0xb75   : > { %v3653_v6 = vmax.f32 %v3637_v39, 0.0 }
 0xb76   : > { %9221 = vmatprep.mubr.msk.bf16.mxu1 %vm1135_vm2, %v3660_v3 }
 0xb77   : > { %v3661_v27 = vpack.c.bf16 %v3653_v6, %v3652_v41 }
 0xb7a   : > { %9222 = vmatmul.mubr.msk.bf16.gmra.mxu1 %vm1135_vm2, %v3661_v27 }
 0xb7b   : > { %9233 = vmatprep.mubr.msk.bf16.mxu1 %vm10223_vm0, %v12981_v0 }
 0xc19   : > { %v9211_v7 = vpop.f32.mrf.mxu1 }
 0xc1a   : > { %v3752_v50 = vadd.f32 %v9211_v7, %v8573_v48 }
 0xc1b   : > { %v3743_v31 = vpop.f32.mrf.mxu1 }
 0xc1c   : > { %v3744_v56 = vadd.f32 %v8573_v48, %v3743_v31 }
 0xc1d   : > { %v9212_v4 = vpop.f32.mrf.mxu1 }
 0xc1e   : > { %v3755_v32 = vadd.f32 %v9212_v4, %v8573_v48 }
 0xc1f   : > { %v3746_v23 = vpop.f32.mrf.mxu1 }
 0xc20   : > { %v11432_v54 = vpack.c.bf16 %v3755_v32, %v3752_v50  ;;  %v3747_v53 = vadd.f32 %v8573_v48, %v3746_v23 }
 0xc22   : > { %v11434_v63 = vpack.c.bf16 %v3747_v53, %v3744_v56  ;;  %3866 = vrot.lane.b32.xlu1 %v11432_v54, %s10224_s0 }
 0xc24   : > { %3815 = vrot.lane.b32.xlu0 %v11434_v63, %s10224_s0 }
 0xc2a   : > { %v9215_v29 = vpop.f32.mrf.mxu1 }
 0xc2b   : > { %v3768_v12 = vadd.f32 %v9215_v29, %v8573_v48 }
 0xc2c   : > { %v3759_v10 = vpop.f32.mrf.mxu1 }
 0xc2d   : > { %v3760_v57 = vadd.f32 %v8573_v48, %v3759_v10 }
 0xc2e   : > { %v9216_v43 = vpop.f32.mrf.mxu1 }
 0xc2f   : > { %v3771_v47 = vadd.f32 %v9216_v43, %v8573_v48 }
 0xc30   : > { %v3762_v45 = vpop.f32.mrf.mxu1 }
 0xc31   : > { %v3763_v40 = vadd.f32 %v8573_v48, %v3762_v45  ;;  %v11444_v11 = vpack.c.bf16 %v3771_v47, %v3768_v12 }
 0xc32   : > { %v9219_v38 = vpop.f32.mrf.mxu1 }
 0xc33   : > { %v11440_v61 = vpack.c.bf16 %v3763_v40, %v3760_v57  ;;  %v3784_v8 = vadd.f32 %v9219_v38, %v8573_v48 }
 0xc34   : > { %v3775_v16 = vpop.f32.mrf.mxu1 }
 0xc35   : > { %3916 = vrot.lane.b32.xlu1 %v11440_v61, %s10224_s0  ;;  %v3776_v52 = vadd.f32 %v8573_v48, %v3775_v16 }
 0xc36   : > { %v9220_v36 = vpop.f32.mrf.mxu1 }
 0xc37   : > { %v3787_v59 = vadd.f32 %v9220_v36, %v8573_v48 }
 0xc38   : > { %v3778_v22 = vpop.f32.mrf.mxu1 }
 0xc39   : > { %v3779_v17 = vadd.f32 %v8573_v48, %v3778_v22  ;;  %3966 = vrot.lane.b32.xlu1 %v11444_v11, %s10224_s0  ;;  %v11448_v5 = vpack.c.bf16 %v3787_v59, %v3784_v8 }
 0xc3a   : > { %v9223_v30 = vpop.f32.mrf.mxu1 }
 0xc3b   : > { %v11450_v25 = vpack.c.bf16 %v3779_v17, %v3776_v52  ;;  %v3800_v21 = vadd.f32 %v9223_v30, %v8573_v48 }
 0xc3c   : > { %v3791_v55 = vpop.f32.mrf.mxu1 }
 0xc3d   : > { %4066 = vrot.lane.b32.xlu1 %v11448_v5, %s10224_s0  ;;  %4016 = vrot.lane.b32.xlu0 %v11450_v25, %s10224_s0  ;;  %v3792_v20 = vadd.f32 %v8573_v48, %v3791_v55 }
 0xc3e   : > { %v9224_v1 = vpop.f32.mrf.mxu1 }
 0xc3f   : > { %v3803_v51 = vadd.f32 %v9224_v1, %v8573_v48 }
 0xc40   : > { %v3794_v62 = vpop.f32.mrf.mxu1 }
 0xc41   : > { %v11456_v34 = vpack.c.bf16 %v3803_v51, %v3800_v21  ;;  %v3795_v44 = vadd.f32 %v8573_v48, %v3794_v62 }
 0xc43   : > { %v11458_v13 = vpack.c.bf16 %v3795_v44, %v3792_v20  ;;  %4166 = vrot.lane.b32.xlu1 %v11456_v34, %s10224_s0 }
 0xc45   : > { %4116 = vrot.lane.b32.xlu0 %v11458_v13, %s10224_s0 }
 0xc94   : > { %v3867_v14 = vpop.permute.xlu1 %3866 }
 0xc95   : > { %v3872_v18 = vsel %vm3817_vm3, %v3867_v14, 0 }
 0xc96   : > { %v3816_v42 = vpop.permute.xlu0 %3815  ;;  %9232 = vmatpush3.bf16.xpose.msra.mxu1 %v3872_v18 }
 0xc97   : > { %v3822_v9 = vsel %vm3817_vm3, %v3816_v42, 0  ;;  %9243 = vmatprep.subr.bf16.mxu1 %v12981_v0 }
 0xc98   : > { %9226 = vmatpush3.bf16.xpose.msra.mxu0 %v3822_v9 }
 0xc99   : > { %9237 = vmatprep.subr.bf16.mxu0 %v12981_v0 }
 0xc9d   : > { %9234 = vmatmul.mubr.msk.bf16.vlgmr.msra.gmra.mxu1 %vm3817_vm3, %v11432_v54 }
 0xc9e   : > { %9245 = vmatprep.mubr.msk.bf16.mxu1 %vm10223_vm0, %v12981_v0 }
 0xc9f   : > { %9228 = vmatmul.mubr.msk.bf16.vlgmr.msra.gmra.mxu0 %vm3817_vm3, %v11434_v63 }
 0xca0   : > { %9239 = vmatprep.mubr.msk.bf16.mxu0 %vm10223_vm0, %v12981_v0 }
 0xca7   : > { %v3917_v19 = vpop.permute.xlu1 %3916 }
 0xca8   : > { %v3922_v49 = vsel %vm3817_vm3, %v3917_v19, 0 }
 0xca9   : > { %9238 = vmatpush3.bf16.xpose.msra.mxu0 %v3922_v49 }
 0xcaa   : > { %9249 = vmatprep.subr.bf16.mxu0 %v12981_v0 }
 0xcab   : > { %v3967_v15 = vpop.permute.xlu1 %3966 }
 0xcac   : > { %v3972_v26 = vsel %vm3817_vm3, %v3967_v15, 0 }
 0xcad   : > { %9244 = vmatpush3.bf16.xpose.msra.mxu1 %v3972_v26 }
 0xcae   : > { %9255 = vmatprep.subr.bf16.mxu1 %v12981_v0 }
 0xcaf   : > { %v4017_v28 = vpop.permute.xlu0 %4016  ;;  %v4067_v35 = vpop.permute.xlu1 %4066 }
 0xcb0   : > { %v4022_v58 = vsel %vm3817_vm3, %v4017_v28, 0  ;;  %9240 = vmatmul.mubr.msk.bf16.vlgmr.msra.gmra.mxu0 %vm3817_vm3, %v11440_v61  ;;  %v4072_v60 = vsel %vm3817_vm3, %v4067_v35, 0 }
 0xcb1   : > { %9250 = vmatpush3.bf16.xpose.msra.mxu0 %v4022_v58  ;;  %9251 = vmatprep.mubr.msk.bf16.mxu0 %vm10223_vm0, %v12981_v0 }
 0xcb2   : > { %9261 = vmatprep.subr.bf16.mxu0 %v12981_v0 }
 0xcb4   : > { %9246 = vmatmul.mubr.msk.bf16.vlgmr.msra.gmra.mxu1 %vm3817_vm3, %v11444_v11 }
 0xcb5   : > { %9256 = vmatpush3.bf16.xpose.msra.mxu1 %v4072_v60  ;;  %9257 = vmatprep.mubr.msk.bf16.mxu1 %vm10223_vm0, %v12981_v0  ;;  %v4167_v24 = vpop.permute.xlu1 %4166 }
 0xcb6   : > { %9267 = vmatprep.subr.bf16.mxu1 %v12981_v0  ;;  %v4172_v33 = vsel %vm3817_vm3, %v4167_v24, 0 }
 0xcb7   : > { %v4117_v2 = vpop.permute.xlu0 %4116 }
 0xcb8   : > { %v4122_v46 = vsel %vm3817_vm3, %v4117_v2, 0  ;;  %9252 = vmatmul.mubr.msk.bf16.vlgmr.msra.gmra.mxu0 %vm3817_vm3, %v11450_v25 }
 0xcb9   : > { %9262 = vmatpush3.bf16.xpose.msra.mxu0 %v4122_v46  ;;  %9263 = vmatprep.mubr.msk.bf16.mxu0 %vm10223_vm0, %v12981_v0 }
 0xcba   : > { %9273 = vmatprep.subr.bf16.mxu0 %v12981_v0 }
 0xcbc   : > { %9258 = vmatmul.mubr.msk.bf16.vlgmr.msra.gmra.mxu1 %vm3817_vm3, %v11448_v5 }
 0xcbd   : > { %9268 = vmatpush3.bf16.xpose.msra.mxu1 %v4172_v33  ;;  %9269 = vmatprep.mubr.msk.bf16.mxu1 %vm10223_vm0, %v12981_v0 }
 0xcbe   : > { %9279 = vmatprep.subr.bf16.mxu1 %v12981_v0 }
 0xcc0   : > { %9264 = vmatmul.mubr.msk.bf16.vlgmr.msra.gmra.mxu0 %vm3817_vm3, %v11458_v13 }
 0xcc1   : > { %9275 = vmatprep.mubr.msk.bf16.mxu0 %vm10223_vm0, %v12981_v0 }
 0xcc4   : > { %9270 = vmatmul.mubr.msk.bf16.vlgmr.msra.gmra.mxu1 %vm3817_vm3, %v11456_v34 }
 0xcc5   : > { %9281 = vmatprep.mubr.msk.bf16.mxu1 %vm10223_vm0, %v12981_v0 }
 0xd5d   : > { %v11512_v37 = vpop.f32.mrf.mxu1 }
 0xd5e   : > { %v4221_v39 = vsel %vm612_vm1, %v11512_v37, -inf }
 0xd5f   : > { %v11516_v3 = vpop.f32.mrf.mxu0  ;;  %4222 = vmax.xlane.f32.xlu0 %v4221_v39  ;;  %v9235_v41 = vpop.f32.mrf.mxu1 }
 0xd60   : > { %v4215_v7 = vsel %vm612_vm1, %v11516_v3, -inf }
 0xd61   : > { %v9229_v6 = vpop.f32.mrf.mxu0  ;;  %v11518_v27 = vpop.f32.mrf.mxu1 }
 0xd62   : > { %v4224_v32 = vsel %vm612_vm1, %v11518_v27, -inf }
 0xd63   : > { %v11522_v48 = vpop.f32.mrf.mxu0  ;;  %4216 = vmax.xlane.f32.xlu0 %v4215_v7  ;;  %v9236_v31 = vpop.f32.mrf.mxu1 }
 0xd64   : > { %v4218_v4 = vsel %vm612_vm1, %v11522_v48, -inf }
 0xd65   : > { %v9230_v50 = vpop.f32.mrf.mxu0  ;;  %4219 = vmax.xlane.f32.xlu1 %v4218_v4 }
 0xd67   : > { %4225 = vmax.xlane.f32.xlu0 %v4224_v32 }
 0xd70   : > { %v11528_v23 = vpop.f32.mrf.mxu0 }
 0xd71   : > { %v4227_v38 = vsel %vm612_vm1, %v11528_v23, -inf }
 0xd72   : > { %v9241_v56 = vpop.f32.mrf.mxu0 }
 0xd74   : > { %v11530_v53 = vpop.f32.mrf.mxu0  ;;  %v11532_v29 = vpop.f32.mrf.mxu1 }
 0xd75   : > { %v4233_v10 = vsel %vm612_vm1, %v11532_v29, -inf  ;;  %v4230_v22 = vsel %vm612_vm1, %v11530_v53, -inf }
 0xd76   : > { %v9242_v43 = vpop.f32.mrf.mxu0  ;;  %4234 = vmax.xlane.f32.xlu0 %v4233_v10  ;;  %v9247_v45 = vpop.f32.mrf.mxu1 }
 0xd78   : > { %v11536_v57 = vpop.f32.mrf.mxu1  ;;  %v11538_v40 = vpop.f32.mrf.mxu0 }
 0xd79   : > { %v4236_v47 = vsel %vm612_vm1, %v11536_v57, -inf  ;;  %v4239_v1 = vsel %vm612_vm1, %v11538_v40, -inf }
 0xd7a   : > { %v9253_v16 = vpop.f32.mrf.mxu0  ;;  %4228 = vmax.xlane.f32.xlu0 %v4227_v38  ;;  %4237 = vmax.xlane.f32.xlu1 %v4236_v47  ;;  %v9248_v12 = vpop.f32.mrf.mxu1 }
 0xd7c   : > { %v11544_v36 = vpop.f32.mrf.mxu0  ;;  %v11546_v59 = vpop.f32.mrf.mxu1 }
 0xd7d   : > { %v4245_v8 = vsel %vm612_vm1, %v11546_v59, -inf  ;;  %v4242_v14 = vsel %vm612_vm1, %v11544_v36, -inf }
 0xd7e   : > { %v9254_v52 = vpop.f32.mrf.mxu0  ;;  %4231 = vmax.xlane.f32.xlu1 %v4230_v22  ;;  %4246 = vmax.xlane.f32.xlu0 %v4245_v8  ;;  %v9259_v17 = vpop.f32.mrf.mxu1 }
 0xd80   : > { %v11552_v30 = vpop.f32.mrf.mxu1  ;;  %v11554_v55 = vpop.f32.mrf.mxu0 }
 0xd81   : > { %v4248_v21 = vsel %vm612_vm1, %v11552_v30, -inf  ;;  %v4251_v49 = vsel %vm612_vm1, %v11554_v55, -inf }
 0xd82   : > { %v9265_v51 = vpop.f32.mrf.mxu0  ;;  %4240 = vmax.xlane.f32.xlu0 %v4239_v1  ;;  %4249 = vmax.xlane.f32.xlu1 %v4248_v21  ;;  %v9260_v62 = vpop.f32.mrf.mxu1 }
 0xd84   : > { %v11560_v20 = vpop.f32.mrf.mxu0  ;;  %v11562_v44 = vpop.f32.mrf.mxu1 }
 0xd85   : > { %v4257_v18 = vsel %vm612_vm1, %v11562_v44, -inf  ;;  %v4254_v28 = vsel %vm612_vm1, %v11560_v20, -inf }
 0xd86   : > { %v9266_v42 = vpop.f32.mrf.mxu0  ;;  %4243 = vmax.xlane.f32.xlu1 %v4242_v14  ;;  %4258 = vmax.xlane.f32.xlu0 %v4257_v18  ;;  %v9271_v9 = vpop.f32.mrf.mxu1 }
 0xd88   : > { %v11568_v19 = vpop.f32.mrf.mxu1 }
 0xd89   : > { %v4260_v26 = vsel %vm612_vm1, %v11568_v19, -inf }
 0xd8a   : > { %4252 = vmax.xlane.f32.xlu0 %v4251_v49  ;;  %v9272_v15 = vpop.f32.mrf.mxu1 }
 0xd97   : > { %4446 = vrot.lane.b32.xlu1 %v11432_v54, %s10225_s17 }
 0xd9b   : > { %4493 = vrot.lane.b32.xlu1 %v11440_v61, %s10225_s17 }
 0xd9f   : > { %4540 = vrot.lane.b32.xlu1 %v11444_v11, %s10225_s17 }
 0xda0   : > { %4399 = vrot.lane.b32.xlu0 %v11434_v63, %s10225_s17 }
 0xda3   : > { %4634 = vrot.lane.b32.xlu1 %v11448_v5, %s10225_s17 }
 0xda4   : > { %4587 = vrot.lane.b32.xlu0 %v11450_v25, %s10225_s17 }
 0xda8   : > { %4681 = vrot.lane.b32.xlu0 %v11458_v13, %s10225_s17 }
 0xdc7   : > { %4261 = vmax.xlane.f32.xlu1 %v4260_v26 }
 0xdcb   : > { %4255 = vmax.xlane.f32.xlu1 %v4254_v28 }
 0xddc   : > { %4728 = vrot.lane.b32.xlu1 %v11456_v34, %s10225_s17 }
 0xde8   : > { %v4223_v58 = vpop.xlane.xlu0 %4222 }
 0xde9   : > { %v4265_v35 = vsub.f32 %v11512_v37, %v4223_v58 }
 0xdeb   : > { %v4283_v60 = vmul.f32 1.442695, %v4265_v35 }
 0xdec   : > { %v4217_v2 = vpop.xlane.xlu0 %4216 }
 0xded   : > { %9950 = vpow2.f32 %v4283_v60  ;;  %v4263_v46 = vsub.f32 %v11516_v3, %v4217_v2 }
 0xdee   : > { %v4220_v24 = vpop.xlane.xlu1 %4219 }
 0xdef   : > { %v4279_v33 = vmul.f32 1.442695, %v4263_v46  ;;  %v4264_v39 = vsub.f32 %v11522_v48, %v4220_v24 }
 0xdf0   : > { %v4226_v41 = vpop.xlane.xlu0 %4225 }
 0xdf1   : > { %9952 = vpow2.f32 %v4279_v33  ;;  %v4266_v6 = vsub.f32 %v11518_v27, %v4226_v41  ;;  %v4281_v7 = vmul.f32 1.442695, %v4264_v39 }
 0xdf3   : > { %v4285_v31 = vmul.f32 1.442695, %v4266_v6 }
 0xdf5   : > { %9954 = vpow2.f32 %v4285_v31 }
 0xdf6   : > { %9956 = vpow2.f32 %v4281_v7 }
 0xdfa   : > { %v11588_v4 = vpop.eup %9950 }
 0xdfb   : > { %v4317_v37 = vsel %vm612_vm1, %v11588_v4, 0.0 }
 0xdfc   : > { %4318 = vadd.xlane.f32.xlu0 %v4317_v37 }
 0xdfe   : > { %v11592_v50 = vpop.eup %9952 }
 0xdff   : > { %v4235_v3 = vpop.xlane.xlu0 %4234  ;;  %v4311_v48 = vsel %vm612_vm1, %v11592_v50, 0.0 }
 0xe00   : > { %v4269_v32 = vsub.f32 %v11532_v29, %v4235_v3  ;;  %4312 = vadd.xlane.f32.xlu0 %v4311_v48 }
 0xe02   : > { %v11597_v27 = vpop.eup %9954  ;;  %v4291_v56 = vmul.f32 1.442695, %v4269_v32 }
 0xe03   : > { %v4229_v10 = vpop.xlane.xlu0 %4228  ;;  %v4238_v43 = vpop.xlane.xlu1 %4237  ;;  %v4320_v45 = vsel %vm612_vm1, %v11597_v27, 0.0 }
 0xe04   : > { %v11601_v38 = vpop.eup %9956  ;;  %9958 = vpow2.f32 %v4291_v56  ;;  %v4267_v47 = vsub.f32 %v11528_v23, %v4229_v10  ;;  %v4270_v16 = vsub.f32 %v11536_v57, %v4238_v43  ;;  %4321 = vadd.xlane.f32.xlu1 %v4320_v45 }
 0xe05   : > { %v4314_v52 = vsel %vm612_vm1, %v11601_v38, 0.0 }
 0xe06   : > { %v4287_v12 = vmul.f32 1.442695, %v4267_v47  ;;  %v4293_v22 = vmul.f32 1.442695, %v4270_v16 }
 0xe07   : > { %v4247_v29 = vpop.xlane.xlu0 %4246  ;;  %v4232_v8 = vpop.xlane.xlu1 %4231 }
 0xe08   : > { %9960 = vpow2.f32 %v4287_v12  ;;  %v4273_v17 = vsub.f32 %v11546_v59, %v4247_v29  ;;  %v4268_v1 = vsub.f32 %v11530_v53, %v4232_v8  ;;  %4315 = vadd.xlane.f32.xlu1 %v4314_v52 }
 0xe09   : > { %9962 = vpow2.f32 %v4293_v22 }
 0xe0a   : > { %v4299_v21 = vmul.f32 1.442695, %v4273_v17  ;;  %v4289_v51 = vmul.f32 1.442695, %v4268_v1 }
 0xe0b   : > { %v4241_v23 = vpop.xlane.xlu0 %4240  ;;  %v4250_v62 = vpop.xlane.xlu1 %4249 }
 0xe0c   : > { %9964 = vpow2.f32 %v4299_v21  ;;  %v4271_v57 = vsub.f32 %v11538_v40, %v4241_v23  ;;  %v4274_v14 = vsub.f32 %v11552_v30, %v4250_v62 }
 0xe0d   : > { %9966 = vpow2.f32 %v4289_v51 }
 0xe0e   : > { %v4295_v18 = vmul.f32 1.442695, %v4271_v57  ;;  %v4301_v42 = vmul.f32 1.442695, %v4274_v14 }
 0xe0f   : > { %v4259_v9 = vpop.xlane.xlu0 %4258  ;;  %v4244_v49 = vpop.xlane.xlu1 %4243 }
 0xe10   : > { %9968 = vpow2.f32 %v4295_v18  ;;  %v4277_v59 = vsub.f32 %v11562_v44, %v4259_v9  ;;  %v4272_v53 = vsub.f32 %v11544_v36, %v4244_v49 }
 0xe11   : > { %v11613_v15 = vpop.eup %9958  ;;  %9970 = vpow2.f32 %v4301_v42 }
 0xe12   : > { %v4307_v26 = vmul.f32 1.442695, %v4277_v59  ;;  %v4297_v28 = vmul.f32 1.442695, %v4272_v53  ;;  %v4329_v40 = vsel %vm612_vm1, %v11613_v15, 0.0 }
 0xe13   : > { %4330 = vadd.xlane.f32.xlu0 %v4329_v40  ;;  %v4253_v30 = vpop.xlane.xlu0 %4252  ;;  %v4447_v58 = vpop.permute.xlu1 %4446 }
 0xe14   : > { %9972 = vpow2.f32 %v4307_v26  ;;  %v4275_v35 = vsub.f32 %v11554_v55, %v4253_v30  ;;  %9280 = vmatpush3.bf16.msra.mxu1 %v4447_v58 }
 0xe15   : > { %v11618_v60 = vpop.eup %9960  ;;  %9974 = vpow2.f32 %v4297_v28  ;;  %9291 = vmatprep.subr.bf16.mxu1 %v12981_v0 }
 0xe16   : > { %v11621_v36 = vpop.eup %9962  ;;  %v4303_v44 = vmul.f32 1.442695, %v4275_v35  ;;  %v4323_v2 = vsel %vm612_vm1, %v11618_v60, 0.0 }
 0xe17   : > { %4324 = vadd.xlane.f32.xlu0 %v4323_v2  ;;  %v4400_v46 = vpop.permute.xlu0 %4399  ;;  %v4332_v24 = vsel %vm612_vm1, %v11621_v36, 0.0  ;;  %v11660_v45 = vpop.permute.xlu1 %4493 }
 0xe18   : > { %9976 = vpow2.f32 %v4303_v44  ;;  %4333 = vadd.xlane.f32.xlu1 %v4332_v24  ;;  %9274 = vmatpush3.bf16.msra.mxu0 %v4400_v46 }
 0xe19   : > { %v11627_v55 = vpop.eup %9964  ;;  %9285 = vmatprep.subr.bf16.mxu0 %v12981_v0 }
 0xe1a   : > { %v11630_v33 = vpop.eup %9966  ;;  %v4341_v39 = vsel %vm612_vm1, %v11627_v55, 0.0 }
 0xe1b   : > { %4342 = vadd.xlane.f32.xlu0 %v4341_v39  ;;  %v4326_v41 = vsel %vm612_vm1, %v11630_v33, 0.0  ;;  %v4541_v47 = vpop.permute.xlu1 %4540 }
 0xe1c   : > { %4327 = vadd.xlane.f32.xlu1 %v4326_v41 }
 0xe1d   : > { %v11636_v6 = vpop.eup %9968 }
 0xe1e   : > { %v11638_v7 = vpop.eup %9970  ;;  %v4335_v31 = vsel %vm612_vm1, %v11636_v6, 0.0 }
 0xe1f   : > { %4336 = vadd.xlane.f32.xlu0 %v4335_v31  ;;  %v4344_v37 = vsel %vm612_vm1, %v11638_v7, 0.0  ;;  %v11668_v16 = vpop.permute.xlu1 %4634 }
 0xe20   : > { %4345 = vadd.xlane.f32.xlu1 %v4344_v37 }
 0xe21   : > { %v11644_v3 = vpop.eup %9972 }
 0xe22   : > { %v11646_v48 = vpop.eup %9974  ;;  %v4353_v32 = vsel %vm612_vm1, %v11644_v3, 0.0 }
 0xe23   : > { %4354 = vadd.xlane.f32.xlu0 %v4353_v32  ;;  %v4338_v56 = vsel %vm612_vm1, %v11646_v48, 0.0 }
 0xe24   : > { %4339 = vadd.xlane.f32.xlu1 %v4338_v56 }
 0xe25   : > { %v11652_v10 = vpop.eup %9976 }
 0xe26   : > { %v4347_v43 = vsel %vm612_vm1, %v11652_v10, 0.0 }
 0xe27   : > { %4348 = vadd.xlane.f32.xlu0 %v4347_v43 }
 0xe35   : > { %4828 = vrot.lane.b32.xlu1 %v11432_v54, %s10226_s18 }
 0xe3d   : > { %4777 = vrot.lane.b32.xlu0 %v11434_v63, %s10226_s18 }
 0xe41   : > { %4775 = vrot.lane.b32.xlu0 %v11434_v63, %s10227_s19 }
 0xe45   : > { %4826 = vrot.lane.b32.xlu0 %v11432_v54, %s10227_s19 }
 0xe49   : > { %4877 = vrot.lane.b32.xlu0 %v11440_v61, %s10227_s19 }
 0xe4d   : > { %4928 = vrot.lane.b32.xlu0 %v11444_v11, %s10227_s19 }
 0xe50   : > { %v4262_v12 = vpop.xlane.xlu1 %4261 }
 0xe51   : > { %v4278_v22 = vsub.f32 %v11568_v19, %v4262_v12  ;;  %4979 = vrot.lane.b32.xlu0 %v11450_v25, %s10227_s19 }
 0xe53   : > { %v4309_v29 = vmul.f32 1.442695, %v4278_v22 }
 0xe54   : > { %v4256_v8 = vpop.xlane.xlu1 %4255 }
 0xe55   : > { %9978 = vpow2.f32 %v4309_v29  ;;  %v4276_v52 = vsub.f32 %v11560_v20, %v4256_v8  ;;  %5030 = vrot.lane.b32.xlu0 %v11448_v5, %s10227_s19  ;;  %v11690_v20 = vpop.permute.xlu0 %4587 }
 0xe57   : > { %v4305_v17 = vmul.f32 1.442695, %v4276_v52 }
 0xe58   : > { %v11700_v57 = vpop.permute.xlu1 %4728 }
 0xe59   : > { %9980 = vpow2.f32 %v4305_v17  ;;  %5081 = vrot.lane.b32.xlu0 %v11458_v13, %s10227_s19  ;;  %v11696_v23 = vpop.permute.xlu0 %4681 }
 0xe62   : > { %v11680_v1 = vpop.eup %9978 }
 0xe63   : > { %v4356_v19 = vsel %vm612_vm1, %v11680_v1, 0.0 }
 0xe64   : > { %4357 = vadd.xlane.f32.xlu1 %v4356_v19 }
 0xe66   : > { %v11684_v21 = vpop.eup %9980 }
 0xe67   : > { %v4350_v51 = vsel %vm612_vm1, %v11684_v21, 0.0 }
 0xe68   : > { %4351 = vadd.xlane.f32.xlu1 %v4350_v51 }
 0xe79   : > { %4879 = vrot.lane.b32.xlu1 %v11440_v61, %s10226_s18 }
 0xe7d   : > { %4930 = vrot.lane.b32.xlu1 %v11444_v11, %s10226_s18 }
 0xe81   : > { %4981 = vrot.lane.b32.xlu1 %v11450_v25, %s10226_s18 }
 0xe85   : > { %5032 = vrot.lane.b32.xlu1 %v11448_v5, %s10226_s18  ;;  %v4319_v62 = vpop.xlane.xlu0 %4318 }
 0xe86   : > { %9982 = vrcp.f32 %v4319_v62 }
 0xe89   : > { %5083 = vrot.lane.b32.xlu1 %v11458_v13, %s10226_s18  ;;  %v4313_v14 = vpop.xlane.xlu0 %4312 }
 0xe8d   : > { %5134 = vrot.lane.b32.xlu1 %v11456_v34, %s10226_s18  ;;  %v4322_v18 = vpop.xlane.xlu1 %4321 }
 0xe8e   : > { %9984 = vrcp.f32 %v4322_v18 }
 0xe8f   : > { %9986 = vrcp.f32 %v4313_v14 }
 0xe91   : > { %5132 = vrot.lane.b32.xlu1 %v11456_v34, %s10227_s19  ;;  %v4316_v42 = vpop.xlane.xlu1 %4315 }
 0xe92   : > { %9988 = vrcp.f32 %v4316_v42 }
 0xe93   : > { %v9983_v9 = vpop.eup %9982 }
 0xe94   : > { %v4377_v59 = vmul.f32 %v9983_v9, %v11588_v4 }
 0xe9b   : > { %v9985_v49 = vpop.eup %9984 }
 0xe9c   : > { %v4378_v53 = vmul.f32 %v9985_v49, %v11597_v27  ;;  %v4331_v26 = vpop.xlane.xlu0 %4330  ;;  %v9987_v28 = vpop.eup %9986 }
 0xe9d   : > { %v4375_v58 = vmul.f32 %v9987_v28, %v11592_v50  ;;  %9990 = vrcp.f32 %v4331_v26 }
 0xe9e   : > { %v4392_v40 = vpack.c.bf16 %v4378_v53, %v4377_v59 }
 0xe9f   : > { %v9989_v30 = vpop.eup %9988 }
 0xea0   : > { %v4376_v35 = vmul.f32 %v9989_v30, %v11601_v38  ;;  %v4325_v44 = vpop.xlane.xlu0 %4324  ;;  %9282 = vmatmul.mubr.msk.bf16.vlgmr.msra.gmra.mxu1 %vm612_vm1, %v4392_v40 }
 0xea1   : > { %v4334_v2 = vpop.xlane.xlu1 %4333  ;;  %9292 = vmatpush3.bf16.msra.mxu1 %v4541_v47  ;;  %9293 = vmatprep.mubr.msk.bf16.mxu1 %vm10223_vm0, %v12981_v0 }
 0xea2   : > { %9992 = vrcp.f32 %v4334_v2  ;;  %v4391_v4 = vpack.c.bf16 %v4376_v35, %v4375_v58  ;;  %9303 = vmatprep.subr.bf16.mxu1 %v12981_v0 }
 0xea3   : > { %9994 = vrcp.f32 %v4325_v44 }
 0xea4   : > { %v4343_v27 = vpop.xlane.xlu0 %4342  ;;  %9276 = vmatmul.mubr.msk.bf16.vlgmr.msra.gmra.mxu0 %vm612_vm1, %v4391_v4 }
 0xea5   : > { %v4328_v50 = vpop.xlane.xlu1 %4327  ;;  %9286 = vmatpush3.bf16.msra.mxu0 %v11660_v45  ;;  %9287 = vmatprep.mubr.msk.bf16.mxu0 %vm10223_vm0, %v12981_v0 }
 0xea6   : > { %9996 = vrcp.f32 %v4328_v50  ;;  %9297 = vmatprep.subr.bf16.mxu0 %v12981_v0 }
 0xea7   : > { %9998 = vrcp.f32 %v4343_v27 }
 0xea8   : > { %v4337_v38 = vpop.xlane.xlu0 %4336 }
 0xea9   : > { %v4346_v46 = vpop.xlane.xlu1 %4345 }
 0xeaa   : > { %10000 = vrcp.f32 %v4346_v46  ;;  %v9991_v24 = vpop.eup %9990 }
 0xeab   : > { %10002 = vrcp.f32 %v4337_v38  ;;  %v4381_v31 = vmul.f32 %v9991_v24, %v11613_v15 }
 0xead   : > { %v4340_v39 = vpop.xlane.xlu1 %4339 }
 0xeae   : > { %10004 = vrcp.f32 %v4340_v39 }
 0xeaf   : > { %v9993_v41 = vpop.eup %9992 }
 0xeb0   : > { %v4382_v37 = vmul.f32 %v9993_v41, %v11621_v36  ;;  %v9995_v32 = vpop.eup %9994 }
 0xeb1   : > { %v4379_v45 = vmul.f32 %v9995_v32, %v11618_v60 }
 0xeb2   : > { %v4394_v56 = vpack.c.bf16 %v4382_v37, %v4381_v31 }
 0xeb3   : > { %v9997_v43 = vpop.eup %9996 }
 0xeb4   : > { %v4380_v47 = vmul.f32 %v9997_v43, %v11630_v33  ;;  %9294 = vmatmul.mubr.msk.bf16.vlgmr.msra.gmra.mxu1 %vm612_vm1, %v4394_v56  ;;  %v9999_v12 = vpop.eup %9998 }
 0xeb5   : > { %9304 = vmatpush3.bf16.msra.mxu1 %v11668_v16  ;;  %9305 = vmatprep.mubr.msk.bf16.mxu1 %vm10223_vm0, %v12981_v0  ;;  %v4385_v36 = vmul.f32 %v9999_v12, %v11627_v55 }
 0xeb6   : > { %v4393_v22 = vpack.c.bf16 %v4380_v47, %v4379_v45  ;;  %9315 = vmatprep.subr.bf16.mxu1 %v12981_v0 }
 0xeb7   : > { %v10001_v15 = vpop.eup %10000 }
 0xeb8   : > { %v4386_v29 = vmul.f32 %v10001_v15, %v11638_v7  ;;  %9288 = vmatmul.mubr.msk.bf16.vlgmr.msra.gmra.mxu0 %vm612_vm1, %v4393_v22  ;;  %v10003_v60 = vpop.eup %10002  ;;  %v4829_v7 = vpop.permute.xlu1 %4828 }
 0xeb9   : > { %9298 = vmatpush3.bf16.msra.mxu0 %v11690_v20  ;;  %9299 = vmatprep.mubr.msk.bf16.mxu0 %vm10223_vm0, %v12981_v0  ;;  %v4383_v8 = vmul.f32 %v10003_v60, %v11636_v6  ;;  %v4355_v6 = vpop.xlane.xlu0 %4354  ;;  %v4834_v28 = vsel %vm3817_vm3, %v4829_v7, 0 }
 0xeba   : > { %v4396_v33 = vpack.c.bf16 %v4386_v29, %v4385_v36  ;;  %9309 = vmatprep.subr.bf16.mxu0 %v12981_v0  ;;  %10006 = vrcp.f32 %v4355_v6 }
 0xebb   : > { %v10005_v16 = vpop.eup %10004 }
 0xebc   : > { %v4384_v52 = vmul.f32 %v10005_v16, %v11646_v48  ;;  %9306 = vmatmul.mubr.msk.bf16.vlgmr.msra.gmra.mxu1 %vm612_vm1, %v4396_v33 }
 0xebd   : > { %9316 = vmatpush3.bf16.msra.mxu1 %v11700_v57  ;;  %9317 = vmatprep.mubr.msk.bf16.mxu1 %vm10223_vm0, %v12981_v0  ;;  %v4349_v48 = vpop.xlane.xlu0 %4348 }
 0xebe   : > { %v4395_v55 = vpack.c.bf16 %v4384_v52, %v4383_v8  ;;  %9327 = vmatprep.subr.bf16.mxu1 %v12981_v0 }
 0xec0   : > { %9300 = vmatmul.mubr.msk.bf16.vlgmr.msra.gmra.mxu0 %vm612_vm1, %v4395_v55 }
 0xec1   : > { %9310 = vmatpush3.bf16.msra.mxu0 %v11696_v23  ;;  %9311 = vmatprep.mubr.msk.bf16.mxu0 %vm10223_vm0, %v12981_v0  ;;  %v4778_v51 = vpop.permute.xlu0 %4777 }
 0xec2   : > { %9321 = vmatprep.subr.bf16.mxu0 %v12981_v0  ;;  %v4783_v30 = vsel %vm3817_vm3, %v4778_v51, 0 }
 0xec5   : > { %v4776_v57 = vpop.permute.xlu0 %4775 }
 0xec7   : > { %v10007_v62 = vpop.eup %10006 }
 0xec8   : > { %v4389_v23 = vmul.f32 %v10007_v62, %v11644_v3 }
 0xec9   : > { %v4827_v53 = vpop.permute.xlu0 %4826 }
 0xecd   : > { %v4878_v58 = vpop.permute.xlu0 %4877 }
 0xed1   : > { %v4929_v35 = vpop.permute.xlu0 %4928 }
 0xed5   : > { %v4980_v27 = vpop.permute.xlu0 %4979 }
 0xed9   : > { %v5031_v46 = vpop.permute.xlu0 %5030 }
 0xedd   : > { %v5082_v31 = vpop.permute.xlu0 %5081 }
 0xeed   : > { %v4358_v17 = vpop.xlane.xlu1 %4357 }
 0xeee   : > { %10008 = vrcp.f32 %v4358_v17 }
 0xeef   : > { %10010 = vrcp.f32 %v4349_v48 }
 0xef1   : > { %v4352_v19 = vpop.xlane.xlu1 %4351 }
 0xef2   : > { %10012 = vrcp.f32 %v4352_v19 }
 0xef5   : > { %v4880_v20 = vpop.permute.xlu1 %4879 }
 0xef6   : > { %v4885_v44 = vsel %vm3817_vm3, %v4880_v20, 0 }
 0xef9   : > { %v4931_v9 = vpop.permute.xlu1 %4930 }
 0xefb   : > { %v10009_v14 = vpop.eup %10008 }
 0xefc   : > { %v4390_v18 = vmul.f32 %v10009_v14, %v11680_v1  ;;  %v10011_v42 = vpop.eup %10010 }
 0xefd   : > { %v4387_v26 = vmul.f32 %v10011_v42, %v11652_v10  ;;  %v4982_v1 = vpop.permute.xlu1 %4981  ;;  %v4936_v10 = vsel %vm3817_vm3, %v4931_v9, 0 }
 0xefe   : > { %v4398_v49 = vpack.c.bf16 %v4390_v18, %v4389_v23  ;;  %v4987_v50 = vsel %vm3817_vm3, %v4982_v1, 0 }
 0xeff   : > { %v10013_v59 = vpop.eup %10012 }
 0xf00   : > { %v4388_v40 = vmul.f32 %v10013_v59, %v11684_v21  ;;  %9318 = vmatmul.mubr.msk.bf16.vlgmr.msra.gmra.mxu1 %vm612_vm1, %v4398_v49 }
 0xf01   : > { %9328 = vmatpush3.bf16.xpose.msra.mxu1 %v4834_v28  ;;  %9329 = vmatprep.mubr.msk.bf16.mxu1 %vm10223_vm0, %v12981_v0  ;;  %v5033_v21 = vpop.permute.xlu1 %5032 }
 0xf02   : > { %v4397_v3 = vpack.c.bf16 %v4388_v40, %v4387_v26  ;;  %9339 = vmatprep.subr.bf16.mxu1 %v12981_v0  ;;  %v5038_v4 = vsel %vm3817_vm3, %v5033_v21, 0 }
 0xf04   : > { %9312 = vmatmul.mubr.msk.bf16.vlgmr.msra.gmra.mxu0 %vm612_vm1, %v4397_v3 }
 0xf05   : > { %9322 = vmatpush3.bf16.xpose.msra.mxu0 %v4783_v30  ;;  %9323 = vmatprep.mubr.msk.bf16.mxu0 %vm10223_vm0, %v12981_v0  ;;  %v5084_v2 = vpop.permute.xlu1 %5083 }
 0xf06   : > { %9333 = vmatprep.subr.bf16.mxu0 %v12981_v0  ;;  %v5089_v39 = vsel %vm3817_vm3, %v5084_v2, 0 }
 0xf08   : > { %9330 = vmatmul.mubr.msk.bf16.vlgmr.msra.gmra.mxu1 %vm3817_vm3, %v4827_v53 }
 0xf09   : > { %9340 = vmatpush3.bf16.xpose.msra.mxu1 %v4936_v10  ;;  %9341 = vmatprep.mubr.msk.bf16.mxu1 %vm10223_vm0, %v12981_v0  ;;  %v5135_v38 = vpop.permute.xlu1 %5134 }
 0xf0a   : > { %9351 = vmatprep.subr.bf16.mxu1 %v12981_v0  ;;  %v5140_v24 = vsel %vm3817_vm3, %v5135_v38, 0 }
 0xf0c   : > { %9324 = vmatmul.mubr.msk.bf16.vlgmr.msra.gmra.mxu0 %vm3817_vm3, %v4776_v57 }
 0xf0d   : > { %9334 = vmatpush3.bf16.xpose.msra.mxu0 %v4885_v44  ;;  %9335 = vmatprep.mubr.msk.bf16.mxu0 %vm10223_vm0, %v12981_v0  ;;  %v5133_v41 = vpop.permute.xlu1 %5132 }
 0xf0e   : > { %9345 = vmatprep.subr.bf16.mxu0 %v12981_v0 }
 0xf10   : > { %9342 = vmatmul.mubr.msk.bf16.vlgmr.msra.gmra.mxu1 %vm3817_vm3, %v4929_v35 }
 0xf11   : > { %9352 = vmatpush3.bf16.xpose.msra.mxu1 %v5038_v4  ;;  %9353 = vmatprep.mubr.msk.bf16.mxu1 %vm10223_vm0, %v12981_v0 }
 0xf12   : > { %9363 = vmatprep.subr.bf16.mxu1 %v12981_v0 }
 0xf14   : > { %9336 = vmatmul.mubr.msk.bf16.vlgmr.msra.gmra.mxu0 %vm3817_vm3, %v4878_v58 }
 0xf15   : > { %9346 = vmatpush3.bf16.xpose.msra.mxu0 %v4987_v50  ;;  %9347 = vmatprep.mubr.msk.bf16.mxu0 %vm10223_vm0, %v12981_v0 }
 0xf16   : > { %9357 = vmatprep.subr.bf16.mxu0 %v12981_v0 }
 0xf18   : > { %9354 = vmatmul.mubr.msk.bf16.vlgmr.msra.gmra.mxu1 %vm3817_vm3, %v5031_v46 }
 0xf19   : > { %9364 = vmatpush3.bf16.xpose.msra.mxu1 %v5140_v24  ;;  %9365 = vmatprep.mubr.msk.bf16.mxu1 %vm10223_vm0, %v12981_v0 }
 0xf1a   : > { %9375 = vmatprep.subr.bf16.mxu1 %v12981_v0 }
 0xf1c   : > { %9348 = vmatmul.mubr.msk.bf16.vlgmr.msra.gmra.mxu0 %vm3817_vm3, %v4980_v27 }
 0xf1d   : > { %9358 = vmatpush3.bf16.xpose.msra.mxu0 %v5089_v39  ;;  %9359 = vmatprep.mubr.msk.bf16.mxu0 %vm10223_vm0, %v12981_v0 }
 0xf1e   : > { %9369 = vmatprep.subr.bf16.mxu0 %v12981_v0 }
 0xf20   : > { %9366 = vmatmul.mubr.msk.bf16.vlgmr.msra.gmra.mxu1 %vm3817_vm3, %v5133_v41 }
 0xf21   : > { %9377 = vmatprep.mubr.msk.bf16.mxu1 %vm10223_vm0, %v12981_v0 }
 0xf24   : > { %9360 = vmatmul.mubr.msk.bf16.vlgmr.msra.gmra.mxu0 %vm3817_vm3, %v5082_v31 }
 0xf25   : > { %9371 = vmatprep.mubr.msk.bf16.mxu0 %vm10223_vm0, %v12981_v0 }
 0xf60   : > { %v11799_v37 = vpop.f32.mrf.mxu1 }
 0xf61   : > { %12987 = vst [vmem:[#allocation2_spill] sm:$0xff] %v11799_v37 }
 0xf62   : > { %v9283_v32 = vpop.f32.mrf.mxu1 }
 0xf64   : > { %v11801_v56 = vpop.f32.mrf.mxu0  ;;  %v11803_v43 = vpop.f32.mrf.mxu1 }
 0xf65   : > { %12988 = vst [vmem:[#allocation3_spill] sm:$0xff] %v11801_v56  ;;  %12989 = vst [vmem:[#allocation4_spill] sm:$0xff] %v11803_v43 }
 0xf66   : > { %v9277_v45 = vpop.f32.mrf.mxu0  ;;  %v9284_v47 = vpop.f32.mrf.mxu1 }
 0xf68   : > { %v11805_v12 = vpop.f32.mrf.mxu0 }
 0xf69   : > { %12990 = vst [vmem:[#allocation5_spill] sm:$0xff] %v11805_v12 }
 0xf6a   : > { %v9278_v22 = vpop.f32.mrf.mxu0 }
 0xf74   : > { %v11807_v15 = vpop.f32.mrf.mxu1 }
 0xf75   : > { %12991 = vst [vmem:[#allocation6_spill] sm:$0xff] %v11807_v15 }
 0xf76   : > { %v9295_v36 = vpop.f32.mrf.mxu1 }
 0xf78   : > { %v11809_v29 = vpop.f32.mrf.mxu0  ;;  %v11811_v60 = vpop.f32.mrf.mxu1 }
 0xf79   : > { %12992 = vst [vmem:[#allocation7_spill] sm:$0xff] %v11809_v29  ;;  %12993 = vst [vmem:[#allocation8_spill] sm:$0xff] %v11811_v60 }
 0xf7a   : > { %v9289_v33 = vpop.f32.mrf.mxu0  ;;  %v9296_v16 = vpop.f32.mrf.mxu1 }
 0xf7c   : > { %v11813_v8 = vpop.f32.mrf.mxu0  ;;  %v11815_v52 = vpop.f32.mrf.mxu1 }
 0xf7d   : > { %12994 = vst [vmem:[#allocation9_spill] sm:$0xff] %v11813_v8  ;;  %12995 = vst [vmem:[#allocation10_spill] sm:$0xff] %v11815_v52 }
 0xf7e   : > { %v9290_v55 = vpop.f32.mrf.mxu0  ;;  %v9307_v6 = vpop.f32.mrf.mxu1 }
 0xf80   : > { %v11817_v7 = vpop.f32.mrf.mxu0  ;;  %v11819_v48 = vpop.f32.mrf.mxu1 }
 0xf81   : > { %12996 = vst [vmem:[#allocation11_spill] sm:$0xff] %v11817_v7  ;;  %12997 = vst [vmem:[#allocation12_spill] sm:$0xff] %v11819_v48 }
 0xf82   : > { %v9301_v17 = vpop.f32.mrf.mxu0  ;;  %v9308_v19 = vpop.f32.mrf.mxu1 }
 0xf84   : > { %v11821_v51 = vpop.f32.mrf.mxu0 }
 0xf85   : > { %12998 = vst [vmem:[#allocation13_spill] sm:$0xff] %v11821_v51 }
 0xf86   : > { %v9302_v20 = vpop.f32.mrf.mxu0 }
 0xfc0   : > { %v11823_v62 = vpop.f32.mrf.mxu1 }
 0xfc1   : > { %12999 = vst [vmem:[#allocation14_spill] sm:$0xff] %v11823_v62 }
 0xfc2   : > { %v9319_v57 = vpop.f32.mrf.mxu1 }
 0xfc4   : > { %v11825_v14 = vpop.f32.mrf.mxu0  ;;  %v11827_v23 = vpop.f32.mrf.mxu1 }
 0xfc5   : > { %13000 = vst [vmem:[#allocation15_spill] sm:$0xff] %v11825_v14  ;;  %13001 = vst [vmem:[#allocation16_spill] sm:$0xff] %v11827_v23 }
 0xfc6   : > { %v9313_v18 = vpop.f32.mrf.mxu0  ;;  %v9320_v42 = vpop.f32.mrf.mxu1 }
 0xfc8   : > { %v11829_v9 = vpop.f32.mrf.mxu0  ;;  %v11831_v49 = vpop.f32.mrf.mxu1 }
 0xfc9   : > { %13002 = vst [vmem:[#allocation17_spill] sm:$0xff] %v11829_v9  ;;  %v5189_v59 = vsel %vm612_vm1, %v11831_v49, -inf }
 0xfca   : > { %5190 = vmax.xlane.f32.xlu0 %v5189_v59  ;;  %v9314_v53 = vpop.f32.mrf.mxu0  ;;  %v9331_v26 = vpop.f32.mrf.mxu1 }
 0xfcc   : > { %v11835_v28 = vpop.f32.mrf.mxu0  ;;  %v11837_v40 = vpop.f32.mrf.mxu1 }
 0xfcd   : > { %v5183_v3 = vsel %vm612_vm1, %v11835_v28, -inf  ;;  %v5192_v21 = vsel %vm612_vm1, %v11837_v40, -inf }
 0xfce   : > { %v9332_v1 = vpop.f32.mrf.mxu1  ;;  %5184 = vmax.xlane.f32.xlu0 %v5183_v3  ;;  %v9325_v30 = vpop.f32.mrf.mxu0 }
 0xfd0   : > { %v11841_v58 = vpop.f32.mrf.mxu0  ;;  %v11843_v10 = vpop.f32.mrf.mxu1 }
 0xfd1   : > { %v5186_v35 = vsel %vm612_vm1, %v11841_v58, -inf  ;;  %v5201_v50 = vsel %vm612_vm1, %v11843_v10, -inf }
 0xfd2   : > { %5193 = vmax.xlane.f32.xlu0 %v5192_v21  ;;  %5187 = vmax.xlane.f32.xlu1 %v5186_v35  ;;  %v9326_v44 = vpop.f32.mrf.mxu0  ;;  %v9343_v2 = vpop.f32.mrf.mxu1 }
 0xfd4   : > { %v11849_v4 = vpop.f32.mrf.mxu0  ;;  %v11851_v27 = vpop.f32.mrf.mxu1 }
 0xfd5   : > { %v5204_v38 = vsel %vm612_vm1, %v11851_v27, -inf  ;;  %v5195_v31 = vsel %vm612_vm1, %v11849_v4, -inf }
 0xfd6   : > { %v9337_v46 = vpop.f32.mrf.mxu0  ;;  %5202 = vmax.xlane.f32.xlu0 %v5201_v50  ;;  %5205 = vmax.xlane.f32.xlu1 %v5204_v38  ;;  %v9344_v24 = vpop.f32.mrf.mxu1 }
 0xfd8   : > { %v11857_v39 = vpop.f32.mrf.mxu0  ;;  %v11859_v41 = vpop.f32.mrf.mxu1 }
 0xfd9   : > { %v5198_v32 = vsel %vm612_vm1, %v11857_v39, -inf  ;;  %v5213_v33 = vsel %vm612_vm1, %v11859_v41, -inf }
 0xfda   : > { %v9338_v45 = vpop.f32.mrf.mxu0  ;;  %5196 = vmax.xlane.f32.xlu0 %v5195_v31  ;;  %5199 = vmax.xlane.f32.xlu1 %v5198_v32  ;;  %v9355_v47 = vpop.f32.mrf.mxu1 }
 0xfdc   : > { %v11865_v22 = vpop.f32.mrf.mxu0  ;;  %v11867_v36 = vpop.f32.mrf.mxu1 }
 0xfdd   : > { %v5216_v16 = vsel %vm612_vm1, %v11867_v36, -inf  ;;  %v5207_v20 = vsel %vm612_vm1, %v11865_v22, -inf }
 0xfde   : > { %v9349_v55 = vpop.f32.mrf.mxu0  ;;  %5214 = vmax.xlane.f32.xlu0 %v5213_v33  ;;  %5217 = vmax.xlane.f32.xlu1 %v5216_v16  ;;  %v9356_v6 = vpop.f32.mrf.mxu1 }
 0xfe0   : > { %v11873_v17 = vpop.f32.mrf.mxu0  ;;  %v11875_v19 = vpop.f32.mrf.mxu1 }
 0xfe1   : > { %v5210_v57 = vsel %vm612_vm1, %v11873_v17, -inf  ;;  %v5225_v26 = vsel %vm612_vm1, %v11875_v19, -inf }
 0xfe2   : > { %v9350_v18 = vpop.f32.mrf.mxu0  ;;  %5208 = vmax.xlane.f32.xlu0 %v5207_v20  ;;  %5211 = vmax.xlane.f32.xlu1 %v5210_v57  ;;  %v9367_v42 = vpop.f32.mrf.mxu1 }
 0xfe4   : > { %v11881_v59 = vpop.f32.mrf.mxu0  ;;  %v11883_v53 = vpop.f32.mrf.mxu1 }
 0xfe5   : > { %v5219_v21 = vsel %vm612_vm1, %v11881_v59, -inf  ;;  %v5228_v44 = vsel %vm612_vm1, %v11883_v53, -inf }
 0xfe6   : > { %v9361_v3 = vpop.f32.mrf.mxu0  ;;  %5226 = vmax.xlane.f32.xlu0 %v5225_v26  ;;  %v9368_v1 = vpop.f32.mrf.mxu1 }
 0xfe8   : > { %v11887_v30 = vpop.f32.mrf.mxu0 }
 0xfe9   : > { %v5222_v2 = vsel %vm612_vm1, %v11887_v30, -inf }
 0xfea   : > { %v9362_v35 = vpop.f32.mrf.mxu0  ;;  %5220 = vmax.xlane.f32.xlu0 %v5219_v21 }
 0xff3   : > { %5414 = vrot.lane.b32.xlu1 %v11432_v54, %s10228_s20 }
 0xff7   : > { %5461 = vrot.lane.b32.xlu1 %v11440_v61, %s10228_s20 }
 0xffb   : > { %5508 = vrot.lane.b32.xlu1 %v11444_v11, %s10228_s20 }
 0xfff   : > { %5602 = vrot.lane.b32.xlu1 %v11448_v5, %s10228_s20 }
0x1000   : > { %5367 = vrot.lane.b32.xlu0 %v11434_v63, %s10228_s20 }
0x1004   : > { %5555 = vrot.lane.b32.xlu0 %v11450_v25, %s10228_s20 }
0x1008   : > { %5649 = vrot.lane.b32.xlu0 %v11458_v13, %s10228_s20 }
0x1023   : > { %5229 = vmax.xlane.f32.xlu1 %v5228_v44 }
0x1027   : > { %5223 = vmax.xlane.f32.xlu1 %v5222_v2 }
0x1038   : > { %5696 = vrot.lane.b32.xlu1 %v11456_v34, %s10228_s20  ;;  %s10237_s20 = smov 24  }
0x1053   : > { %v5191_v50 = vpop.xlane.xlu0 %5190 }
0x1054   : > { %v5233_v38 = vsub.f32 %v11831_v49, %v5191_v50 }
0x1056   : > { %v5251_v46 = vmul.f32 1.442695, %v5233_v38 }
0x1057   : > { %v5185_v24 = vpop.xlane.xlu0 %5184 }
0x1058   : > { %10014 = vpow2.f32 %v5251_v46  ;;  %v5231_v31 = vsub.f32 %v11835_v28, %v5185_v24 }
0x105a   : > { %v5247_v32 = vmul.f32 1.442695, %v5231_v31 }
0x105b   : > { %v5194_v45 = vpop.xlane.xlu0 %5193  ;;  %v5188_v47 = vpop.xlane.xlu1 %5187 }
0x105c   : > { %10016 = vpow2.f32 %v5247_v32  ;;  %v5234_v33 = vsub.f32 %v11837_v40, %v5194_v45  ;;  %v5232_v16 = vsub.f32 %v11841_v58, %v5188_v47 }
0x105e   : > { %v5253_v55 = vmul.f32 1.442695, %v5234_v33  ;;  %v5249_v6 = vmul.f32 1.442695, %v5232_v16 }
0x105f   : > { %v5203_v20 = vpop.xlane.xlu0 %5202  ;;  %v5206_v57 = vpop.xlane.xlu1 %5205 }
0x1060   : > { %10018 = vpow2.f32 %v5253_v55  ;;  %v5237_v49 = vsub.f32 %v11843_v10, %v5203_v20  ;;  %v5238_v18 = vsub.f32 %v11851_v27, %v5206_v57 }
0x1061   : > { %10020 = vpow2.f32 %v5249_v6 }
0x1062   : > { %v5259_v42 = vmul.f32 1.442695, %v5237_v49  ;;  %v5261_v28 = vmul.f32 1.442695, %v5238_v18 }
0x1063   : > { %v5197_v26 = vpop.xlane.xlu0 %5196  ;;  %v5200_v3 = vpop.xlane.xlu1 %5199 }
0x1064   : > { %10022 = vpow2.f32 %v5259_v42  ;;  %v5235_v1 = vsub.f32 %v11849_v4, %v5197_v26  ;;  %v5236_v40 = vsub.f32 %v11857_v39, %v5200_v3 }
0x1065   : > { %v11911_v58 = vpop.eup %10014  ;;  %10024 = vpow2.f32 %v5261_v28 }
0x1066   : > { %v5255_v21 = vmul.f32 1.442695, %v5235_v1  ;;  %v5257_v35 = vmul.f32 1.442695, %v5236_v40  ;;  %v5285_v10 = vsel %vm612_vm1, %v11911_v58, 0.0 }
0x1067   : > { %v5215_v44 = vpop.xlane.xlu0 %5214  ;;  %5286 = vadd.xlane.f32.xlu0 %v5285_v10  ;;  %v5218_v27 = vpop.xlane.xlu1 %5217 }
0x1068   : > { %10026 = vpow2.f32 %v5255_v21  ;;  %v5241_v2 = vsub.f32 %v11859_v41, %v5215_v44  ;;  %v5242_v50 = vsub.f32 %v11867_v36, %v5218_v27 }
0x1069   : > { %v11917_v38 = vpop.eup %10016  ;;  %10028 = vpow2.f32 %v5257_v35 }
0x106a   : > { %v5267_v4 = vmul.f32 1.442695, %v5241_v2  ;;  %v5269_v39 = vmul.f32 1.442695, %v5242_v50  ;;  %v5279_v46 = vsel %vm612_vm1, %v11917_v38, 0.0 }
0x106b   : > { %v5209_v24 = vpop.xlane.xlu0 %5208  ;;  %5280 = vadd.xlane.f32.xlu0 %v5279_v46  ;;  %v5212_v31 = vpop.xlane.xlu1 %5211 }
0x106c   : > { %10030 = vpow2.f32 %v5267_v4  ;;  %v5239_v32 = vsub.f32 %v11865_v22, %v5209_v24  ;;  %v5240_v45 = vsub.f32 %v11873_v17, %v5212_v31 }
0x106d   : > { %v11923_v47 = vpop.eup %10018  ;;  %10032 = vpow2.f32 %v5269_v39 }
0x106e   : > { %v5263_v41 = vmul.f32 1.442695, %v5239_v32  ;;  %v5265_v36 = vmul.f32 1.442695, %v5240_v45  ;;  %v5288_v33 = vsel %vm612_vm1, %v11923_v47, 0.0  ;;  %v11927_v16 = vpop.eup %10020 }
0x106f   : > { %v5227_v55 = vpop.xlane.xlu0 %5226  ;;  %5289 = vadd.xlane.f32.xlu1 %v5288_v33  ;;  %v5415_v6 = vpop.permute.xlu1 %5414  ;;  %v5282_v49 = vsel %vm612_vm1, %v11927_v16, 0.0 }
0x1070   : > { %10034 = vpow2.f32 %v5263_v41  ;;  %v5245_v20 = vsub.f32 %v11875_v19, %v5227_v55  ;;  %9376 = vmatpush3.bf16.msra.mxu1 %v5415_v6 }
0x1071   : > { %v11930_v22 = vpop.eup %10022  ;;  %9387 = vmatprep.subr.bf16.mxu1 %v12981_v0  ;;  %10036 = vpow2.f32 %v5265_v36 }
0x1072   : > { %v5275_v17 = vmul.f32 1.442695, %v5245_v20  ;;  %v5297_v57 = vsel %vm612_vm1, %v11930_v22, 0.0  ;;  %v11937_v18 = vpop.eup %10024 }
0x1073   : > { %5298 = vadd.xlane.f32.xlu0 %v5297_v57  ;;  %v5221_v42 = vpop.xlane.xlu0 %5220  ;;  %5283 = vadd.xlane.f32.xlu1 %v5282_v49  ;;  %v5300_v1 = vsel %vm612_vm1, %v11937_v18, 0.0  ;;  %v11977_v45 = vpop.permute.xlu1 %5461 }
0x1074   : > { %10038 = vpow2.f32 %v5275_v17  ;;  %v5243_v19 = vsub.f32 %v11881_v59, %v5221_v42 }
0x1075   : > { %v11940_v28 = vpop.eup %10026 }
0x1076   : > { %v5271_v26 = vmul.f32 1.442695, %v5243_v19  ;;  %v5291_v3 = vsel %vm612_vm1, %v11940_v28, 0.0  ;;  %v11946_v40 = vpop.eup %10028 }
0x1077   : > { %5292 = vadd.xlane.f32.xlu0 %v5291_v3  ;;  %v5368_v21 = vpop.permute.xlu0 %5367  ;;  %5301 = vadd.xlane.f32.xlu1 %v5300_v1  ;;  %v5294_v10 = vsel %vm612_vm1, %v11946_v40, 0.0  ;;  %v11983_v41 = vpop.permute.xlu1 %5508 }
0x1078   : > { %10040 = vpow2.f32 %v5271_v26  ;;  %9370 = vmatpush3.bf16.msra.mxu0 %v5368_v21 }
0x1079   : > { %v11948_v35 = vpop.eup %10030  ;;  %9381 = vmatprep.subr.bf16.mxu0 %v12981_v0 }
0x107a   : > { %v5309_v59 = vsel %vm612_vm1, %v11948_v35, 0.0  ;;  %v11955_v44 = vpop.eup %10032 }
0x107b   : > { %5310 = vadd.xlane.f32.xlu0 %v5309_v59  ;;  %5295 = vadd.xlane.f32.xlu1 %v5294_v10  ;;  %v5312_v50 = vsel %vm612_vm1, %v11955_v44, 0.0  ;;  %v11987_v36 = vpop.permute.xlu1 %5602  ;;  %v12019_v19 = vpop.permute.xlu0 %5555 }
0x107d   : > { %v11957_v27 = vpop.eup %10034 }
0x107e   : > { %v5303_v2 = vsel %vm612_vm1, %v11957_v27, 0.0  ;;  %v11963_v4 = vpop.eup %10036 }
0x107f   : > { %5304 = vadd.xlane.f32.xlu0 %v5303_v2  ;;  %5313 = vadd.xlane.f32.xlu1 %v5312_v50  ;;  %v5306_v24 = vsel %vm612_vm1, %v11963_v4, 0.0  ;;  %v12025_v26 = vpop.permute.xlu0 %5649 }
0x1081   : > { %v11965_v39 = vpop.eup %10038 }
0x1082   : > { %v5321_v46 = vsel %vm612_vm1, %v11965_v39, 0.0 }
0x1083   : > { %5322 = vadd.xlane.f32.xlu0 %v5321_v46  ;;  %5307 = vadd.xlane.f32.xlu1 %v5306_v24 }
0x1085   : > { %v11971_v31 = vpop.eup %10040 }
0x1086   : > { %v5315_v32 = vsel %vm612_vm1, %v11971_v31, 0.0 }
0x1087   : > { %5316 = vadd.xlane.f32.xlu0 %v5315_v32 }
0x1094   : > { %5796 = vrot.lane.b32.xlu1 %v11432_v54, %s10229_s23 }
0x109d   : > { %5745 = vrot.lane.b32.xlu0 %v11434_v63, %s10229_s23 }
0x10a1   : > { %5743 = vrot.lane.b32.xlu0 %v11434_v63, %s10230_s24 }
0x10a5   : > { %5794 = vrot.lane.b32.xlu0 %v11432_v54, %s10230_s24 }
0x10a9   : > { %5845 = vrot.lane.b32.xlu0 %v11440_v61, %s10230_s24 }
0x10ac   : > { %v5230_v33 = vpop.xlane.xlu1 %5229 }
0x10ad   : > { %v5246_v55 = vsub.f32 %v11883_v53, %v5230_v33  ;;  %5896 = vrot.lane.b32.xlu0 %v11444_v11, %s10230_s24 }
0x10af   : > { %v5277_v6 = vmul.f32 1.442695, %v5246_v55 }
0x10b0   : > { %v5224_v20 = vpop.xlane.xlu1 %5223 }
0x10b1   : > { %10042 = vpow2.f32 %v5277_v6  ;;  %v5244_v17 = vsub.f32 %v11887_v30, %v5224_v20  ;;  %5947 = vrot.lane.b32.xlu0 %v11450_v25, %s10230_s24 }
0x10b3   : > { %v5273_v57 = vmul.f32 1.442695, %v5244_v17 }
0x10b4   : > { %v12027_v1 = vpop.permute.xlu1 %5696 }
0x10b5   : > { %10044 = vpow2.f32 %v5273_v57  ;;  %5998 = vrot.lane.b32.xlu0 %v11448_v5, %s10230_s24 }
0x10b9   : > { %6049 = vrot.lane.b32.xlu0 %v11458_v13, %s10230_s24 }
0x10be   : > { %v12001_v53 = vpop.eup %10042 }
0x10bf   : > { %v5324_v49 = vsel %vm612_vm1, %v12001_v53, 0.0 }
0x10c0   : > { %5325 = vadd.xlane.f32.xlu1 %v5324_v49 }
0x10c2   : > { %v12005_v42 = vpop.eup %10044 }
0x10c3   : > { %v5318_v30 = vsel %vm612_vm1, %v12005_v42, 0.0 }
0x10c4   : > { %5319 = vadd.xlane.f32.xlu1 %v5318_v30 }
0x10d5   : > { %5847 = vrot.lane.b32.xlu1 %v11440_v61, %s10229_s23 }
0x10d9   : > { %5898 = vrot.lane.b32.xlu1 %v11444_v11, %s10229_s23 }
0x10dd   : > { %5949 = vrot.lane.b32.xlu1 %v11450_v25, %s10229_s23 }
0x10e1   : > { %6000 = vrot.lane.b32.xlu1 %v11448_v5, %s10229_s23 }
0x10e5   : > { %6051 = vrot.lane.b32.xlu1 %v11458_v13, %s10229_s23 }
0x10e9   : > { %6102 = vrot.lane.b32.xlu1 %v11456_v34, %s10229_s23 }
0x10ed   : > { %6100 = vrot.lane.b32.xlu1 %v11456_v34, %s10230_s24 }
0x10f0   : > { %v5287_v3 = vpop.xlane.xlu0 %5286 }
0x10f1   : > { %10046 = vrcp.f32 %v5287_v3 }
0x10f4   : > { %v5281_v21 = vpop.xlane.xlu0 %5280 }
0x10f8   : > { %v5290_v59 = vpop.xlane.xlu1 %5289 }
0x10f9   : > { %10048 = vrcp.f32 %v5290_v59 }
0x10fa   : > { %10050 = vrcp.f32 %v5281_v21 }
0x10fc   : > { %v5299_v10 = vpop.xlane.xlu0 %5298  ;;  %v5284_v2 = vpop.xlane.xlu1 %5283 }
0x10fd   : > { %10052 = vrcp.f32 %v5284_v2 }
0x10fe   : > { %10054 = vrcp.f32 %v5299_v10  ;;  %v10047_v24 = vpop.eup %10046 }
0x10ff   : > { %v5345_v6 = vmul.f32 %v10047_v24, %v11911_v58 }
0x1100   : > { %v5293_v50 = vpop.xlane.xlu0 %5292  ;;  %v5302_v46 = vpop.xlane.xlu1 %5301 }
0x1101   : > { %10056 = vrcp.f32 %v5302_v46 }
0x1102   : > { %10058 = vrcp.f32 %v5293_v50 }
0x1104   : > { %v5311_v32 = vpop.xlane.xlu0 %5310  ;;  %v5296_v33 = vpop.xlane.xlu1 %5295 }
0x1105   : > { %10060 = vrcp.f32 %v5296_v33 }
0x1106   : > { %v10049_v55 = vpop.eup %10048  ;;  %10062 = vrcp.f32 %v5311_v32 }
0x1107   : > { %v5346_v20 = vmul.f32 %v10049_v55, %v11923_v47  ;;  %v10051_v57 = vpop.eup %10050 }
0x1108   : > { %v5314_v17 = vpop.xlane.xlu1 %5313  ;;  %v5305_v49 = vpop.xlane.xlu0 %5304  ;;  %v5343_v21 = vmul.f32 %v10051_v57, %v11917_v38 }
0x1109   : > { %v5360_v30 = vpack.c.bf16 %v5346_v20, %v5345_v6  ;;  %10064 = vrcp.f32 %v5314_v17 }
0x110a   : > { %v10053_v3 = vpop.eup %10052  ;;  %10066 = vrcp.f32 %v5305_v49 }
0x110b   : > { %9378 = vmatmul.mubr.msk.bf16.vlgmr.msra.gmra.mxu1 %vm612_vm1, %v5360_v30  ;;  %v5344_v59 = vmul.f32 %v10053_v3, %v11927_v16  ;;  %v10055_v58 = vpop.eup %10054 }
0x110c   : > { %9388 = vmatpush3.bf16.msra.mxu1 %v11983_v41  ;;  %v5308_v10 = vpop.xlane.xlu1 %5307  ;;  %9389 = vmatprep.mubr.msk.bf16.mxu1 %vm10223_vm0, %v12981_v0  ;;  %v5349_v50 = vmul.f32 %v10055_v58, %v11930_v22 }
0x110d   : > { %9399 = vmatprep.subr.bf16.mxu1 %v12981_v0  ;;  %10068 = vrcp.f32 %v5308_v10  ;;  %v5359_v47 = vpack.c.bf16 %v5344_v59, %v5343_v21 }
0x110e   : > { %v10057_v2 = vpop.eup %10056 }
0x110f   : > { %v5350_v46 = vmul.f32 %v10057_v2, %v11937_v18  ;;  %9372 = vmatmul.mubr.msk.bf16.vlgmr.msra.gmra.mxu0 %vm612_vm1, %v5359_v47  ;;  %v10059_v38 = vpop.eup %10058 }
0x1110   : > { %9382 = vmatpush3.bf16.msra.mxu0 %v11977_v45  ;;  %9383 = vmatprep.mubr.msk.bf16.mxu0 %vm10223_vm0, %v12981_v0  ;;  %v5347_v24 = vmul.f32 %v10059_v38, %v11940_v28 }
0x1111   : > { %v5362_v16 = vpack.c.bf16 %v5350_v46, %v5349_v50  ;;  %9393 = vmatprep.subr.bf16.mxu0 %v12981_v0 }
0x1112   : > { %v10061_v41 = vpop.eup %10060 }
0x1113   : > { %v5348_v32 = vmul.f32 %v10061_v41, %v11946_v40  ;;  %9390 = vmatmul.mubr.msk.bf16.vlgmr.msra.gmra.mxu1 %vm612_vm1, %v5362_v16  ;;  %v10063_v22 = vpop.eup %10062 }
0x1114   : > { %9400 = vmatpush3.bf16.msra.mxu1 %v11987_v36  ;;  %9401 = vmatprep.mubr.msk.bf16.mxu1 %vm10223_vm0, %v12981_v0  ;;  %v5353_v33 = vmul.f32 %v10063_v22, %v11948_v35 }
0x1115   : > { %v5361_v18 = vpack.c.bf16 %v5348_v32, %v5347_v24  ;;  %9411 = vmatprep.subr.bf16.mxu1 %v12981_v0 }
0x1116   : > { %v10065_v45 = vpop.eup %10064 }
0x1117   : > { %v5354_v55 = vmul.f32 %v10065_v45, %v11955_v44  ;;  %9384 = vmatmul.mubr.msk.bf16.vlgmr.msra.gmra.mxu0 %vm612_vm1, %v5361_v18  ;;  %v10067_v28 = vpop.eup %10066  ;;  %v5323_v44 = vpop.xlane.xlu0 %5322 }
0x1118   : > { %9394 = vmatpush3.bf16.msra.mxu0 %v12019_v19  ;;  %9395 = vmatprep.mubr.msk.bf16.mxu0 %vm10223_vm0, %v12981_v0  ;;  %v5351_v6 = vmul.f32 %v10067_v28, %v11957_v27  ;;  %v5797_v27 = vpop.permute.xlu1 %5796  ;;  %10070 = vrcp.f32 %v5323_v44 }
0x1119   : > { %v5364_v40 = vpack.c.bf16 %v5354_v55, %v5353_v33  ;;  %9405 = vmatprep.subr.bf16.mxu0 %v12981_v0  ;;  %v5802_v46 = vsel %vm3817_vm3, %v5797_v27, 0 }
0x111a   : > { %v10069_v36 = vpop.eup %10068 }
0x111b   : > { %v5352_v20 = vmul.f32 %v10069_v36, %v11963_v4  ;;  %9402 = vmatmul.mubr.msk.bf16.vlgmr.msra.gmra.mxu1 %vm612_vm1, %v5364_v40  ;;  %v5317_v4 = vpop.xlane.xlu0 %5316 }
0x111c   : > { %9412 = vmatpush3.bf16.msra.mxu1 %v12027_v1  ;;  %9413 = vmatprep.mubr.msk.bf16.mxu1 %vm10223_vm0, %v12981_v0 }
0x111d   : > { %v5363_v35 = vpack.c.bf16 %v5352_v20, %v5351_v6  ;;  %9423 = vmatprep.subr.bf16.mxu1 %v12981_v0 }
0x111f   : > { %9396 = vmatmul.mubr.msk.bf16.vlgmr.msra.gmra.mxu0 %vm612_vm1, %v5363_v35  ;;  %v5746_v17 = vpop.permute.xlu0 %5745 }
0x1120   : > { %9406 = vmatpush3.bf16.msra.mxu0 %v12025_v26  ;;  %9407 = vmatprep.mubr.msk.bf16.mxu0 %vm10223_vm0, %v12981_v0  ;;  %v5751_v16 = vsel %vm3817_vm3, %v5746_v17, 0 }
0x1121   : > { %9417 = vmatprep.subr.bf16.mxu0 %v12981_v0 }
0x1123   : > { %v5744_v30 = vpop.permute.xlu0 %5743 }
0x1125   : > { %v10071_v49 = vpop.eup %10070 }
0x1126   : > { %v5357_v26 = vmul.f32 %v10071_v49, %v11965_v39 }
0x1127   : > { %v5795_v2 = vpop.permute.xlu0 %5794 }
0x112b   : > { %v5846_v41 = vpop.permute.xlu0 %5845 }
0x112f   : > { %v5897_v24 = vpop.permute.xlu0 %5896 }
0x1133   : > { %v5948_v45 = vpop.permute.xlu0 %5947 }
0x1137   : > { %v5999_v28 = vpop.permute.xlu0 %5998 }
0x113b   : > { %v6050_v20 = vpop.permute.xlu0 %6049 }
0x1149   : > { %v5326_v19 = vpop.xlane.xlu1 %5325 }
0x114a   : > { %10072 = vrcp.f32 %v5326_v19 }
0x114b   : > { %10074 = vrcp.f32 %v5317_v4 }
0x114d   : > { %v5320_v1 = vpop.xlane.xlu1 %5319 }
0x114e   : > { %10076 = vrcp.f32 %v5320_v1 }
0x1151   : > { %v5848_v57 = vpop.permute.xlu1 %5847 }
0x1152   : > { %v5853_v32 = vsel %vm3817_vm3, %v5848_v57, 0 }
0x1155   : > { %v5899_v10 = vpop.permute.xlu1 %5898 }
0x1157   : > { %v10073_v3 = vpop.eup %10072 }
0x1158   : > { %v5358_v21 = vmul.f32 %v10073_v3, %v12001_v53  ;;  %v10075_v59 = vpop.eup %10074 }
0x1159   : > { %v5355_v50 = vmul.f32 %v10075_v59, %v11971_v31  ;;  %v5950_v53 = vpop.permute.xlu1 %5949  ;;  %v5904_v31 = vsel %vm3817_vm3, %v5899_v10, 0 }
0x115a   : > { %v5366_v58 = vpack.c.bf16 %v5358_v21, %v5357_v26  ;;  %v5955_v33 = vsel %vm3817_vm3, %v5950_v53, 0 }
0x115b   : > { %v10077_v47 = vpop.eup %10076 }
0x115c   : > { %v5356_v38 = vmul.f32 %v10077_v47, %v12005_v42  ;;  %9414 = vmatmul.mubr.msk.bf16.vlgmr.msra.gmra.mxu1 %vm612_vm1, %v5366_v58 }
0x115d   : > { %9424 = vmatpush3.bf16.xpose.msra.mxu1 %v5802_v46  ;;  %9425 = vmatprep.mubr.msk.bf16.mxu1 %vm10223_vm0, %v12981_v0  ;;  %v6001_v42 = vpop.permute.xlu1 %6000 }
0x115e   : > { %v5365_v39 = vpack.c.bf16 %v5356_v38, %v5355_v50  ;;  %9435 = vmatprep.subr.bf16.mxu1 %v12981_v0  ;;  %v6006_v18 = vsel %vm3817_vm3, %v6001_v42, 0 }
0x1160   : > { %9408 = vmatmul.mubr.msk.bf16.vlgmr.msra.gmra.mxu0 %vm612_vm1, %v5365_v39 }
0x1161   : > { %9418 = vmatpush3.bf16.xpose.msra.mxu0 %v5751_v16  ;;  %9419 = vmatprep.mubr.msk.bf16.mxu0 %vm10223_vm0, %v12981_v0  ;;  %v6052_v22 = vpop.permute.xlu1 %6051 }
0x1162   : > { %9429 = vmatprep.subr.bf16.mxu0 %v12981_v0  ;;  %v6057_v36 = vsel %vm3817_vm3, %v6052_v22, 0 }
0x1164   : > { %9426 = vmatmul.mubr.msk.bf16.vlgmr.msra.gmra.mxu1 %vm3817_vm3, %v5795_v2 }
0x1165   : > { %9436 = vmatpush3.bf16.xpose.msra.mxu1 %v5904_v31  ;;  %9437 = vmatprep.mubr.msk.bf16.mxu1 %vm10223_vm0, %v12981_v0  ;;  %v6103_v55 = vpop.permute.xlu1 %6102 }
0x1166   : > { %9447 = vmatprep.subr.bf16.mxu1 %v12981_v0  ;;  %v6108_v40 = vsel %vm3817_vm3, %v6103_v55, 0 }
0x1168   : > { %9420 = vmatmul.mubr.msk.bf16.vlgmr.msra.gmra.mxu0 %vm3817_vm3, %v5744_v30 }
0x1169   : > { %9430 = vmatpush3.bf16.xpose.msra.mxu0 %v5853_v32  ;;  %9431 = vmatprep.mubr.msk.bf16.mxu0 %vm10223_vm0, %v12981_v0  ;;  %v6101_v6 = vpop.permute.xlu1 %6100 }
0x116a   : > { %9441 = vmatprep.subr.bf16.mxu0 %v12981_v0 }
0x116c   : > { %9438 = vmatmul.mubr.msk.bf16.vlgmr.msra.gmra.mxu1 %vm3817_vm3, %v5897_v24 }
0x116d   : > { %9448 = vmatpush3.bf16.xpose.msra.mxu1 %v6006_v18  ;;  %9449 = vmatprep.mubr.msk.bf16.mxu1 %vm10223_vm0, %v12981_v0 }
0x116e   : > { %9459 = vmatprep.subr.bf16.mxu1 %v12981_v0 }
0x1170   : > { %9432 = vmatmul.mubr.msk.bf16.vlgmr.msra.gmra.mxu0 %vm3817_vm3, %v5846_v41 }
0x1171   : > { %9442 = vmatpush3.bf16.xpose.msra.mxu0 %v5955_v33  ;;  %9443 = vmatprep.mubr.msk.bf16.mxu0 %vm10223_vm0, %v12981_v0 }
0x1172   : > { %9453 = vmatprep.subr.bf16.mxu0 %v12981_v0 }
0x1174   : > { %9450 = vmatmul.mubr.msk.bf16.vlgmr.msra.gmra.mxu1 %vm3817_vm3, %v5999_v28 }
0x1175   : > { %9460 = vmatpush3.bf16.xpose.msra.mxu1 %v6108_v40  ;;  %9461 = vmatprep.mubr.msk.bf16.mxu1 %vm10223_vm0, %v12981_v0 }
0x1176   : > { %9471 = vmatprep.subr.bf16.mxu1 %v12981_v0 }
0x1178   : > { %9444 = vmatmul.mubr.msk.bf16.vlgmr.msra.gmra.mxu0 %vm3817_vm3, %v5948_v45 }
0x1179   : > { %9454 = vmatpush3.bf16.xpose.msra.mxu0 %v6057_v36  ;;  %9455 = vmatprep.mubr.msk.bf16.mxu0 %vm10223_vm0, %v12981_v0 }
0x117a   : > { %9465 = vmatprep.subr.bf16.mxu0 %v12981_v0 }
0x117c   : > { %9462 = vmatmul.mubr.msk.bf16.vlgmr.msra.gmra.mxu1 %vm3817_vm3, %v6101_v6 }
0x117d   : > { %9473 = vmatprep.mubr.msk.bf16.mxu1 %vm10223_vm0, %v12981_v0 }
0x1180   : > { %9456 = vmatmul.mubr.msk.bf16.vlgmr.msra.gmra.mxu0 %vm3817_vm3, %v6050_v20 }
0x1181   : > { %9467 = vmatprep.mubr.msk.bf16.mxu0 %vm10223_vm0, %v12981_v0 }
0x11cb   : > { %v12121_v35 = vpop.f32.mrf.mxu1 }
0x11cd   : > { %v9379_v44 = vpop.f32.mrf.mxu1 }
0x11cf   : > { %v12123_v27 = vpop.f32.mrf.mxu1  ;;  %v12125_v4 = vpop.f32.mrf.mxu0 }
0x11d1   : > { %v9380_v1 = vpop.f32.mrf.mxu1  ;;  %v9373_v17 = vpop.f32.mrf.mxu0 }
0x11d3   : > { %v12129_v57 = vpop.f32.mrf.mxu0  ;;  %v12131_v49 = vpop.f32.mrf.mxu1 }
0x11d5   : > { %v9374_v3 = vpop.f32.mrf.mxu0  ;;  %v9391_v26 = vpop.f32.mrf.mxu1 }
0x11d7   : > { %v12135_v21 = vpop.f32.mrf.mxu0  ;;  %v12137_v59 = vpop.f32.mrf.mxu1 }
0x11d9   : > { %v9385_v58 = vpop.f32.mrf.mxu0  ;;  %v9392_v47 = vpop.f32.mrf.mxu1 }
0x11db   : > { %v12141_v2 = vpop.f32.mrf.mxu0  ;;  %v12143_v50 = vpop.f32.mrf.mxu1 }
0x11dd   : > { %v9386_v38 = vpop.f32.mrf.mxu0  ;;  %v9403_v39 = vpop.f32.mrf.mxu1 }
0x11df   : > { %v12147_v53 = vpop.f32.mrf.mxu0  ;;  %v12149_v16 = vpop.f32.mrf.mxu1 }
0x11e1   : > { %v9397_v31 = vpop.f32.mrf.mxu0  ;;  %v9404_v42 = vpop.f32.mrf.mxu1 }
0x11e3   : > { %v12153_v24 = vpop.f32.mrf.mxu0 }
0x11e5   : > { %v9398_v22 = vpop.f32.mrf.mxu0 }
0x121c   : > { %v12157_v18 = vpop.f32.mrf.mxu1 }
0x121e   : > { %v9415_v45 = vpop.f32.mrf.mxu1 }
0x1220   : > { %v12159_v33 = vpop.f32.mrf.mxu0  ;;  %v12161_v55 = vpop.f32.mrf.mxu1 }
0x1222   : > { %v9409_v40 = vpop.f32.mrf.mxu0  ;;  %v9416_v36 = vpop.f32.mrf.mxu1 }
0x1224   : > { %v12165_v6 = vpop.f32.mrf.mxu0  ;;  %v12167_v20 = vpop.f32.mrf.mxu1 }
0x1225   : > { %v6157_v1 = vsel %vm612_vm1, %v12167_v20, -inf }
0x1226   : > { %6158 = vmax.xlane.f32.xlu0 %v6157_v1  ;;  %v9410_v17 = vpop.f32.mrf.mxu0  ;;  %v9427_v3 = vpop.f32.mrf.mxu1 }
0x1228   : > { %v12173_v26 = vpop.f32.mrf.mxu0  ;;  %v12175_v58 = vpop.f32.mrf.mxu1 }
0x1229   : > { %v6151_v47 = vsel %vm612_vm1, %v12173_v26, -inf  ;;  %v6160_v22 = vsel %vm612_vm1, %v12175_v58, -inf }
0x122a   : > { %v9428_v38 = vpop.f32.mrf.mxu1  ;;  %6152 = vmax.xlane.f32.xlu0 %v6151_v47  ;;  %v9421_v39 = vpop.f32.mrf.mxu0 }
0x122c   : > { %v12179_v31 = vpop.f32.mrf.mxu0  ;;  %v12181_v42 = vpop.f32.mrf.mxu1 }
0x122d   : > { %v6154_v45 = vsel %vm612_vm1, %v12179_v31, -inf  ;;  %v6169_v3 = vsel %vm612_vm1, %v12181_v42, -inf }
0x122e   : > { %6161 = vmax.xlane.f32.xlu0 %v6160_v22  ;;  %6155 = vmax.xlane.f32.xlu1 %v6154_v45  ;;  %v9422_v40 = vpop.f32.mrf.mxu0  ;;  %v9439_v36 = vpop.f32.mrf.mxu1 }
0x1230   : > { %v12187_v1 = vpop.f32.mrf.mxu0  ;;  %v12189_v17 = vpop.f32.mrf.mxu1 }
0x1231   : > { %v6172_v47 = vsel %vm612_vm1, %v12189_v17, -inf  ;;  %v6163_v45 = vsel %vm612_vm1, %v12187_v1, -inf }
0x1232   : > { %v9433_v38 = vpop.f32.mrf.mxu0  ;;  %6170 = vmax.xlane.f32.xlu0 %v6169_v3  ;;  %6173 = vmax.xlane.f32.xlu1 %v6172_v47  ;;  %v9440_v39 = vpop.f32.mrf.mxu1 }
0x1234   : > { %v12195_v44 = vpop.f32.mrf.mxu0  ;;  %v12197_v22 = vpop.f32.mrf.mxu1 }
0x1235   : > { %v6166_v40 = vsel %vm612_vm1, %v12195_v44, -inf  ;;  %v6181_v3 = vsel %vm612_vm1, %v12197_v22, -inf }
0x1236   : > { %v9434_v36 = vpop.f32.mrf.mxu0  ;;  %6164 = vmax.xlane.f32.xlu0 %v6163_v45  ;;  %6167 = vmax.xlane.f32.xlu1 %v6166_v40  ;;  %v9451_v28 = vpop.f32.mrf.mxu1 }
0x1238   : > { %v12203_v41 = vpop.f32.mrf.mxu0  ;;  %v12205_v38 = vpop.f32.mrf.mxu1 }
0x1239   : > { %v6184_v47 = vsel %vm612_vm1, %v12205_v38, -inf  ;;  %v6175_v28 = vsel %vm612_vm1, %v12203_v41, -inf }
0x123a   : > { %v9445_v39 = vpop.f32.mrf.mxu0  ;;  %6182 = vmax.xlane.f32.xlu0 %v6181_v3  ;;  %6185 = vmax.xlane.f32.xlu1 %v6184_v47  ;;  %v9452_v10 = vpop.f32.mrf.mxu1 }
0x123c   : > { %v12211_v19 = vpop.f32.mrf.mxu0  ;;  %v12213_v36 = vpop.f32.mrf.mxu1 }
0x123d   : > { %v6178_v45 = vsel %vm612_vm1, %v12211_v19, -inf  ;;  %v6193_v10 = vsel %vm612_vm1, %v12213_v36, -inf }
0x123e   : > { %v9446_v40 = vpop.f32.mrf.mxu0  ;;  %6176 = vmax.xlane.f32.xlu0 %v6175_v28  ;;  %6179 = vmax.xlane.f32.xlu1 %v6178_v45  ;;  %v9463_v32 = vpop.f32.mrf.mxu1 }
0x1240   : > { %v12219_v46 = vpop.f32.mrf.mxu0  ;;  %v12221_v39 = vpop.f32.mrf.mxu1 }
0x1241   : > { %v6187_v0 = vsel %vm612_vm1, %v12219_v46, -inf  ;;  %v6196_v32 = vsel %vm612_vm1, %v12221_v39, -inf }
0x1242   : > { %v9457_v3 = vpop.f32.mrf.mxu0  ;;  %6194 = vmax.xlane.f32.xlu0 %v6193_v10  ;;  %v9464_v47 = vpop.f32.mrf.mxu1 }
0x1244   : > { %v12225_v30 = vpop.f32.mrf.mxu0 }
0x1246   : > { %v9458_v14 = vpop.f32.mrf.mxu0  ;;  %6188 = vmax.xlane.f32.xlu0 %v6187_v0  ;;  %v6190_v0 = vsel %vm612_vm1, %v12225_v30, -inf }
0x124f   : > { %6382 = vrot.lane.b32.xlu1 %v11432_v54, %s10231_s25 }
0x1253   : > { %6429 = vrot.lane.b32.xlu1 %v11440_v61, %s10231_s25 }
0x1257   : > { %6476 = vrot.lane.b32.xlu1 %v11444_v11, %s10231_s25 }
0x125b   : > { %6570 = vrot.lane.b32.xlu1 %v11448_v5, %s10231_s25 }
0x125c   : > { %6335 = vrot.lane.b32.xlu0 %v11434_v63, %s10231_s25 }
0x1260   : > { %6523 = vrot.lane.b32.xlu0 %v11450_v25, %s10231_s25 }
0x1264   : > { %6617 = vrot.lane.b32.xlu0 %v11458_v13, %s10231_s25 }
0x127f   : > { %6197 = vmax.xlane.f32.xlu1 %v6196_v32 }
0x1283   : > { %6191 = vmax.xlane.f32.xlu1 %v6190_v0 }
0x1294   : > { %6664 = vrot.lane.b32.xlu1 %v11456_v34, %s10231_s25 }
0x12af   : > { %v6159_v14 = vpop.xlane.xlu0 %6158 }
0x12b0   : > { %v6201_v28 = vsub.f32 %v12167_v20, %v6159_v14 }
0x12b2   : > { %v6219_v45 = vmul.f32 1.442695, %v6201_v28 }
0x12b3   : > { %v6153_v40 = vpop.xlane.xlu0 %6152 }
0x12b4   : > { %10078 = vpow2.f32 %v6219_v45  ;;  %v6199_v10 = vsub.f32 %v12173_v26, %v6153_v40 }
0x12b6   : > { %v6215_v3 = vmul.f32 1.442695, %v6199_v10 }
0x12b7   : > { %v6162_v47 = vpop.xlane.xlu0 %6161  ;;  %v6156_v9 = vpop.xlane.xlu1 %6155 }
0x12b8   : > { %10080 = vpow2.f32 %v6215_v3  ;;  %v6202_v32 = vsub.f32 %v12175_v58, %v6162_v47  ;;  %v6200_v62 = vsub.f32 %v12179_v31, %v6156_v9 }
0x12ba   : > { %v6221_v23 = vmul.f32 1.442695, %v6202_v32  ;;  %v6217_v0 = vmul.f32 1.442695, %v6200_v62 }
0x12bb   : > { %v6171_v52 = vpop.xlane.xlu0 %6170  ;;  %v6174_v48 = vpop.xlane.xlu1 %6173 }
0x12bc   : > { %10082 = vpow2.f32 %v6221_v23  ;;  %v6205_v20 = vsub.f32 %v12181_v42, %v6171_v52  ;;  %v6206_v14 = vsub.f32 %v12189_v17, %v6174_v48 }
0x12bd   : > { %10084 = vpow2.f32 %v6217_v0 }
0x12be   : > { %v6227_v28 = vmul.f32 1.442695, %v6205_v20  ;;  %v6229_v26 = vmul.f32 1.442695, %v6206_v14 }
0x12bf   : > { %v6165_v45 = vpop.xlane.xlu0 %6164  ;;  %v6168_v40 = vpop.xlane.xlu1 %6167 }
0x12c0   : > { %10086 = vpow2.f32 %v6227_v28  ;;  %v6203_v10 = vsub.f32 %v12187_v1, %v6165_v45  ;;  %v6204_v58 = vsub.f32 %v12195_v44, %v6168_v40 }
0x12c1   : > { %v12249_v9 = vpop.eup %10078  ;;  %10088 = vpow2.f32 %v6229_v26 }
0x12c2   : > { %v6223_v62 = vmul.f32 1.442695, %v6203_v10  ;;  %v6225_v31 = vmul.f32 1.442695, %v6204_v58  ;;  %v6253_v52 = vsel %vm612_vm1, %v12249_v9, 0.0 }
0x12c3   : > { %v6183_v23 = vpop.xlane.xlu0 %6182  ;;  %6254 = vadd.xlane.f32.xlu0 %v6253_v52  ;;  %v6186_v48 = vpop.xlane.xlu1 %6185 }
0x12c4   : > { %10090 = vpow2.f32 %v6223_v62  ;;  %v6209_v42 = vsub.f32 %v12197_v22, %v6183_v23  ;;  %v6210_v17 = vsub.f32 %v12205_v38, %v6186_v48 }
0x12c5   : > { %v12255_v3 = vpop.eup %10080  ;;  %10092 = vpow2.f32 %v6225_v31 }
0x12c6   : > { %v6235_v44 = vmul.f32 1.442695, %v6209_v42  ;;  %v6237_v1 = vmul.f32 1.442695, %v6210_v17  ;;  %v6247_v47 = vsel %vm612_vm1, %v12255_v3, 0.0 }
0x12c7   : > { %v6177_v32 = vpop.xlane.xlu0 %6176  ;;  %6248 = vadd.xlane.f32.xlu0 %v6247_v47  ;;  %v6180_v0 = vpop.xlane.xlu1 %6179 }
0x12c8   : > { %10094 = vpow2.f32 %v6235_v44  ;;  %v6207_v20 = vsub.f32 %v12203_v41, %v6177_v32  ;;  %v6208_v14 = vsub.f32 %v12211_v19, %v6180_v0  ;;  %v13003_v19 = vmov 0.0  }
0x12c9   : > { %v12261_v28 = vpop.eup %10082  ;;  %10096 = vpow2.f32 %v6237_v1 }
0x12ca   : > { %v6231_v22 = vmul.f32 1.442695, %v6207_v20  ;;  %v6233_v38 = vmul.f32 1.442695, %v6208_v14  ;;  %v6256_v26 = vsel %vm612_vm1, %v12261_v28, 0.0  ;;  %v12265_v45 = vpop.eup %10084 }
0x12cb   : > { %v6195_v40 = vpop.xlane.xlu0 %6194  ;;  %6257 = vadd.xlane.f32.xlu1 %v6256_v26  ;;  %v6383_v10 = vpop.permute.xlu1 %6382  ;;  %v6250_v52 = vsel %vm612_vm1, %v12265_v45, 0.0 }
0x12cc   : > { %10098 = vpow2.f32 %v6231_v22  ;;  %v6213_v58 = vsub.f32 %v12213_v36, %v6195_v40  ;;  %9472 = vmatpush3.bf16.msra.mxu1 %v6383_v10 }
0x12cd   : > { %v12268_v41 = vpop.eup %10086  ;;  %9483 = vmatprep.subr.bf16.mxu1 %v13003_v19  ;;  %10100 = vpow2.f32 %v6233_v38 }
0x12ce   : > { %v6243_v62 = vmul.f32 1.442695, %v6213_v58  ;;  %v6265_v31 = vsel %vm612_vm1, %v12268_v41, 0.0  ;;  %v12275_v23 = vpop.eup %10088 }
0x12cf   : > { %6266 = vadd.xlane.f32.xlu0 %v6265_v31  ;;  %v6189_v48 = vpop.xlane.xlu0 %6188  ;;  %6251 = vadd.xlane.f32.xlu1 %v6250_v52  ;;  %v6268_v1 = vsel %vm612_vm1, %v12275_v23, 0.0 }
0x12d0   : > { %10102 = vpow2.f32 %v6243_v62  ;;  %v6211_v36 = vsub.f32 %v12219_v46, %v6189_v48  ;;  %v12315_v48 = vpop.permute.xlu1 %6429 }
0x12d1   : > { %v12278_v42 = vpop.eup %10090 }
0x12d2   : > { %v6239_v17 = vmul.f32 1.442695, %v6211_v36  ;;  %v6259_v44 = vsel %vm612_vm1, %v12278_v42, 0.0  ;;  %v12284_v47 = vpop.eup %10092 }
0x12d3   : > { %6260 = vadd.xlane.f32.xlu0 %v6259_v44  ;;  %v6336_v32 = vpop.permute.xlu0 %6335  ;;  %6269 = vadd.xlane.f32.xlu1 %v6268_v1  ;;  %v6262_v20 = vsel %vm612_vm1, %v12284_v47, 0.0 }
0x12d4   : > { %10104 = vpow2.f32 %v6239_v17  ;;  %9466 = vmatpush3.bf16.msra.mxu0 %v6336_v32  ;;  %v12321_v36 = vpop.permute.xlu1 %6476 }
0x12d5   : > { %v12286_v0 = vpop.eup %10094  ;;  %9477 = vmatprep.subr.bf16.mxu0 %v13003_v19 }
0x12d6   : > { %v6277_v46 = vsel %vm612_vm1, %v12286_v0, 0.0  ;;  %v12293_v14 = vpop.eup %10096 }
0x12d7   : > { %6278 = vadd.xlane.f32.xlu0 %v6277_v46  ;;  %6263 = vadd.xlane.f32.xlu1 %v6262_v20  ;;  %v6280_v26 = vsel %vm612_vm1, %v12293_v14, 0.0 }
0x12d8   : > { %v12325_v17 = vpop.permute.xlu1 %6570 }
0x12d9   : > { %v12295_v22 = vpop.eup %10098 }
0x12da   : > { %v6271_v38 = vsel %vm612_vm1, %v12295_v22, 0.0  ;;  %v12301_v40 = vpop.eup %10100 }
0x12db   : > { %6272 = vadd.xlane.f32.xlu0 %v6271_v38  ;;  %6281 = vadd.xlane.f32.xlu1 %v6280_v26  ;;  %v6274_v62 = vsel %vm612_vm1, %v12301_v40, 0.0 }
0x12dd   : > { %v12303_v10 = vpop.eup %10102 }
0x12de   : > { %v6289_v58 = vsel %vm612_vm1, %v12303_v10, 0.0 }
0x12df   : > { %6290 = vadd.xlane.f32.xlu0 %v6289_v58  ;;  %6275 = vadd.xlane.f32.xlu1 %v6274_v62  ;;  %v12357_v62 = vpop.permute.xlu0 %6523 }
0x12e1   : > { %v12309_v31 = vpop.eup %10104 }
0x12e2   : > { %v6283_v52 = vsel %vm612_vm1, %v12309_v31, 0.0 }
0x12e3   : > { %6284 = vadd.xlane.f32.xlu0 %v6283_v52  ;;  %v12363_v52 = vpop.permute.xlu0 %6617 }
0x12f0   : > { %6764 = vrot.lane.b32.xlu1 %v11432_v54, %s10232_s29 }
0x12f9   : > { %6713 = vrot.lane.b32.xlu0 %v11434_v63, %s10232_s29 }
0x12fd   : > { %6711 = vrot.lane.b32.xlu0 %v11434_v63, %s10233_s26 }
0x1301   : > { %6762 = vrot.lane.b32.xlu0 %v11432_v54, %s10233_s26 }
0x1305   : > { %6813 = vrot.lane.b32.xlu0 %v11440_v61, %s10233_s26 }
0x1308   : > { %v6198_v44 = vpop.xlane.xlu1 %6197 }
0x1309   : > { %v6214_v1 = vsub.f32 %v12221_v39, %v6198_v44  ;;  %6864 = vrot.lane.b32.xlu0 %v11444_v11, %s10233_s26 }
0x130b   : > { %v6245_v32 = vmul.f32 1.442695, %v6214_v1 }
0x130c   : > { %v6192_v46 = vpop.xlane.xlu1 %6191 }
0x130d   : > { %10106 = vpow2.f32 %v6245_v32  ;;  %v6212_v20 = vsub.f32 %v12225_v30, %v6192_v46  ;;  %6915 = vrot.lane.b32.xlu0 %v11450_v25, %s10233_s26 }
0x130f   : > { %v6241_v38 = vmul.f32 1.442695, %v6212_v20 }
0x1310   : > { %v12365_v1 = vpop.permute.xlu1 %6664 }
0x1311   : > { %10108 = vpow2.f32 %v6241_v38  ;;  %6966 = vrot.lane.b32.xlu0 %v11448_v5, %s10233_s26 }
0x1315   : > { %7017 = vrot.lane.b32.xlu0 %v11458_v13, %s10233_s26 }
0x131a   : > { %v12339_v39 = vpop.eup %10106 }
0x131b   : > { %v6292_v26 = vsel %vm612_vm1, %v12339_v39, 0.0 }
0x131c   : > { %6293 = vadd.xlane.f32.xlu1 %v6292_v26 }
0x131e   : > { %v12343_v58 = vpop.eup %10108 }
0x131f   : > { %v6286_v30 = vsel %vm612_vm1, %v12343_v58, 0.0 }
0x1320   : > { %6287 = vadd.xlane.f32.xlu1 %v6286_v30 }
0x1331   : > { %6815 = vrot.lane.b32.xlu1 %v11440_v61, %s10232_s29 }
0x1335   : > { %6866 = vrot.lane.b32.xlu1 %v11444_v11, %s10232_s29 }
0x1339   : > { %6917 = vrot.lane.b32.xlu1 %v11450_v25, %s10232_s29 }
0x133d   : > { %6968 = vrot.lane.b32.xlu1 %v11448_v5, %s10232_s29 }
0x1341   : > { %7019 = vrot.lane.b32.xlu1 %v11458_v13, %s10232_s29 }
0x1345   : > { %7070 = vrot.lane.b32.xlu1 %v11456_v34, %s10232_s29 }
0x1349   : > { %7068 = vrot.lane.b32.xlu1 %v11456_v34, %s10233_s26 }
0x134c   : > { %v6255_v44 = vpop.xlane.xlu0 %6254 }
0x134d   : > { %10110 = vrcp.f32 %v6255_v44 }
0x1350   : > { %v6249_v32 = vpop.xlane.xlu0 %6248 }
0x1354   : > { %v6258_v46 = vpop.xlane.xlu1 %6257 }
0x1355   : > { %10112 = vrcp.f32 %v6258_v46 }
0x1356   : > { %10114 = vrcp.f32 %v6249_v32 }
0x1358   : > { %v6267_v20 = vpop.xlane.xlu0 %6266  ;;  %v6252_v38 = vpop.xlane.xlu1 %6251 }
0x1359   : > { %10116 = vrcp.f32 %v6252_v38 }
0x135a   : > { %10118 = vrcp.f32 %v6267_v20  ;;  %v10111_v7 = vpop.eup %10110 }
0x135b   : > { %v6313_v29 = vmul.f32 %v10111_v7, %v12249_v9 }
0x135c   : > { %v6261_v26 = vpop.xlane.xlu0 %6260  ;;  %v6270_v30 = vpop.xlane.xlu1 %6269 }
0x135d   : > { %10120 = vrcp.f32 %v6270_v30 }
0x135e   : > { %10122 = vrcp.f32 %v6261_v26 }
0x1360   : > { %v6279_v51 = vpop.xlane.xlu0 %6278  ;;  %v6264_v15 = vpop.xlane.xlu1 %6263 }
0x1361   : > { %10124 = vrcp.f32 %v6264_v15 }
0x1362   : > { %v10113_v60 = vpop.eup %10112  ;;  %10126 = vrcp.f32 %v6279_v51 }
0x1363   : > { %v6314_v44 = vmul.f32 %v10113_v60, %v12261_v28  ;;  %v10115_v32 = vpop.eup %10114 }
0x1364   : > { %v6282_v46 = vpop.xlane.xlu1 %6281  ;;  %v6273_v37 = vpop.xlane.xlu0 %6272  ;;  %v6311_v38 = vmul.f32 %v10115_v32, %v12255_v3 }
0x1365   : > { %v6328_v8 = vpack.c.bf16 %v6314_v44, %v6313_v29  ;;  %10128 = vrcp.f32 %v6282_v46 }
0x1366   : > { %v10117_v20 = vpop.eup %10116  ;;  %10130 = vrcp.f32 %v6273_v37 }
0x1367   : > { %9474 = vmatmul.mubr.msk.bf16.vlgmr.msra.gmra.mxu1 %vm612_vm1, %v6328_v8  ;;  %v6312_v26 = vmul.f32 %v10117_v20, %v12265_v45  ;;  %v10119_v60 = vpop.eup %10118 }
0x1368   : > { %9484 = vmatpush3.bf16.msra.mxu1 %v12321_v36  ;;  %v6276_v15 = vpop.xlane.xlu1 %6275  ;;  %9485 = vmatprep.mubr.msk.bf16.mxu1 %vm10223_vm0, %v13003_v19  ;;  %v6317_v51 = vmul.f32 %v10119_v60, %v12268_v41 }
0x1369   : > { %9495 = vmatprep.subr.bf16.mxu1 %v13003_v19  ;;  %v6327_v29 = vpack.c.bf16 %v6312_v26, %v6311_v38  ;;  %10132 = vrcp.f32 %v6276_v15 }
0x136a   : > { %v10121_v7 = vpop.eup %10120 }
0x136b   : > { %v6318_v8 = vmul.f32 %v10121_v7, %v12275_v23  ;;  %9468 = vmatmul.mubr.msk.bf16.vlgmr.msra.gmra.mxu0 %vm612_vm1, %v6327_v29  ;;  %v10123_v9 = vpop.eup %10122 }
0x136c   : > { %9478 = vmatpush3.bf16.msra.mxu0 %v12315_v48  ;;  %9479 = vmatprep.mubr.msk.bf16.mxu0 %vm10223_vm0, %v13003_v19  ;;  %v6315_v28 = vmul.f32 %v10123_v9, %v12278_v42 }
0x136d   : > { %v6330_v37 = vpack.c.bf16 %v6318_v8, %v6317_v51  ;;  %9489 = vmatprep.subr.bf16.mxu0 %v13003_v19 }
0x136e   : > { %v10125_v3 = vpop.eup %10124 }
0x136f   : > { %v6316_v45 = vmul.f32 %v10125_v3, %v12284_v47  ;;  %9486 = vmatmul.mubr.msk.bf16.vlgmr.msra.gmra.mxu1 %vm612_vm1, %v6330_v37  ;;  %v10127_v41 = vpop.eup %10126 }
0x1370   : > { %9496 = vmatpush3.bf16.msra.mxu1 %v12325_v17  ;;  %9497 = vmatprep.mubr.msk.bf16.mxu1 %vm10223_vm0, %v13003_v19  ;;  %v6321_v36 = vmul.f32 %v10127_v41, %v12286_v0 }
0x1371   : > { %v6329_v23 = vpack.c.bf16 %v6316_v45, %v6315_v28  ;;  %9507 = vmatprep.subr.bf16.mxu1 %v13003_v19 }
0x1372   : > { %v10129_v48 = vpop.eup %10128 }
0x1373   : > { %v6322_v30 = vmul.f32 %v10129_v48, %v12293_v14  ;;  %9480 = vmatmul.mubr.msk.bf16.vlgmr.msra.gmra.mxu0 %vm612_vm1, %v6329_v23  ;;  %v10131_v42 = vpop.eup %10130  ;;  %v6291_v14 = vpop.xlane.xlu0 %6290 }
0x1374   : > { %9490 = vmatpush3.bf16.msra.mxu0 %v12357_v62  ;;  %9491 = vmatprep.mubr.msk.bf16.mxu0 %vm10223_vm0, %v13003_v19  ;;  %v6319_v44 = vmul.f32 %v10131_v42, %v12295_v22  ;;  %v6765_v22 = vpop.permute.xlu1 %6764  ;;  %10134 = vrcp.f32 %v6291_v14 }
0x1375   : > { %v6332_v47 = vpack.c.bf16 %v6322_v30, %v6321_v36  ;;  %9501 = vmatprep.subr.bf16.mxu0 %v13003_v19  ;;  %v6770_v3 = vsel %vm3817_vm3, %v6765_v22, 0 }
0x1376   : > { %v10133_v17 = vpop.eup %10132 }
0x1377   : > { %v6320_v46 = vmul.f32 %v10133_v17, %v12301_v40  ;;  %9498 = vmatmul.mubr.msk.bf16.vlgmr.msra.gmra.mxu1 %vm612_vm1, %v6332_v47  ;;  %v6285_v40 = vpop.xlane.xlu0 %6284 }
0x1378   : > { %9508 = vmatpush3.bf16.msra.mxu1 %v12365_v1  ;;  %9509 = vmatprep.mubr.msk.bf16.mxu1 %vm10223_vm0, %v13003_v19 }
0x1379   : > { %v6331_v0 = vpack.c.bf16 %v6320_v46, %v6319_v44  ;;  %9519 = vmatprep.subr.bf16.mxu1 %v13003_v19 }
0x137b   : > { %9492 = vmatmul.mubr.msk.bf16.vlgmr.msra.gmra.mxu0 %vm612_vm1, %v6331_v0  ;;  %v6714_v32 = vpop.permute.xlu0 %6713 }
0x137c   : > { %9502 = vmatpush3.bf16.msra.mxu0 %v12363_v52  ;;  %9503 = vmatprep.mubr.msk.bf16.mxu0 %vm10223_vm0, %v13003_v19  ;;  %v6719_v45 = vsel %vm3817_vm3, %v6714_v32, 0 }
0x137d   : > { %9513 = vmatprep.subr.bf16.mxu0 %v13003_v19 }
0x137f   : > { %v6712_v26 = vpop.permute.xlu0 %6711 }
0x1381   : > { %v10135_v38 = vpop.eup %10134 }
0x1382   : > { %v6325_v52 = vmul.f32 %v10135_v38, %v12303_v10 }
0x1383   : > { %v6763_v9 = vpop.permute.xlu0 %6762 }
0x1387   : > { %v6814_v41 = vpop.permute.xlu0 %6813 }
0x138b   : > { %v6865_v23 = vpop.permute.xlu0 %6864 }
0x138f   : > { %v6916_v42 = vpop.permute.xlu0 %6915 }
0x1393   : > { %v6967_v44 = vpop.permute.xlu0 %6966 }
0x1397   : > { %v7018_v22 = vpop.permute.xlu0 %7017 }
0x13a5   : > { %v6294_v62 = vpop.xlane.xlu1 %6293 }
0x13a6   : > { %10136 = vrcp.f32 %v6294_v62 }
0x13a7   : > { %10138 = vrcp.f32 %v6285_v40 }
0x13a9   : > { %v6288_v1 = vpop.xlane.xlu1 %6287 }
0x13aa   : > { %10140 = vrcp.f32 %v6288_v1 }
0x13ad   : > { %v6816_v20 = vpop.permute.xlu1 %6815 }
0x13ae   : > { %v6821_v48 = vsel %vm3817_vm3, %v6816_v20, 0 }
0x13b1   : > { %v6867_v7 = vpop.permute.xlu1 %6866 }
0x13b3   : > { %v10137_v15 = vpop.eup %10136 }
0x13b4   : > { %v6326_v60 = vmul.f32 %v10137_v15, %v12339_v39  ;;  %v10139_v29 = vpop.eup %10138 }
0x13b5   : > { %v6323_v37 = vmul.f32 %v10139_v29, %v12309_v31  ;;  %v6918_v39 = vpop.permute.xlu1 %6917  ;;  %v6872_v31 = vsel %vm3817_vm3, %v6867_v7, 0 }
0x13b6   : > { %v6334_v51 = vpack.c.bf16 %v6326_v60, %v6325_v52  ;;  %v6923_v47 = vsel %vm3817_vm3, %v6918_v39, 0 }
0x13b7   : > { %v10141_v8 = vpop.eup %10140 }
0x13b8   : > { %v6324_v28 = vmul.f32 %v10141_v8, %v12343_v58  ;;  %9510 = vmatmul.mubr.msk.bf16.vlgmr.msra.gmra.mxu1 %vm612_vm1, %v6334_v51 }
0x13b9   : > { %9520 = vmatpush3.bf16.xpose.msra.mxu1 %v6770_v3  ;;  %9521 = vmatprep.mubr.msk.bf16.mxu1 %vm10223_vm0, %v13003_v19  ;;  %v6969_v58 = vpop.permute.xlu1 %6968 }
0x13ba   : > { %v6333_v10 = vpack.c.bf16 %v6324_v28, %v6323_v37  ;;  %9531 = vmatprep.subr.bf16.mxu1 %v13003_v19  ;;  %v6974_v30 = vsel %vm3817_vm3, %v6969_v58, 0 }
0x13bc   : > { %9504 = vmatmul.mubr.msk.bf16.vlgmr.msra.gmra.mxu0 %vm612_vm1, %v6333_v10 }
0x13bd   : > { %9514 = vmatpush3.bf16.xpose.msra.mxu0 %v6719_v45  ;;  %9515 = vmatprep.mubr.msk.bf16.mxu0 %vm10223_vm0, %v13003_v19  ;;  %v7020_v36 = vpop.permute.xlu1 %7019 }
0x13be   : > { %9525 = vmatprep.subr.bf16.mxu0 %v13003_v19  ;;  %v7025_v0 = vsel %vm3817_vm3, %v7020_v36, 0 }
0x13c0   : > { %9522 = vmatmul.mubr.msk.bf16.vlgmr.msra.gmra.mxu1 %vm3817_vm3, %v6763_v9 }
0x13c1   : > { %9532 = vmatpush3.bf16.xpose.msra.mxu1 %v6872_v31  ;;  %9533 = vmatprep.mubr.msk.bf16.mxu1 %vm10223_vm0, %v13003_v19  ;;  %v7071_v17 = vpop.permute.xlu1 %7070 }
0x13c2   : > { %9543 = vmatprep.subr.bf16.mxu1 %v13003_v19  ;;  %v7076_v46 = vsel %vm3817_vm3, %v7071_v17, 0 }
0x13c4   : > { %9516 = vmatmul.mubr.msk.bf16.vlgmr.msra.gmra.mxu0 %vm3817_vm3, %v6712_v26 }
0x13c5   : > { %9526 = vmatpush3.bf16.xpose.msra.mxu0 %v6821_v48  ;;  %9527 = vmatprep.mubr.msk.bf16.mxu0 %vm10223_vm0, %v13003_v19  ;;  %v7069_v14 = vpop.permute.xlu1 %7068 }
0x13c6   : > { %9537 = vmatprep.subr.bf16.mxu0 %v13003_v19 }
0x13c8   : > { %9534 = vmatmul.mubr.msk.bf16.vlgmr.msra.gmra.mxu1 %vm3817_vm3, %v6865_v23 }
0x13c9   : > { %9544 = vmatpush3.bf16.xpose.msra.mxu1 %v6974_v30  ;;  %9545 = vmatprep.mubr.msk.bf16.mxu1 %vm10223_vm0, %v13003_v19 }
0x13ca   : > { %9555 = vmatprep.subr.bf16.mxu1 %v13003_v19 }
0x13cc   : > { %9528 = vmatmul.mubr.msk.bf16.vlgmr.msra.gmra.mxu0 %vm3817_vm3, %v6814_v41 }
0x13cd   : > { %9538 = vmatpush3.bf16.xpose.msra.mxu0 %v6923_v47  ;;  %9539 = vmatprep.mubr.msk.bf16.mxu0 %vm10223_vm0, %v13003_v19 }
0x13ce   : > { %9549 = vmatprep.subr.bf16.mxu0 %v13003_v19 }
0x13d0   : > { %9546 = vmatmul.mubr.msk.bf16.vlgmr.msra.gmra.mxu1 %vm3817_vm3, %v6967_v44 }
0x13d1   : > { %9556 = vmatpush3.bf16.xpose.msra.mxu1 %v7076_v46  ;;  %9557 = vmatprep.mubr.msk.bf16.mxu1 %vm10223_vm0, %v13003_v19 }
0x13d2   : > { %9567 = vmatprep.subr.bf16.mxu1 %v13003_v19 }
0x13d4   : > { %9540 = vmatmul.mubr.msk.bf16.vlgmr.msra.gmra.mxu0 %vm3817_vm3, %v6916_v42 }
0x13d5   : > { %9550 = vmatpush3.bf16.xpose.msra.mxu0 %v7025_v0  ;;  %9551 = vmatprep.mubr.msk.bf16.mxu0 %vm10223_vm0, %v13003_v19 }
0x13d6   : > { %9561 = vmatprep.subr.bf16.mxu0 %v13003_v19 }
0x13d8   : > { %9558 = vmatmul.mubr.msk.bf16.vlgmr.msra.gmra.mxu1 %vm3817_vm3, %v7069_v14 }
0x13d9   : > { %9569 = vmatprep.mubr.msk.bf16.mxu1 %vm10223_vm0, %v13003_v19 }
0x13dc   : > { %9552 = vmatmul.mubr.msk.bf16.vlgmr.msra.gmra.mxu0 %vm3817_vm3, %v7018_v22 }
0x13dd   : > { %9563 = vmatprep.mubr.msk.bf16.mxu0 %vm10223_vm0, %v13003_v19 }
0x1427   : > { %v12459_v40 = vpop.f32.mrf.mxu1 }
0x1429   : > { %v9475_v62 = vpop.f32.mrf.mxu1 }
0x142b   : > { %v12461_v1 = vpop.f32.mrf.mxu1  ;;  %v12463_v32 = vpop.f32.mrf.mxu0 }
0x142d   : > { %v9476_v38 = vpop.f32.mrf.mxu1  ;;  %v9469_v26 = vpop.f32.mrf.mxu0 }
0x142f   : > { %v12467_v15 = vpop.f32.mrf.mxu0  ;;  %v12469_v52 = vpop.f32.mrf.mxu1 }
0x1431   : > { %v9470_v29 = vpop.f32.mrf.mxu0  ;;  %v9487_v7 = vpop.f32.mrf.mxu1 }
0x1433   : > { %v12473_v51 = vpop.f32.mrf.mxu0  ;;  %v12475_v8 = vpop.f32.mrf.mxu1 }
0x1435   : > { %v9481_v37 = vpop.f32.mrf.mxu0  ;;  %v9488_v3 = vpop.f32.mrf.mxu1 }
0x1437   : > { %v12479_v28 = vpop.f32.mrf.mxu0  ;;  %v12481_v10 = vpop.f32.mrf.mxu1 }
0x1439   : > { %v9482_v45 = vpop.f32.mrf.mxu0  ;;  %v9499_v41 = vpop.f32.mrf.mxu1 }
0x143b   : > { %v12485_v31 = vpop.f32.mrf.mxu0  ;;  %v12487_v58 = vpop.f32.mrf.mxu1 }
0x143d   : > { %v9493_v48 = vpop.f32.mrf.mxu0  ;;  %v9500_v36 = vpop.f32.mrf.mxu1 }
0x143f   : > { %v12491_v30 = vpop.f32.mrf.mxu0 }
0x1441   : > { %v9494_v47 = vpop.f32.mrf.mxu0 }
0x1478   : > { %v12495_v17 = vpop.f32.mrf.mxu1 }
0x147a   : > { %v9511_v44 = vpop.f32.mrf.mxu1 }
0x147c   : > { %v12497_v46 = vpop.f32.mrf.mxu0  ;;  %v12499_v0 = vpop.f32.mrf.mxu1 }
0x147d   : > { %13004 = vst [vmem:[#allocation18_spill] sm:$0xff] %v12497_v46 }
0x147e   : > { %v9505_v22 = vpop.f32.mrf.mxu0  ;;  %v9512_v62 = vpop.f32.mrf.mxu1 }
0x1480   : > { %v12503_v38 = vpop.f32.mrf.mxu0  ;;  %v12505_v26 = vpop.f32.mrf.mxu1 }
0x1481   : > { %13005 = vst [vmem:[#allocation19_spill] sm:$0xff] %v12503_v38  ;;  %v7125_v7 = vsel %vm612_vm1, %v12505_v26, -inf }
0x1482   : > { %7126 = vmax.xlane.f32.xlu0 %v7125_v7  ;;  %v9506_v37 = vpop.f32.mrf.mxu0  ;;  %v9523_v3 = vpop.f32.mrf.mxu1 }
0x1484   : > { %v12511_v45 = vpop.f32.mrf.mxu0  ;;  %v12513_v41 = vpop.f32.mrf.mxu1 }
0x1485   : > { %v7119_v48 = vsel %vm612_vm1, %v12511_v45, -inf  ;;  %v7128_v62 = vsel %vm612_vm1, %v12513_v41, -inf }
0x1486   : > { %v9524_v36 = vpop.f32.mrf.mxu1  ;;  %7120 = vmax.xlane.f32.xlu0 %v7119_v48  ;;  %v9517_v47 = vpop.f32.mrf.mxu0 }
0x1488   : > { %v12517_v44 = vpop.f32.mrf.mxu0  ;;  %v12519_v22 = vpop.f32.mrf.mxu1 }
0x1489   : > { %v7122_v7 = vsel %vm612_vm1, %v12517_v44, -inf  ;;  %v7137_v48 = vsel %vm612_vm1, %v12519_v22, -inf }
0x148a   : > { %7129 = vmax.xlane.f32.xlu0 %v7128_v62  ;;  %7123 = vmax.xlane.f32.xlu1 %v7122_v7  ;;  %v9518_v37 = vpop.f32.mrf.mxu0  ;;  %v9535_v3 = vpop.f32.mrf.mxu1 }
0x148c   : > { %v12525_v29 = vpop.f32.mrf.mxu0  ;;  %v12527_v14 = vpop.f32.mrf.mxu1 }
0x148d   : > { %v7140_v36 = vsel %vm612_vm1, %v12527_v14, -inf  ;;  %v7131_v7 = vsel %vm612_vm1, %v12525_v29, -inf }
0x148e   : > { %v9529_v47 = vpop.f32.mrf.mxu0  ;;  %7138 = vmax.xlane.f32.xlu0 %v7137_v48  ;;  %7141 = vmax.xlane.f32.xlu1 %v7140_v36  ;;  %v9536_v42 = vpop.f32.mrf.mxu1 }
0x1490   : > { %v12533_v23 = vpop.f32.mrf.mxu0  ;;  %v12535_v62 = vpop.f32.mrf.mxu1 }
0x1491   : > { %v7134_v37 = vsel %vm612_vm1, %v12533_v23, -inf  ;;  %v7149_v42 = vsel %vm612_vm1, %v12535_v62, -inf }
0x1492   : > { %v9530_v3 = vpop.f32.mrf.mxu0  ;;  %7132 = vmax.xlane.f32.xlu0 %v7131_v7  ;;  %7135 = vmax.xlane.f32.xlu1 %v7134_v37  ;;  %v9547_v9 = vpop.f32.mrf.mxu1 }
0x1494   : > { %v12541_v20 = vpop.f32.mrf.mxu0  ;;  %v12543_v47 = vpop.f32.mrf.mxu1 }
0x1495   : > { %v7152_v48 = vsel %vm612_vm1, %v12543_v47, -inf  ;;  %v7143_v9 = vsel %vm612_vm1, %v12541_v20, -inf }
0x1496   : > { %v9541_v36 = vpop.f32.mrf.mxu0  ;;  %7150 = vmax.xlane.f32.xlu0 %v7149_v42  ;;  %7153 = vmax.xlane.f32.xlu1 %v7152_v48  ;;  %v9548_v39 = vpop.f32.mrf.mxu1 }
0x1498   : > { %v12549_v60 = vpop.f32.mrf.mxu0  ;;  %v12551_v3 = vpop.f32.mrf.mxu1 }
0x1499   : > { %v7146_v7 = vsel %vm612_vm1, %v12549_v60, -inf  ;;  %v7161_v39 = vsel %vm612_vm1, %v12551_v3, -inf }
0x149a   : > { %v9542_v37 = vpop.f32.mrf.mxu0  ;;  %7144 = vmax.xlane.f32.xlu0 %v7143_v9  ;;  %7147 = vmax.xlane.f32.xlu1 %v7146_v7  ;;  %v9559_v43 = vpop.f32.mrf.mxu1 }
0x149c   : > { %v12557_v56 = vpop.f32.mrf.mxu0  ;;  %v12559_v36 = vpop.f32.mrf.mxu1 }
0x149d   : > { %v7155_v46 = vsel %vm612_vm1, %v12557_v56, -inf  ;;  %v7164_v43 = vsel %vm612_vm1, %v12559_v36, -inf }
0x149e   : > { %v9553_v42 = vpop.f32.mrf.mxu0  ;;  %7162 = vmax.xlane.f32.xlu0 %v7161_v39  ;;  %v9560_v48 = vpop.f32.mrf.mxu1 }
0x14a0   : > { %v12563_v12 = vpop.f32.mrf.mxu0 }
0x14a2   : > { %v9554_v38 = vpop.f32.mrf.mxu0  ;;  %7156 = vmax.xlane.f32.xlu0 %v7155_v46  ;;  %v7158_v46 = vsel %vm612_vm1, %v12563_v12, -inf }
0x14ab   : > { %7350 = vrot.lane.b32.xlu1 %v11432_v54, %s10234_s27 }
0x14af   : > { %7397 = vrot.lane.b32.xlu1 %v11440_v61, %s10234_s27 }
0x14b3   : > { %7444 = vrot.lane.b32.xlu1 %v11444_v11, %s10234_s27 }
0x14b8   : > { %7303 = vrot.lane.b32.xlu0 %v11434_v63, %s10234_s27 }
0x14bc   : > { %7491 = vrot.lane.b32.xlu0 %v11450_v25, %s10234_s27 }
0x14d7   : > { %7165 = vmax.xlane.f32.xlu1 %v7164_v43 }
0x14db   : > { %7159 = vmax.xlane.f32.xlu1 %v7158_v46 }
0x14ec   : > { %7538 = vrot.lane.b32.xlu1 %v11448_v5, %s10234_s27 }
0x150b   : > { %v7127_v54 = vpop.xlane.xlu0 %7126 }
0x150c   : > { %v7169_v61 = vsub.f32 %v12505_v26, %v7127_v54 }
0x150e   : > { %v7187_v11 = vmul.f32 1.442695, %v7169_v61 }
0x150f   : > { %v7121_v38 = vpop.xlane.xlu0 %7120 }
0x1510   : > { %10142 = vpow2.f32 %v7187_v11  ;;  %v7167_v63 = vsub.f32 %v12511_v45, %v7121_v38 }
0x1512   : > { %v7183_v25 = vmul.f32 1.442695, %v7167_v63 }
0x1513   : > { %v7130_v9 = vpop.xlane.xlu0 %7129  ;;  %v7124_v7 = vpop.xlane.xlu1 %7123 }
0x1514   : > { %10144 = vpow2.f32 %v7183_v25  ;;  %v7170_v37 = vsub.f32 %v12513_v41, %v7130_v9  ;;  %v7168_v39 = vsub.f32 %v12517_v44, %v7124_v7 }
0x1516   : > { %v7189_v42 = vmul.f32 1.442695, %v7170_v37  ;;  %v7185_v48 = vmul.f32 1.442695, %v7168_v39 }
0x1517   : > { %v7139_v43 = vpop.xlane.xlu0 %7138  ;;  %v7142_v5 = vpop.xlane.xlu1 %7141 }
0x1518   : > { %10146 = vpow2.f32 %v7189_v42  ;;  %v7173_v26 = vsub.f32 %v12519_v22, %v7139_v43  ;;  %v7174_v46 = vsub.f32 %v12527_v14, %v7142_v5 }
0x1519   : > { %10148 = vpow2.f32 %v7185_v48 }
0x151a   : > { %v7195_v54 = vmul.f32 1.442695, %v7173_v26  ;;  %v7197_v45 = vmul.f32 1.442695, %v7174_v46 }
0x151b   : > { %v7133_v61 = vpop.xlane.xlu0 %7132  ;;  %v7136_v11 = vpop.xlane.xlu1 %7135 }
0x151c   : > { %10150 = vpow2.f32 %v7195_v54  ;;  %v7171_v38 = vsub.f32 %v12525_v29, %v7133_v61  ;;  %v7172_v41 = vsub.f32 %v12533_v23, %v7136_v11 }
0x151d   : > { %v12591_v44 = vpop.eup %10142  ;;  %10152 = vpow2.f32 %v7197_v45 }
0x151e   : > { %v7191_v63 = vmul.f32 1.442695, %v7171_v38  ;;  %v7193_v25 = vmul.f32 1.442695, %v7172_v41  ;;  %v7221_v22 = vsel %vm612_vm1, %v12591_v44, 0.0 }
0x151f   : > { %v7151_v9 = vpop.xlane.xlu0 %7150  ;;  %7222 = vadd.xlane.f32.xlu0 %v7221_v22  ;;  %v7154_v14 = vpop.xlane.xlu1 %7153 }
0x1520   : > { %10154 = vpow2.f32 %v7191_v63  ;;  %v7177_v7 = vsub.f32 %v12535_v62, %v7151_v9  ;;  %v7178_v37 = vsub.f32 %v12543_v47, %v7154_v14 }
0x1521   : > { %v12597_v39 = vpop.eup %10144  ;;  %10156 = vpow2.f32 %v7193_v25 }
0x1522   : > { %v7203_v23 = vmul.f32 1.442695, %v7177_v7  ;;  %v7205_v29 = vmul.f32 1.442695, %v7178_v37  ;;  %v7215_v42 = vsel %vm612_vm1, %v12597_v39, 0.0 }
0x1523   : > { %v7145_v48 = vpop.xlane.xlu0 %7144  ;;  %7216 = vadd.xlane.f32.xlu0 %v7215_v42  ;;  %v7148_v43 = vpop.xlane.xlu1 %7147 }
0x1524   : > { %10158 = vpow2.f32 %v7203_v23  ;;  %v7175_v5 = vsub.f32 %v12541_v20, %v7145_v48  ;;  %v7176_v26 = vsub.f32 %v12549_v60, %v7148_v43 }
0x1525   : > { %v12603_v46 = vpop.eup %10146  ;;  %10160 = vpow2.f32 %v7205_v29 }
0x1526   : > { %v7199_v62 = vmul.f32 1.442695, %v7175_v5  ;;  %v7201_v47 = vmul.f32 1.442695, %v7176_v26  ;;  %v7224_v54 = vsel %vm612_vm1, %v12603_v46, 0.0  ;;  %v12607_v45 = vpop.eup %10148 }
0x1527   : > { %v7163_v61 = vpop.xlane.xlu0 %7162  ;;  %7225 = vadd.xlane.f32.xlu1 %v7224_v54  ;;  %v7351_v11 = vpop.permute.xlu1 %7350  ;;  %v7218_v63 = vsel %vm612_vm1, %v12607_v45, 0.0 }
0x1528   : > { %10162 = vpow2.f32 %v7199_v62  ;;  %v7181_v38 = vsub.f32 %v12551_v3, %v7163_v61  ;;  %9568 = vmatpush3.bf16.msra.mxu1 %v7351_v11 }
0x1529   : > { %v12610_v20 = vpop.eup %10150  ;;  %9579 = vmatprep.subr.bf16.mxu1 %v13003_v19  ;;  %10164 = vpow2.f32 %v7201_v47 }
0x152a   : > { %v7211_v60 = vmul.f32 1.442695, %v7181_v38  ;;  %v7233_v41 = vsel %vm612_vm1, %v12610_v20, 0.0  ;;  %v12617_v25 = vpop.eup %10152 }
0x152b   : > { %7234 = vadd.xlane.f32.xlu0 %v7233_v41  ;;  %v7157_v22 = vpop.xlane.xlu0 %7156  ;;  %7219 = vadd.xlane.f32.xlu1 %v7218_v63  ;;  %v7236_v37 = vsel %vm612_vm1, %v12617_v25, 0.0  ;;  %v12657_v41 = vpop.permute.xlu1 %7397  ;;  %v13006_v63 = vpack.i.bf16 %v12129_v57, %v12125_v4  ;;  %v13009_v57 = vpack.i.bf16 %v12479_v28, %v12473_v51  ;;  %v13013_v51 = vpack.i.bf16 %v12137_v59, %v12131_v49 }
0x152c   : > { %10166 = vpow2.f32 %v7211_v60  ;;  %v7179_v3 = vsub.f32 %v12557_v56, %v7157_v22  ;;  %v13014_v28 = vpack.i.bf16 %v12475_v8, %v12469_v52 }
0x152d   : > { %v12620_v9 = vpop.eup %10154 }
0x152e   : > { %v7207_v14 = vmul.f32 1.442695, %v7179_v3  ;;  %v7227_v7 = vsel %vm612_vm1, %v12620_v9, 0.0  ;;  %v12626_v23 = vpop.eup %10156  ;;  %v13007_v3 = vpack.i.bf16 %v12467_v15, %v12463_v32  ;;  %v13010_v15 = vpack.i.bf16 %v12153_v24, %v12147_v53 }
0x152f   : > { %7228 = vadd.xlane.f32.xlu0 %v7227_v7  ;;  %v7304_v29 = vpop.permute.xlu0 %7303  ;;  %7237 = vadd.xlane.f32.xlu1 %v7236_v37  ;;  %v7230_v48 = vsel %vm612_vm1, %v12626_v23, 0.0  ;;  %v7445_v22 = vpop.permute.xlu1 %7444  ;;  %v13011_v53 = vpack.i.bf16 %v12123_v27, %v12121_v35  ;;  %v13012_v24 = vpack.i.bf16 %v12461_v1, %v12459_v40 }
0x1530   : > { %10168 = vpow2.f32 %v7207_v14  ;;  %9562 = vmatpush3.bf16.msra.mxu0 %v7304_v29 }
0x1531   : > { %v12628_v42 = vpop.eup %10158  ;;  %9573 = vmatprep.subr.bf16.mxu0 %v13003_v19 }
0x1532   : > { %v7245_v56 = vsel %vm612_vm1, %v12628_v42, 0.0  ;;  %v12635_v43 = vpop.eup %10160 }
0x1533   : > { %7246 = vadd.xlane.f32.xlu0 %v7245_v56  ;;  %7231 = vadd.xlane.f32.xlu1 %v7230_v48  ;;  %v7248_v62 = vsel %vm612_vm1, %v12635_v43, 0.0  ;;  %v12711_v35 = vpop.permute.xlu0 %7491 }
0x1535   : > { %v12637_v5 = vpop.eup %10162 }
0x1536   : > { %v7239_v26 = vsel %vm612_vm1, %v12637_v5, 0.0  ;;  %v12643_v47 = vpop.eup %10164 }
0x1537   : > { %7240 = vadd.xlane.f32.xlu0 %v7239_v26  ;;  %7249 = vadd.xlane.f32.xlu1 %v7248_v62  ;;  %v7242_v11 = vsel %vm612_vm1, %v12643_v47, 0.0 }
0x1539   : > { %v12645_v54 = vpop.eup %10166 }
0x153a   : > { %v7257_v61 = vsel %vm612_vm1, %v12645_v54, 0.0 }
0x153b   : > { %7258 = vadd.xlane.f32.xlu0 %v7257_v61  ;;  %7243 = vadd.xlane.f32.xlu1 %v7242_v11 }
0x153d   : > { %v12651_v38 = vpop.eup %10168 }
0x153e   : > { %v7251_v60 = vsel %vm612_vm1, %v12651_v38, 0.0 }
0x153f   : > { %7252 = vadd.xlane.f32.xlu0 %v7251_v60 }
0x1555   : > { %7585 = vrot.lane.b32.xlu0 %v11458_v13, %s10234_s27  ;;  %v13008_v13 = vpack.i.bf16 %v12141_v2, %v12135_v21 }
0x1559   : > { %9678 = vrot.lane.b32.xlu0 %v13006_v63, %s10235_s28 }
0x155d   : > { %9688 = vrot.lane.b32.xlu0 %v13007_v3, %s10236_s30 }
0x1560   : > { %v7166_v14 = vpop.xlane.xlu1 %7165 }
0x1561   : > { %v7182_v7 = vsub.f32 %v12559_v36, %v7166_v14  ;;  %9698 = vrot.lane.b32.xlu0 %v13008_v13, %s10235_s28 }
0x1563   : > { %v7213_v37 = vmul.f32 1.442695, %v7182_v7 }
0x1564   : > { %v7160_v29 = vpop.xlane.xlu1 %7159 }
0x1565   : > { %10170 = vpow2.f32 %v7213_v37  ;;  %v7180_v4 = vsub.f32 %v12563_v12, %v7160_v29  ;;  %9708 = vrot.lane.b32.xlu0 %v13009_v57, %s10236_s30 }
0x1567   : > { %v7209_v32 = vmul.f32 1.442695, %v7180_v4 }
0x1568   : > { %v7539_v40 = vpop.permute.xlu1 %7538 }
0x1569   : > { %10172 = vpow2.f32 %v7209_v32  ;;  %9718 = vrot.lane.b32.xlu0 %v13010_v15, %s10235_s28 }
0x1572   : > { %v12681_v36 = vpop.eup %10170 }
0x1573   : > { %v7260_v21 = vsel %vm612_vm1, %v12681_v36, 0.0 }
0x1574   : > { %7261 = vadd.xlane.f32.xlu1 %v7260_v21 }
0x1576   : > { %v12685_v2 = vpop.eup %10172 }
0x1577   : > { %v7254_v12 = vsel %vm612_vm1, %v12685_v2, 0.0 }
0x1578   : > { %7255 = vadd.xlane.f32.xlu1 %v7254_v12 }
0x1589   : > { %7632 = vrot.lane.b32.xlu1 %v11456_v34, %s10234_s27  ;;  %v13015_v34 = vpack.i.bf16 %v12149_v16, %v12143_v50  ;;  %s8471_s27 = sshll.u32 %s13043_s22, 3 }
0x158a   : > { %s549_s18 = scalar_lea.vmem %s12980_s16, %s8471_s27 }
0x158d   : > { %9683 = vrot.lane.b32.xlu1 %v13011_v53, %s10235_s28 }
0x1591   : > { %9693 = vrot.lane.b32.xlu1 %v13012_v24, %s10236_s30 }
0x1595   : > { %9703 = vrot.lane.b32.xlu1 %v13013_v51, %s10235_s28 }
0x1599   : > { %9713 = vrot.lane.b32.xlu1 %v13014_v28, %s10236_s30 }
0x159d   : > { %9723 = vrot.lane.b32.xlu1 %v13015_v34, %s10235_s28 }
0x15a8   : > { %v7223_v27 = vpop.xlane.xlu0 %7222 }
0x15a9   : > { %10174 = vrcp.f32 %v7223_v27 }
0x15ac   : > { %v7217_v1 = vpop.xlane.xlu0 %7216 }
0x15b0   : > { %v7226_v56 = vpop.xlane.xlu1 %7225 }
0x15b1   : > { %10176 = vrcp.f32 %v7226_v56 }
0x15b2   : > { %10178 = vrcp.f32 %v7217_v1 }
0x15b4   : > { %v7235_v49 = vpop.xlane.xlu0 %7234  ;;  %v7220_v59 = vpop.xlane.xlu1 %7219 }
0x15b5   : > { %10180 = vrcp.f32 %v7220_v59 }
0x15b6   : > { %10182 = vrcp.f32 %v7235_v49  ;;  %v10175_v48 = vpop.eup %10174 }
0x15b7   : > { %v7281_v62 = vmul.f32 %v10175_v48, %v12591_v44 }
0x15b8   : > { %v7229_v52 = vpop.xlane.xlu0 %7228  ;;  %v7238_v8 = vpop.xlane.xlu1 %7237 }
0x15b9   : > { %10184 = vrcp.f32 %v7238_v8 }
0x15ba   : > { %10186 = vrcp.f32 %v7229_v52 }
0x15bc   : > { %v7247_v50 = vpop.xlane.xlu0 %7246  ;;  %v7232_v16 = vpop.xlane.xlu1 %7231 }
0x15bd   : > { %10188 = vrcp.f32 %v7232_v16 }
0x15be   : > { %v10177_v26 = vpop.eup %10176  ;;  %10190 = vrcp.f32 %v7247_v50 }
0x15bf   : > { %v7282_v61 = vmul.f32 %v10177_v26, %v12603_v46  ;;  %v10179_v60 = vpop.eup %10178 }
0x15c0   : > { %v7250_v11 = vpop.xlane.xlu1 %7249  ;;  %v7241_v3 = vpop.xlane.xlu0 %7240  ;;  %v7279_v7 = vmul.f32 %v10179_v60, %v12597_v39 }
0x15c1   : > { %v7296_v63 = vpack.c.bf16 %v7282_v61, %v7281_v62  ;;  %10192 = vrcp.f32 %v7250_v11 }
0x15c2   : > { %v10181_v14 = vpop.eup %10180  ;;  %10194 = vrcp.f32 %v7241_v3 }
0x15c3   : > { %9570 = vmatmul.mubr.msk.bf16.vlgmr.msra.gmra.mxu1 %vm612_vm1, %v7296_v63  ;;  %v7280_v13 = vmul.f32 %v10181_v14, %v12607_v45  ;;  %v10183_v44 = vpop.eup %10182 }
0x15c4   : > { %9580 = vmatpush3.bf16.msra.mxu1 %v7445_v22  ;;  %v7244_v37 = vpop.xlane.xlu1 %7243  ;;  %9581 = vmatprep.mubr.msk.bf16.mxu1 %vm10223_vm0, %v13003_v19  ;;  %v7285_v4 = vmul.f32 %v10183_v44, %v12610_v20  ;;  %v7259_v21 = vpop.xlane.xlu0 %7258 }
0x15c5   : > { %9591 = vmatprep.subr.bf16.mxu1 %v13003_v19  ;;  %v7295_v46 = vpack.c.bf16 %v7280_v13, %v7279_v7  ;;  %10196 = vrcp.f32 %v7244_v37  ;;  %v13016_v13 = vpack.i.bf16 %v12487_v58, %v12481_v10  ;;  %v13018_v58 = vpack.i.bf16 %v12161_v55, %v12157_v18  ;;  %v13021_v55 = vld [vmem:[#allocation19_spill] sm:$0xff] }
0x15c6   : > { %v10185_v29 = vpop.eup %10184  ;;  %10198 = vrcp.f32 %v7259_v21  ;;  %v13020_v18 = vpack.i.bf16 %v12499_v0, %v12495_v17 }
0x15c7   : > { %v7286_v57 = vmul.f32 %v10185_v29, %v12617_v25  ;;  %9564 = vmatmul.mubr.msk.bf16.vlgmr.msra.gmra.mxu0 %vm612_vm1, %v7295_v46  ;;  %v10187_v39 = vpop.eup %10186 }
0x15c8   : > { %9574 = vmatpush3.bf16.msra.mxu0 %v12657_v41  ;;  %9575 = vmatprep.mubr.msk.bf16.mxu0 %vm10223_vm0, %v13003_v19  ;;  %v7283_v32 = vmul.f32 %v10187_v39, %v12620_v9  ;;  %v7253_v24 = vpop.xlane.xlu0 %7252 }
0x15c9   : > { %v7298_v45 = vpack.c.bf16 %v7286_v57, %v7285_v4  ;;  %9585 = vmatprep.subr.bf16.mxu0 %v13003_v19  ;;  %v13017_v57 = vpack.i.bf16 %v12491_v30, %v12485_v31  ;;  %v13019_v30 = vpack.i.bf16 %v12165_v6, %v12159_v33 }
0x15ca   : > { %v10189_v22 = vpop.eup %10188 }
0x15cb   : > { %v7284_v15 = vmul.f32 %v10189_v22, %v12626_v23  ;;  %9582 = vmatmul.mubr.msk.bf16.vlgmr.msra.gmra.mxu1 %vm612_vm1, %v7298_v45  ;;  %v10191_v20 = vpop.eup %10190 }
0x15cc   : > { %9592 = vmatpush3.bf16.msra.mxu1 %v7539_v40  ;;  %9593 = vmatprep.mubr.msk.bf16.mxu1 %vm10223_vm0, %v13003_v19  ;;  %v7289_v12 = vmul.f32 %v10191_v20, %v12628_v42 }
0x15cd   : > { %v7297_v25 = vpack.c.bf16 %v7284_v15, %v7283_v32  ;;  %9603 = vmatprep.subr.bf16.mxu1 %v13003_v19 }
0x15ce   : > { %v10193_v41 = vpop.eup %10192 }
0x15cf   : > { %v7290_v53 = vmul.f32 %v10193_v41, %v12635_v43  ;;  %9576 = vmatmul.mubr.msk.bf16.vlgmr.msra.gmra.mxu0 %vm612_vm1, %v7297_v25  ;;  %v10195_v9 = vpop.eup %10194  ;;  %v7586_v43 = vpop.permute.xlu0 %7585 }
0x15d0   : > { %9586 = vmatpush3.bf16.msra.mxu0 %v12711_v35  ;;  %9587 = vmatprep.mubr.msk.bf16.mxu0 %vm10223_vm0, %v13003_v19  ;;  %v7287_v28 = vmul.f32 %v10195_v9, %v12637_v5  ;;  %v13022_v9 = vld [vmem:[#allocation18_spill] sm:$0xff] }
0x15d1   : > { %v7300_v23 = vpack.c.bf16 %v7290_v53, %v7289_v12  ;;  %9597 = vmatprep.subr.bf16.mxu0 %v13003_v19 }
0x15d2   : > { %v10197_v51 = vpop.eup %10196 }
0x15d3   : > { %v7288_v34 = vmul.f32 %v10197_v51, %v12643_v47  ;;  %9594 = vmatmul.mubr.msk.bf16.vlgmr.msra.gmra.mxu1 %vm612_vm1, %v7300_v23  ;;  %v10199_v27 = vpop.eup %10198  ;;  %v13023_v23 = vpack.i.bf16 %v13021_v55, %v13022_v9 }
0x15d4   : > { %9605 = vmatprep.mubr.msk.bf16.mxu1 %vm10223_vm0, %v13003_v19  ;;  %v7293_v1 = vmul.f32 %v10199_v27, %v12645_v54  ;;  %v9814_v54 = vld [vmem:[%s12972_s8 + $0x8] sm:$0xff]  }
0x15d5   : > { %v7299_v42 = vpack.c.bf16 %v7288_v34, %v7287_v28 }
0x15d7   : > { %9588 = vmatmul.mubr.msk.bf16.vlgmr.msra.gmra.mxu0 %vm612_vm1, %v7299_v42 }
0x15d8   : > { %9598 = vmatpush3.bf16.msra.mxu0 %v7586_v43  ;;  %9599 = vmatprep.mubr.msk.bf16.mxu0 %vm10223_vm0, %v13003_v19 }
0x15d9   : > { %9609 = vmatprep.subr.bf16.mxu0 %v9814_v54 }
0x15fd   : > { %v7262_v35 = vpop.xlane.xlu1 %7261 }
0x15fe   : > { %10200 = vrcp.f32 %v7262_v35 }
0x15ff   : > { %10202 = vrcp.f32 %v7253_v24 }
0x1601   : > { %v7256_v5 = vpop.xlane.xlu1 %7255 }
0x1602   : > { %10204 = vrcp.f32 %v7256_v5  ;;  %v9679_v5 = vpop.permute.xlu0 %9678 }
0x1605   : > { %v7633_v47 = vpop.permute.xlu1 %7632 }
0x1606   : > { %9604 = vmatpush3.bf16.msra.mxu1 %v7633_v47  ;;  %v9689_v27 = vpop.permute.xlu0 %9688 }
0x1607   : > { %9629 = vmatprep.subr.bf16.mxu1 %v13003_v19 }
0x1609   : > { %v9684_v0 = vpop.permute.xlu1 %9683 }
0x160b   : > { %v10201_v40 = vpop.eup %10200 }
0x160c   : > { %v7294_v56 = vmul.f32 %v10201_v40, %v12681_v36  ;;  %v10203_v49 = vpop.eup %10202 }
0x160d   : > { %v7291_v8 = vmul.f32 %v10203_v49, %v12651_v38  ;;  %v9815_v38 = vld [vmem:[%s12972_s8] sm:$0xff]   ;;  %v9694_v47 = vpop.permute.xlu1 %9693 }
0x160e   : > { %v7302_v59 = vpack.c.bf16 %v7294_v56, %v7293_v1  ;;  %v9699_v1 = vpop.permute.xlu0 %9698 }
0x160f   : > { %v10205_v52 = vpop.eup %10204 }
0x1610   : > { %v7292_v48 = vmul.f32 %v10205_v52, %v12685_v2  ;;  %9606 = vmatmul.mubr.msk.bf16.vlgmr.msra.gmra.mxu1 %vm612_vm1, %v7302_v59 }
0x1611   : > { %9633 = vmatprep.mubr.msk.bf16.mxu1 %vm10223_vm0, %v13003_v19  ;;  %v9704_v40 = vpop.permute.xlu1 %9703 }
0x1612   : > { %v7301_v50 = vpack.c.bf16 %v7292_v48, %v7291_v8  ;;  %v9709_v49 = vpop.permute.xlu0 %9708  ;;  %v9681_v8 = vunpack.i.h.bf16 %v9679_v5  ;;  %v9680_v48 = vunpack.i.l.bf16 %v9679_v5 }
0x1613   : > { %v9711_v9 = vunpack.i.h.bf16 %v9709_v49 }
0x1614   : > { %9600 = vmatmul.mubr.msk.bf16.vlgmr.msra.gmra.mxu0 %vm612_vm1, %v7301_v50 }
0x1615   : > { %9610 = vmatpush3.bf16.msra.mxu0 %v9814_v54  ;;  %v9714_v56 = vpop.permute.xlu1 %9713  ;;  %v9686_v54 = vunpack.i.h.bf16 %v9684_v0 }
0x1616   : > { %9611 = vmatprep.subr.bf16.mxu0 %v9815_v38  ;;  %v12798_v50 = vpop.permute.xlu0 %9718 }
0x1619   : > { %9612 = vmatpush3.bf16.msra.mxu0 %v9815_v38  ;;  %v12796_v59 = vpop.permute.xlu1 %9723  ;;  %v9696_v38 = vunpack.i.h.bf16 %v9694_v47 }
0x1683   : > { %v7390_v36 = vpop.f32.mrf.mxu1 }
0x1685   : > { %v9571_v2 = vpop.f32.mrf.mxu1 }
0x1686   : > { %v9695_v2 = vunpack.i.l.bf16 %v9694_v47 }
0x1687   : > { %v7393_v16 = vpop.f32.mrf.mxu1  ;;  %v7343_v26 = vpop.f32.mrf.mxu0 }
0x1688   : > { %v9727_v62 = vpack.i.bf16 %v7393_v16, %v7390_v36  ;;  %v9685_v36 = vunpack.i.l.bf16 %v9684_v0  ;;  %v9691_v16 = vunpack.i.h.bf16 %v9689_v27 }
0x1689   : > { %v9572_v61 = vpop.f32.mrf.mxu1  ;;  %v9565_v11 = vpop.f32.mrf.mxu0 }
0x168a   : > { %9728 = vrot.lane.b32.xlu1 %v9727_v62, %s10237_s20 }
0x168b   : > { %v7346_v60 = vpop.f32.mrf.mxu0  ;;  %v7484_v63 = vpop.f32.mrf.mxu1 }
0x168c   : > { %v9732_v3 = vpack.i.bf16 %v7346_v60, %v7343_v26  ;;  %v9690_v26 = vunpack.i.l.bf16 %v9689_v27  ;;  %v13024_v60 = vld [vmem:[#allocation5_spill] sm:$0xff] }
0x168d   : > { %v9566_v14 = vpop.f32.mrf.mxu0  ;;  %v9583_v7 = vpop.f32.mrf.mxu1 }
0x168e   : > { %9743 = vrot.lane.b32.xlu1 %v13016_v13, %s10236_s30  ;;  %9733 = vrot.lane.b32.xlu0 %v9732_v3, %s10237_s20  ;;  %v13025_v3 = vld [vmem:[#allocation3_spill] sm:$0xff]  ;;  %v13026_v7 = vld [vmem:[#allocation4_spill] sm:$0xff] }
0x168f   : > { %v7437_v37 = vpop.f32.mrf.mxu0  ;;  %v7487_v44 = vpop.f32.mrf.mxu1  ;;  %v7871_v14 = vsel %vm3817_vm3, %v13025_v3, %v9680_v48  ;;  %v7874_v13 = vsel %vm3817_vm3, %v13026_v7, %v9686_v54  ;;  %v9721_v48 = vunpack.i.h.bf16 %v12798_v50 }
0x1690   : > { %v9747_v46 = vpack.i.bf16 %v7487_v44, %v7484_v63  ;;  %v7872_v63 = vsel %vm3817_vm3, %v13024_v60, %v9681_v8 }
0x1691   : > { %v9577_v29 = vpop.f32.mrf.mxu0  ;;  %v9584_v4 = vpop.f32.mrf.mxu1 }
0x1692   : > { %9738 = vrot.lane.b32.xlu0 %v13017_v57, %s10236_s30  ;;  %9748 = vrot.lane.b32.xlu1 %v9747_v46, %s10237_s20  ;;  %v7890_v4 = vsel %vm612_vm1, %v7874_v13, %v9696_v38  ;;  %v9720_v38 = vunpack.i.l.bf16 %v12798_v50  ;;  %v13032_v50 = vld [vmem:[#allocation13_spill] sm:$0xff] }
0x1693   : > { %v7440_v39 = vpop.f32.mrf.mxu0  ;;  %v7578_v45 = vpop.f32.mrf.mxu1 }
0x1694   : > { %v9752_v22 = vpack.i.bf16 %v7440_v39, %v7437_v37  ;;  %v13027_v37 = vld [vmem:[#allocation2_spill] sm:$0xff] }
0x1695   : > { %v9578_v32 = vpop.f32.mrf.mxu0  ;;  %v9595_v10 = vpop.f32.mrf.mxu1  ;;  %v7873_v44 = vsel %vm3817_vm3, %v13027_v37, %v9685_v36 }
0x1696   : > { %9763 = vrot.lane.b32.xlu1 %v13018_v58, %s10235_s28  ;;  %9753 = vrot.lane.b32.xlu0 %v9752_v22, %s10237_s20  ;;  %v7889_v29 = vsel %vm612_vm1, %v7873_v44, %v9695_v2  ;;  %v7888_v22 = vsel %vm612_vm1, %v7872_v63, %v9691_v16  ;;  %v9701_v58 = vunpack.i.h.bf16 %v9699_v1  ;;  %v9726_v2 = vunpack.i.h.bf16 %v12796_v59 }
0x1697   : > { %v7531_v15 = vpop.f32.mrf.mxu0  ;;  %v7581_v21 = vpop.f32.mrf.mxu1  ;;  %v9725_v16 = vunpack.i.l.bf16 %v12796_v59  ;;  %v7880_v44 = vsel %vm3817_vm3, %v13032_v50, %v9721_v48  ;;  %v13033_v59 = vld [vmem:[#allocation11_spill] sm:$0xff] }
0x1698   : > { %v9767_v20 = vpack.i.bf16 %v7581_v21, %v7578_v45  ;;  %v7887_v45 = vsel %vm612_vm1, %v7871_v14, %v9690_v26 }
0x1699   : > { %v9589_v25 = vpop.f32.mrf.mxu0  ;;  %v9596_v31 = vpop.f32.mrf.mxu1 }
0x169a   : > { %9758 = vrot.lane.b32.xlu0 %v13019_v30, %s10235_s28  ;;  %9768 = vrot.lane.b32.xlu1 %v9767_v20, %s10237_s20  ;;  %v9700_v20 = vunpack.i.l.bf16 %v9699_v1  ;;  %v9706_v25 = vunpack.i.h.bf16 %v9704_v40  ;;  %v9705_v31 = vunpack.i.l.bf16 %v9704_v40 }
0x169b   : > { %v7534_v41 = vpop.f32.mrf.mxu0 }
0x169c   : > { %v9772_v12 = vpack.i.bf16 %v7534_v41, %v7531_v15 }
0x169d   : > { %v9590_v53 = vpop.f32.mrf.mxu0 }
0x169e   : > { %9783 = vrot.lane.b32.xlu1 %v13020_v18, %s10236_s30  ;;  %9773 = vrot.lane.b32.xlu0 %v9772_v12, %s10237_s20  ;;  %v9716_v53 = vunpack.i.h.bf16 %v9714_v56  ;;  %v9715_v18 = vunpack.i.l.bf16 %v9714_v56 }
0x16a2   : > { %9778 = vrot.lane.b32.xlu0 %v13023_v23, %s10236_s30  ;;  %v9710_v23 = vunpack.i.l.bf16 %v9709_v49 }
0x16d0   : > { %v7672_v24 = vpop.f32.mrf.mxu1 }
0x16d2   : > { %v9607_v33 = vpop.f32.mrf.mxu1 }
0x16d4   : > { %v7625_v6 = vpop.f32.mrf.mxu0  ;;  %v7675_v51 = vpop.f32.mrf.mxu1 }
0x16d5   : > { %v9792_v28 = vpack.i.bf16 %v7675_v51, %v7672_v24 }
0x16d6   : > { %v9601_v34 = vpop.f32.mrf.mxu0  ;;  %v9608_v42 = vpop.f32.mrf.mxu1 }
0x16d7   : > { %9793 = vrot.lane.b32.xlu1 %v9792_v28, %s10237_s20  ;;  %v13029_v28 = vld [vmem:[#allocation7_spill] sm:$0xff]  ;;  %v13030_v42 = vld [vmem:[#allocation8_spill] sm:$0xff] }
0x16d8   : > { %v7628_v43 = vpop.f32.mrf.mxu0  ;;  %v7875_v34 = vsel %vm3817_vm3, %v13029_v28, %v9700_v20 }
0x16d9   : > { %v9787_v35 = vpack.i.bf16 %v7628_v43, %v7625_v6  ;;  %v13028_v6 = vld [vmem:[#allocation9_spill] sm:$0xff]  ;;  %v7878_v43 = vsel %vm3817_vm3, %v13030_v42, %v9706_v25  ;;  %v7891_v56 = vsel %vm612_vm1, %v7875_v34, %v9710_v23 }
0x16da   : > { %v9602_v17 = vpop.f32.mrf.mxu0  ;;  %v7876_v51 = vsel %vm3817_vm3, %v13028_v6, %v9701_v58  ;;  %v7894_v27 = vsel %vm612_vm1, %v7878_v43, %v9716_v53  ;;  %v13036_v43 = vld [vmem:[#allocation16_spill] sm:$0xff] }
0x16db   : > { %9788 = vrot.lane.b32.xlu0 %v9787_v35, %s10237_s20  ;;  %v13031_v35 = vld [vmem:[#allocation6_spill] sm:$0xff]  ;;  %v7892_v49 = vsel %vm612_vm1, %v7876_v51, %v9711_v9 }
0x16dc   : > { %v7877_v17 = vsel %vm3817_vm3, %v13031_v35, %v9705_v31 }
0x16dd   : > { %v7893_v47 = vsel %vm612_vm1, %v7877_v17, %v9715_v18  ;;  %v13037_v17 = vld [vmem:[#allocation14_spill] sm:$0xff] }
0x16fc   : > { %v9729_v52 = vpop.permute.xlu1 %9728 }
0x16fd   : > { %v9731_v62 = vunpack.i.h.bf16 %v9729_v52  ;;  %v9730_v61 = vunpack.i.l.bf16 %v9729_v52 }
0x16ff   : > { %v7906_v32 = vsel %vm7903_vm4, %v7889_v29, %v9730_v61  ;;  %v7907_v10 = vsel %vm7903_vm4, %v7890_v4, %v9731_v62  ;;  %v13034_v29 = vld [vmem:[#allocation12_spill] sm:$0xff] }
0x1700   : > { %v12800_v11 = vpop.permute.xlu1 %9743  ;;  %v9734_v46 = vpop.permute.xlu0 %9733  ;;  %v7921_v55 = vpack.c.bf16 %v7907_v10, %v7906_v32  ;;  %v7882_v4 = vsel %vm3817_vm3, %v13034_v29, %v9726_v2  ;;  %v12891_v29 = vld [vmem:[%s12973_s9] ss:$0 sm:$0xff] }
0x1701   : > { %v9736_v57 = vunpack.i.h.bf16 %v9734_v46  ;;  %v9735_v39 = vunpack.i.l.bf16 %v9734_v46  ;;  %v9746_v60 = vunpack.i.h.bf16 %v12800_v11  ;;  %v9745_v63 = vunpack.i.l.bf16 %v12800_v11 }
0x1702   : > { %v7879_v46 = vsel %vm3817_vm3, %v13033_v59, %v9720_v38 }
0x1703   : > { %v7905_v15 = vsel %vm7903_vm4, %v7888_v22, %v9736_v57  ;;  %v7904_v21 = vsel %vm7903_vm4, %v7887_v45, %v9735_v39  ;;  %v13035_v57 = vld [vmem:[#allocation10_spill] sm:$0xff]  ;;  %v7898_v22 = vsel %vm612_vm1, %v7882_v4, %v9746_v60 }
0x1704   : > { %v7920_v30 = vpack.c.bf16 %v7905_v15, %v7904_v21  ;;  %v9739_v41 = vpop.permute.xlu0 %9738  ;;  %v9749_v12 = vpop.permute.xlu1 %9748  ;;  %v7881_v11 = vsel %vm3817_vm3, %v13035_v57, %v9725_v16  ;;  %v9817_v60 = vld [vmem:[%s12974_s10] sm:$0xff]  }
0x1705   : > { %v9751_v24 = vunpack.i.h.bf16 %v9749_v12  ;;  %v9750_v33 = vunpack.i.l.bf16 %v9749_v12  ;;  %v9741_v14 = vunpack.i.h.bf16 %v9739_v41  ;;  %v9740_v7 = vunpack.i.l.bf16 %v9739_v41 }
0x1706   : > { %9613 = vmatprep.mubr.msk.bf16.mxu0 %vm1135_vm2, %v7920_v30  ;;  %v7897_v45 = vsel %vm612_vm1, %v7881_v11, %v9745_v63 }
0x1707   : > { %9614 = vmatmul.mubr.msk.bf16.vlgmr.msra.gmra.mxu0 %vm1135_vm2, %v7921_v55  ;;  %v7910_v52 = vsel %vm7903_vm4, %v7893_v47, %v9750_v33  ;;  %v7911_v8 = vsel %vm7903_vm4, %v7894_v27, %v9751_v24  ;;  %v7896_v58 = vsel %vm612_vm1, %v7880_v44, %v9741_v14  ;;  %v7895_v15 = vsel %vm612_vm1, %v7879_v46, %v9740_v7  ;;  %v13038_v47 = vld [vmem:[#allocation17_spill] sm:$0xff] }
0x1708   : > { %v9754_v0 = vpop.permute.xlu0 %9753  ;;  %v9764_v5 = vpop.permute.xlu1 %9763  ;;  %v7923_v3 = vpack.c.bf16 %v7911_v8, %v7910_v52 }
0x1709   : > { %v9756_v40 = vunpack.i.h.bf16 %v9754_v0  ;;  %v9755_v1 = vunpack.i.l.bf16 %v9754_v0  ;;  %v9766_v18 = vunpack.i.h.bf16 %v9764_v5  ;;  %v9765_v55 = vunpack.i.l.bf16 %v9764_v5 }
0x170b   : > { %v7909_v54 = vsel %vm7903_vm4, %v7892_v49, %v9756_v40  ;;  %v7908_v36 = vsel %vm7903_vm4, %v7891_v56, %v9755_v1  ;;  %v7886_v35 = vsel %vm3817_vm3, %v13036_v43, %v9766_v18  ;;  %v7885_v0 = vsel %vm3817_vm3, %v13037_v17, %v9765_v55  ;;  %v13039_v40 = vld [vmem:[#allocation15_spill] sm:$0xff] }
0x170c   : > { %v7922_v26 = vpack.c.bf16 %v7909_v54, %v7908_v36  ;;  %v9759_v62 = vpop.permute.xlu0 %9758  ;;  %v9769_v61 = vpop.permute.xlu1 %9768 }
0x170d   : > { %v9771_v13 = vunpack.i.h.bf16 %v9769_v61  ;;  %v9770_v37 = vunpack.i.l.bf16 %v9769_v61  ;;  %v9761_v9 = vunpack.i.h.bf16 %v9759_v62  ;;  %v9760_v23 = vunpack.i.l.bf16 %v9759_v62  ;;  %v9816_v61 = vld [vmem:[%s12974_s10 + $0x8] sm:$0xff]  }
0x170e   : > { %9617 = vmatprep.mubr.msk.bf16.mxu0 %vm1135_vm2, %v7922_v26  ;;  %9630 = vmatpush3.bf16.msra.mxu1 %v9816_v61 }
0x170f   : > { %9618 = vmatmul.mubr.msk.bf16.gmra.mxu0 %vm1135_vm2, %v7923_v3  ;;  %v7914_v21 = vsel %vm7903_vm4, %v7897_v45, %v9770_v37  ;;  %v7915_v20 = vsel %vm7903_vm4, %v7898_v22, %v9771_v13  ;;  %v7884_v27 = vsel %vm3817_vm3, %v13038_v47, %v9761_v9  ;;  %v7883_v5 = vsel %vm3817_vm3, %v13039_v40, %v9760_v23 }
0x1710   : > { %v9774_v39 = vpop.permute.xlu0 %9773  ;;  %v7925_v41 = vpack.c.bf16 %v7915_v20, %v7914_v21  ;;  %v9784_v12 = vpop.permute.xlu1 %9783  ;;  %9631 = vmatprep.subr.bf16.mxu1 %v13003_v19 }
0x1711   : > { %v9776_v32 = vunpack.i.h.bf16 %v9774_v39  ;;  %v9775_v10 = vunpack.i.l.bf16 %v9774_v39  ;;  %v9786_v33 = vunpack.i.h.bf16 %v9784_v12  ;;  %v9785_v6 = vunpack.i.l.bf16 %v9784_v12 }
0x1712   : > { %9632 = vmatpush3.bf16.msra.mxu1 %v9817_v60 }
0x1713   : > { %v7913_v25 = vsel %vm7903_vm4, %v7896_v58, %v9776_v32  ;;  %v7912_v31 = vsel %vm7903_vm4, %v7895_v15, %v9775_v10  ;;  %v7901_v56 = vsel %vm612_vm1, %v7885_v0, %v9785_v6  ;;  %v7902_v49 = vsel %vm612_vm1, %v7886_v35, %v9786_v33  ;;  %9637 = vmatprep.subr.bf16.mxu1 %v13003_v19 }
0x1714   : > { %v7924_v30 = vpack.c.bf16 %v7913_v25, %v7912_v31  ;;  %v9779_v53 = vpop.permute.xlu0 %9778 }
0x1715   : > { %v9781_v51 = vunpack.i.h.bf16 %v9779_v53  ;;  %v9780_v28 = vunpack.i.l.bf16 %v9779_v53 }
0x1716   : > { %9621 = vmatprep.mubr.msk.bf16.mxu0 %vm1135_vm2, %v7924_v30 }
0x1717   : > { %9622 = vmatmul.mubr.msk.bf16.gmra.mxu0 %vm1135_vm2, %v7925_v41  ;;  %v7900_v48 = vsel %vm612_vm1, %v7884_v27, %v9781_v51  ;;  %v7899_v54 = vsel %vm612_vm1, %v7883_v5, %v9780_v28 }
0x1749   : > { %v9794_v24 = vpop.permute.xlu1 %9793 }
0x174a   : > { %v9796_v34 = vunpack.i.h.bf16 %v9794_v24  ;;  %v9795_v42 = vunpack.i.l.bf16 %v9794_v24 }
0x174c   : > { %v7918_v36 = vsel %vm7903_vm4, %v7901_v56, %v9795_v42  ;;  %v7919_v38 = vsel %vm7903_vm4, %v7902_v49, %v9796_v34 }
0x174d   : > { %v9789_v1 = vpop.permute.xlu0 %9788  ;;  %v7927_v62 = vpack.c.bf16 %v7919_v38, %v7918_v36 }
0x174e   : > { %v9791_v52 = vunpack.i.h.bf16 %v9789_v1  ;;  %v9790_v8 = vunpack.i.l.bf16 %v9789_v1 }
0x1750   : > { %v7917_v2 = vsel %vm7903_vm4, %v7900_v48, %v9791_v52  ;;  %v7916_v16 = vsel %vm7903_vm4, %v7899_v54, %v9790_v8 }
0x1751   : > { %v7926_v26 = vpack.c.bf16 %v7917_v2, %v7916_v16 }
0x1753   : > { %9625 = vmatprep.mubr.msk.bf16.mxu0 %vm1135_vm2, %v7926_v26 }
0x1754   : > { %9626 = vmatmul.mubr.msk.bf16.gmra.mxu0 %vm1135_vm2, %v7927_v62 }
0x17c7   : > { %v9615_v63 = vpop.f32.mrf.mxu0 }
0x17c8   : > { %v8018_v39 = vadd.f32 %v9615_v63, %v12891_v29 }
0x17c9   : > { %v8009_v3 = vpop.f32.mrf.mxu0 }
0x17ca   : > { %v8010_v22 = vadd.f32 %v12891_v29, %v8009_v3  ;;  %v8081_v21 = vsel %vm1135_vm2, %v8018_v39, 0.0 }
0x17cb   : > { %v9616_v14 = vpop.f32.mrf.mxu0 }
0x17cc   : > { %v8021_v57 = vadd.f32 %v9616_v14, %v12891_v29  ;;  %v8072_v30 = vsel %vm1135_vm2, %v8010_v22, 0.0 }
0x17cd   : > { %v8012_v7 = vpop.f32.mrf.mxu0 }
0x17ce   : > { %v8013_v11 = vadd.f32 %v12891_v29, %v8012_v7  ;;  %v8082_v10 = vsel %vm1135_vm2, %v8021_v57, 0.0 }
0x17cf   : > { %v9619_v13 = vpop.f32.mrf.mxu0  ;;  %v8083_v41 = vadd.f32 %v8082_v10, %v8081_v21 }
0x17d0   : > { %v8073_v15 = vsel %vm1135_vm2, %v8013_v11, 0.0  ;;  %v8034_v53 = vadd.f32 %v9619_v13, %v12891_v29 }
0x17d1   : > { %v8025_v37 = vpop.f32.mrf.mxu0  ;;  %v8074_v12 = vadd.f32 %v8073_v15, %v8072_v30  ;;  %v8084_v6 = vrot.slane %v8083_v41, 4 }
0x17d2   : > { %v8026_v58 = vadd.f32 %v12891_v29, %v8025_v37  ;;  %v8099_v28 = vsel %vm1135_vm2, %v8034_v53, 0.0 }
0x17d3   : > { %v9620_v50 = vpop.f32.mrf.mxu0  ;;  %v8075_v51 = vrot.slane %v8074_v12, 4  ;;  %v8085_v47 = vadd.f32 %v8084_v6, %v8083_v41 }
0x17d4   : > { %v8037_v20 = vadd.f32 %v9620_v50, %v12891_v29  ;;  %v8090_v18 = vsel %vm1135_vm2, %v8026_v58, 0.0 }
0x17d5   : > { %v8028_v44 = vpop.f32.mrf.mxu0  ;;  %v8076_v27 = vadd.f32 %v8075_v51, %v8074_v12  ;;  %v8086_v8 = vrot.slane %v8085_v47, 2 }
0x17d6   : > { %v8029_v45 = vadd.f32 %v12891_v29, %v8028_v44  ;;  %v8100_v23 = vsel %vm1135_vm2, %v8037_v20, 0.0 }
0x17d7   : > { %v9623_v59 = vpop.f32.mrf.mxu0  ;;  %v8101_v42 = vadd.f32 %v8100_v23, %v8099_v28  ;;  %v8077_v52 = vrot.slane %v8076_v27, 2  ;;  %v8087_v16 = vadd.f32 %v8086_v8, %v8085_v47 }
0x17d8   : > { %v8091_v25 = vsel %vm1135_vm2, %v8029_v45, 0.0  ;;  %v8050_v35 = vadd.f32 %v9623_v59, %v12891_v29 }
0x17d9   : > { %v8041_v46 = vpop.f32.mrf.mxu0  ;;  %v8092_v9 = vadd.f32 %v8091_v25, %v8090_v18  ;;  %v8102_v40 = vrot.slane %v8101_v42, 4  ;;  %v8078_v2 = vadd.f32 %v8077_v52, %v8076_v27  ;;  %v8088_v14 = vrot.slane %v8087_v16, 1 }
0x17da   : > { %v8042_v55 = vadd.f32 %v12891_v29, %v8041_v46  ;;  %v8117_v1 = vsel %vm1135_vm2, %v8050_v35, 0.0 }
0x17db   : > { %v9624_v4 = vpop.f32.mrf.mxu0  ;;  %v8093_v43 = vrot.slane %v8092_v9, 4  ;;  %v8103_v48 = vadd.f32 %v8102_v40, %v8101_v42  ;;  %v8079_v3 = vrot.slane %v8078_v2, 1  ;;  %v8089_v39 = vadd.f32 %v8088_v14, %v8087_v16 }
0x17dc   : > { %v8053_v33 = vadd.f32 %v9624_v4, %v12891_v29  ;;  %v8108_v34 = vsel %vm1135_vm2, %v8042_v55, 0.0 }
0x17dd   : > { %v8044_v32 = vpop.f32.mrf.mxu0  ;;  %v8094_v5 = vadd.f32 %v8093_v43, %v8092_v9  ;;  %v8104_v26 = vrot.slane %v8103_v48, 2  ;;  %v8080_v4 = vadd.f32 %v8079_v3, %v8078_v2  ;;  %v8146_v9 = vmul.f32 0.0625, %v8089_v39  ;;  %v8659_v39 = vld [vmem:[%s12975_s11] ss:$0 sm:$0xff] }
0x17de   : > { %v8045_v31 = vadd.f32 %v12891_v29, %v8044_v32  ;;  %v8118_v0 = vsel %vm1135_vm2, %v8053_v33, 0.0 }
0x17df   : > { %v8119_v49 = vadd.f32 %v8118_v0, %v8117_v1  ;;  %v8095_v54 = vrot.slane %v8094_v5, 2  ;;  %v8105_v7 = vadd.f32 %v8104_v26, %v8103_v48  ;;  %v8154_v43 = vpack.c.bf16 %v8146_v9, %v8146_v9 }
0x17e0   : > { %v8109_v24 = vsel %vm1135_vm2, %v8045_v31, 0.0  ;;  %v8145_v31 = vmul.f32 0.0625, %v8080_v4 }
0x17e1   : > { %v8110_v17 = vadd.f32 %v8109_v24, %v8108_v34  ;;  %v8120_v38 = vrot.slane %v8119_v49, 4  ;;  %v8096_v62 = vadd.f32 %v8095_v54, %v8094_v5  ;;  %v8106_v45 = vrot.slane %v8105_v7, 1 }
0x17e2   : > { %v8153_v51 = vpack.c.bf16 %v8145_v31, %v8145_v31  ;;  %v8663_v31 = vld [vmem:[%s12977_s13] ss:$0 sm:$0xff] }
0x17e3   : > { %v8111_v56 = vrot.slane %v8110_v17, 4  ;;  %v8121_v60 = vadd.f32 %v8120_v38, %v8119_v49  ;;  %v8097_v13 = vrot.slane %v8096_v62, 1  ;;  %v8107_v23 = vadd.f32 %v8106_v45, %v8105_v7 }
0x17e4   : > { %v8180_v27 = vunpack.c.l.b16 %v8153_v51  ;;  %v8181_v49 = vunpack.c.l.b16 %v8154_v43 }
0x17e5   : > { %v8112_v36 = vadd.f32 %v8111_v56, %v8110_v17  ;;  %v8122_v44 = vrot.slane %v8121_v60, 2  ;;  %v8098_v22 = vadd.f32 %v8097_v13, %v8096_v62  ;;  %v8148_v35 = vmul.f32 0.0625, %v8107_v23 }
0x17e7   : > { %v8113_v61 = vrot.slane %v8112_v36, 2  ;;  %v8123_v58 = vadd.f32 %v8122_v44, %v8121_v60  ;;  %v8147_v12 = vmul.f32 0.0625, %v8098_v22  ;;  %v8156_v52 = vpack.c.bf16 %v8148_v35, %v8148_v35 }
0x17e9   : > { %v8114_v37 = vadd.f32 %v8113_v61, %v8112_v36  ;;  %v8124_v24 = vrot.slane %v8123_v58, 1  ;;  %v8155_v28 = vpack.c.bf16 %v8147_v12, %v8147_v12  ;;  %v8189_v36 = vsel %vm8188_vm5, %v8181_v49, %v8180_v27 }
0x17ea   : > { %v8183_v62 = vunpack.c.l.b16 %v8156_v52 }
0x17eb   : > { %v8115_v32 = vrot.slane %v8114_v37, 1  ;;  %v8125_v17 = vadd.f32 %v8124_v24, %v8123_v58  ;;  %v8182_v40 = vunpack.c.l.b16 %v8155_v28 }
0x17ed   : > { %v8116_v53 = vadd.f32 %v8115_v32, %v8114_v37  ;;  %v8150_v8 = vmul.f32 0.0625, %v8125_v17  ;;  %v8191_v38 = vsel %vm8190_vm6, %v8182_v40, %v8189_v36 }
0x17ef   : > { %v8149_v34 = vmul.f32 0.0625, %v8116_v53  ;;  %v8158_v61 = vpack.c.bf16 %v8150_v8, %v8150_v8 }
0x17f1   : > { %v8157_v5 = vpack.c.bf16 %v8149_v34, %v8149_v34  ;;  %v8185_v13 = vunpack.c.l.b16 %v8158_v61 }
0x17f3   : > { %v8184_v2 = vunpack.c.l.b16 %v8157_v5 }
0x1814   : > { %v9627_v63 = vpop.f32.mrf.mxu0 }
0x1815   : > { %v8066_v59 = vadd.f32 %v9627_v63, %v12891_v29  ;;  %v8193_v63 = vsel %vm8192_vm7, %v8183_v62, %v8191_v38 }
0x1816   : > { %v8057_v50 = vpop.f32.mrf.mxu0  ;;  %v8195_v14 = vsel %vm8194_vm8, %v8184_v2, %v8193_v63 }
0x1817   : > { %v8058_v57 = vadd.f32 %v12891_v29, %v8057_v50  ;;  %v8135_v15 = vsel %vm1135_vm2, %v8066_v59, 0.0  ;;  %v8197_v44 = vsel %vm8196_vm9, %v8185_v13, %v8195_v14 }
0x1818   : > { %v9628_v46 = vpop.f32.mrf.mxu0 }
0x1819   : > { %v8069_v11 = vadd.f32 %v9628_v46, %v12891_v29  ;;  %v8126_v30 = vsel %vm1135_vm2, %v8058_v57, 0.0  ;;  %v9818_v57 = vld [vmem:[%s12976_s12 + $0x8] sm:$0xff]  }
0x181a   : > { %v8060_v10 = vpop.f32.mrf.mxu0 }
0x181b   : > { %v8136_v21 = vsel %vm1135_vm2, %v8069_v11, 0.0  ;;  %v8061_v20 = vadd.f32 %v12891_v29, %v8060_v10  ;;  %v9819_v11 = vld [vmem:[%s12976_s12] sm:$0xff]  }
0x181c   : > { %v8137_v25 = vadd.f32 %v8136_v21, %v8135_v15 }
0x181d   : > { %v8127_v41 = vsel %vm1135_vm2, %v8061_v20, 0.0  ;;  %v9820_v20 = vld [vmem:[%s12978_s14 + $0x8] sm:$0xff]  }
0x181e   : > { %v8138_v18 = vrot.slane %v8137_v25, 4  ;;  %v8128_v55 = vadd.f32 %v8127_v41, %v8126_v30 }
0x1820   : > { %v8139_v33 = vadd.f32 %v8138_v18, %v8137_v25  ;;  %v8129_v6 = vrot.slane %v8128_v55, 4  ;;  %v9821_v25 = vld [vmem:[%s12978_s14] sm:$0xff]  }
0x1822   : > { %v8140_v42 = vrot.slane %v8139_v33, 2  ;;  %v8130_v29 = vadd.f32 %v8129_v6, %v8128_v55 }
0x1824   : > { %v8141_v0 = vadd.f32 %v8140_v42, %v8139_v33  ;;  %v8131_v47 = vrot.slane %v8130_v29, 2 }
0x1826   : > { %v8142_v1 = vrot.slane %v8141_v0, 1  ;;  %v8132_v56 = vadd.f32 %v8131_v47, %v8130_v29 }
0x1828   : > { %v8143_v48 = vadd.f32 %v8142_v1, %v8141_v0  ;;  %v8133_v54 = vrot.slane %v8132_v56, 1 }
0x182a   : > { %v8152_v16 = vmul.f32 0.0625, %v8143_v48  ;;  %v8134_v26 = vadd.f32 %v8133_v54, %v8132_v56 }
0x182c   : > { %v8151_v60 = vmul.f32 0.0625, %v8134_v26  ;;  %v8160_v3 = vpack.c.bf16 %v8152_v16, %v8152_v16 }
0x182e   : > { %v8159_v7 = vpack.c.bf16 %v8151_v60, %v8151_v60  ;;  %v8187_v50 = vunpack.c.l.b16 %v8160_v3 }
0x1830   : > { %v8186_v37 = vunpack.c.l.b16 %v8159_v7 }
0x1832   : > { %v8199_v59 = vsel %vm8198_vm10, %v8186_v37, %v8197_v44 }
0x1833   : > { %v8201_v46 = vsel %vm8200_vm11, %v8187_v50, %v8199_v59 }
0x1834   : > { %v8202_v4 = vpack.c.b16 %v8201_v46, %v8201_v46 }
0x1836   : > { %9634 = vmatmul.mubr.msk.bf16.vlgmr.msra.gmra.mxu1 %vm1135_vm2, %v8202_v4 }
0x1837   : > { %9641 = vmatprep.mubr.msk.bf16.mxu1 %vm10223_vm0, %v13003_v19  ;;  %9638 = vmatpush3.bf16.msra.mxu1 %v9818_v57 }
0x1838   : > { %9639 = vmatprep.subr.bf16.mxu1 %v13003_v19 }
0x183b   : > { %9640 = vmatpush3.bf16.msra.mxu1 %v9819_v11 }
0x183c   : > { %9645 = vmatprep.subr.bf16.mxu1 %v13003_v19 }
0x18f6   : > { %v8252_v45 = vpop.f32.mrf.mxu1 }
0x18f7   : > { %v8253_v22 = vadd.f32 %v8659_v39, %v8252_v45 }
0x18f8   : > { %v9635_v32 = vpop.f32.mrf.mxu1 }
0x18f9   : > { %v8258_v10 = vmax.f32 %v8253_v22, 0.0 }
0x18fa   : > { %v8255_v58 = vpop.f32.mrf.mxu1 }
0x18fb   : > { %v8259_v15 = vpack.c.bf16 %v8258_v10, %v8258_v10 }
0x18fc   : > { %v9636_v21 = vpop.f32.mrf.mxu1 }
0x18fd   : > { %9642 = vmatmul.mubr.msk.bf16.vlgmr.msra.gmra.mxu1 %vm1135_vm2, %v8259_v15 }
0x18fe   : > { %9649 = vmatprep.mubr.msk.bf16.mxu1 %vm10223_vm0, %v13003_v19  ;;  %9646 = vmatpush3.bf16.msra.mxu1 %v9820_v20 }
0x18ff   : > { %9647 = vmatprep.subr.bf16.mxu1 %v13003_v19  ;;  %v8667_v19 = vld [vmem:[%s12979_s15] ss:$0 sm:$0xff] }
0x1902   : > { %9648 = vmatpush3.bf16.msra.mxu1 %v9821_v25 }
0x19bd   : > { %v8320_v30 = vpop.f32.mrf.mxu1 }
0x19be   : > { %v8321_v41 = vadd.f32 %v8663_v31, %v8320_v30 }
0x19bf   : > { %v9643_v12 = vpop.f32.mrf.mxu1 }
0x19c0   : > { %v8326_v53 = vmax.f32 %v8321_v41, 0.0 }
0x19c1   : > { %v8323_v18 = vpop.f32.mrf.mxu1 }
0x19c2   : > { %v8327_v55 = vpack.c.bf16 %v8326_v53, %v8326_v53 }
0x19c3   : > { %v9644_v9 = vpop.f32.mrf.mxu1 }
0x19c4   : > { %9650 = vmatmul.mubr.msk.bf16.vlgmr.msra.gmra.mxu1 %vm1135_vm2, %v8327_v55 }
0x1a84   : > { %v8388_v23 = vpop.f32.mrf.mxu1 }
0x1a85   : > { %v8389_v24 = vadd.f32 %v8667_v19, %v8388_v23 }
0x1a86   : > { %v9651_v33 = vpop.f32.mrf.mxu1 }
0x1a87   : > { %8394 = vst [vmem:[%s549_s18] sm:$0xff] %v8389_v24 }
0x1a88   : > { %v8391_v6 = vpop.f32.mrf.mxu1 }
0x1a8a   : > { %v9652_v51 = vpop.f32.mrf.mxu1 }
0x1a8b PF: > { %s26_s21 = sadd.s32 1, %s10220_s21  }
0x1a8c   : > { %p23_p5 = scmp.ge.s32.totalorder %s26_s21, 4  }
0x1a8e   :  { %25 = sbr.rel (!%p23_p5) target bundleno = 2 (0x2), region = 125 }

</bundles_post_ra>
